<compile_context>
chip_gen: v7x
topology: tpu7x:2x2x1
jax: 0.10.0
libtpu: 0.0.40
codegen_flags: <defaults>
</compile_context>

<pallas_src>
import math
from functools import partial

import jax
import jax.numpy as jnp
from jax import lax
from jax.experimental import pallas as pl
from jax.experimental.pallas import tpu as pltpu


DP = 128  # persistent lane-dense padded channel width of the token path


def _round_up(x, m):
    return (x + m - 1) // m * m


def _select_tuning():
    """Generation-aware tile cap / scoped-VMEM budget."""
    cap, vmem = 256, 32 * 1024 * 1024            # safe default (v7x: 64 MiB VMEM)
    try:
        info = pltpu.get_tpu_info()
        if int(getattr(info, "vmem_capacity_bytes", 0)) >= 96 * 1024 * 1024:
            cap, vmem = 512, 64 * 1024 * 1024    # v5e / v6e: 128 MiB physical VMEM
    except Exception:
        pass
    return cap, vmem


TILE_CAP, VMEM_LIMIT = _select_tuning()


def _cparams(sem):
    return pltpu.CompilerParams(dimension_semantics=sem,
                                vmem_limit_bytes=VMEM_LIMIT)


# ----------------------------------------------------------------------------
# In-kernel helpers
# ----------------------------------------------------------------------------
def _layernorm(x, g, bt, k_real):
    """Two-pass LayerNorm over the first k_real columns (padded cols are 0)."""
    inv_k = 1.0 / float(k_real)
    mu = jnp.sum(x, axis=-1, keepdims=True) * inv_k
    cols = lax.broadcasted_iota(jnp.int32, x.shape, x.ndim - 1)
    xc = jnp.where(cols < k_real, x - mu, 0.0)
    var = jnp.sum(xc * xc, axis=-1, keepdims=True) * inv_k
    return xc * lax.rsqrt(var + 1e-5) * g + bt


# ----------------------------------------------------------------------------
# Pallas kernels
# ----------------------------------------------------------------------------
def _linear_kernel(x_ref, w_ref, b_ref, o_ref, *, relu):
    y = jnp.dot(x_ref[...], w_ref[...], preferred_element_type=jnp.float32)
    y = y + b_ref[...]
    if relu:
        y = jnp.maximum(y, 0.0)
    o_ref[...] = y.astype(o_ref.dtype)


def pallas_linear(x, w, b, relu=False, out_dtype=jnp.bfloat16):
    """o = x @ w + b.  K and N are small here (<=512) and held whole; M tiled."""
    M, K = x.shape
    Kw, N = w.shape
    assert K == Kw
    TM = min(TILE_CAP, _round_up(M, 16))
    Mp = _round_up(M, TM)
    xp = jnp.pad(x, ((0, Mp - M), (0, 0))).astype(jnp.bfloat16)
    out = pl.pallas_call(
        partial(_linear_kernel, relu=relu),
        out_shape=jax.ShapeDtypeStruct((Mp, N), out_dtype),
        grid=(Mp // TM,),
        in_specs=[pl.BlockSpec((TM, K), lambda i: (i, 0)),
                  pl.BlockSpec((K, N), lambda i: (0, 0)),
                  pl.BlockSpec((1, N), lambda i: (0, 0))],
        out_specs=pl.BlockSpec((TM, N), lambda i: (i, 0)),
        compiler_params=_cparams(("parallel",)),
    )(xp, w, b)
    return out[:M]


def _ln_linear_kernel(x_ref, g_ref, bt_ref, w_ref, b_ref, o_ref, *, k_real):
    xn = _layernorm(x_ref[...].astype(jnp.float32), g_ref[...], bt_ref[...],
                    k_real)
    y = jnp.dot(xn.astype(jnp.bfloat16), w_ref[...],
                preferred_element_type=jnp.float32)
    o_ref[...] = (y + b_ref[...]).astype(o_ref.dtype)


def pallas_ln_linear(x, g, bt, w, b, k_real, out_dtype=jnp.bfloat16):
    """Fused pre-LayerNorm + matmul (K already lane-dense / padded)."""
    M, K = x.shape
    _, N = w.shape
    TM = min(TILE_CAP, _round_up(M, 16))
    Mp = _round_up(M, TM)
    xp = jnp.pad(x, ((0, Mp - M), (0, 0)))
    out = pl.pallas_call(
        partial(_ln_linear_kernel, k_real=k_real),
        out_shape=jax.ShapeDtypeStruct((Mp, N), out_dtype),
        grid=(Mp // TM,),
        in_specs=[pl.BlockSpec((TM, K), lambda i: (i, 0)),
                  pl.BlockSpec((1, K), lambda i: (0, 0)),
                  pl.BlockSpec((1, K), lambda i: (0, 0)),
                  pl.BlockSpec((K, N), lambda i: (0, 0)),
                  pl.BlockSpec((1, N), lambda i: (0, 0))],
        out_specs=pl.BlockSpec((TM, N), lambda i: (i, 0)),
        compiler_params=_cparams(("parallel",)),
    )(xp, g, bt, w, b)
    return out[:M]


def _mlp_kernel(*refs, ln, k_real):
    if ln:
        x_ref, g_ref, bt_ref, w1_ref, b1_ref, w2_ref, b2_ref, o_ref = refs
        x = _layernorm(x_ref[...].astype(jnp.float32), g_ref[...], bt_ref[...],
                       k_real)
    else:
        x_ref, w1_ref, b1_ref, w2_ref, b2_ref, o_ref = refs
        x = x_ref[...].astype(jnp.float32)
    h = jnp.dot(x.astype(jnp.bfloat16), w1_ref[...],
                preferred_element_type=jnp.float32)
    h = jnp.maximum(h + b1_ref[...], 0.0)
    y = jnp.dot(h.astype(jnp.bfloat16), w2_ref[...],
                preferred_element_type=jnp.float32)
    o_ref[...] = (y + b2_ref[...]).astype(o_ref.dtype)


def pallas_mlp(x, w1, b1, w2, b2, *, ln=False, g=None, bt=None, k_real=None,
               out_dtype=jnp.bfloat16):
    """Fused (optional LN) -> relu(x@w1+b1) @ w2 + b2; weights VMEM-resident."""
    M, K = x.shape
    _, H = w1.shape
    _, N = w2.shape
    TM = min(TILE_CAP, _round_up(M, 16))
    Mp = _round_up(M, TM)
    xp = jnp.pad(x, ((0, Mp - M), (0, 0)))
    args = [xp]
    in_specs = [pl.BlockSpec((TM, K), lambda i: (i, 0))]
    if ln:
        args += [g, bt]
        in_specs += [pl.BlockSpec((1, K), lambda i: (0, 0)),
                     pl.BlockSpec((1, K), lambda i: (0, 0))]
    args += [w1, b1, w2, b2]
    in_specs += [pl.BlockSpec((K, H), lambda i: (0, 0)),
                 pl.BlockSpec((1, H), lambda i: (0, 0)),
                 pl.BlockSpec((H, N), lambda i: (0, 0)),
                 pl.BlockSpec((1, N), lambda i: (0, 0))]
    # TODO(synk): on v7x mark the constant-index weight specs with
    # pipeline_mode=pl.Buffered(1) to drop the redundant second buffer once
    # real FlowFormer dims (d=256, hidden 1024) are used.
    out = pl.pallas_call(
        partial(_mlp_kernel, ln=ln, k_real=k_real),
        out_shape=jax.ShapeDtypeStruct((Mp, N), out_dtype),
        grid=(Mp // TM,),
        in_specs=in_specs,
        out_specs=pl.BlockSpec((TM, N), lambda i: (i, 0)),
        compiler_params=_cparams(("parallel",)),
    )(*args)
    return out[:M]


def _conv_tap_kernel(x_ref, w_ref, b_ref, o_ref, acc_ref, *, relu):
    @pl.when(pl.program_id(1) == 0)
    def _():
        acc_ref[...] = jnp.zeros_like(acc_ref)

    acc_ref[...] += jnp.dot(x_ref[...], w_ref[...],
                            preferred_element_type=jnp.float32)

    @pl.when(pl.program_id(1) == pl.num_programs(1) - 1)
    def _():
        y = acc_ref[...] + b_ref[...]
        if relu:
            y = jnp.maximum(y, 0.0)
        o_ref[...] = y.astype(o_ref.dtype)


def pallas_conv3x3(x, w, b, stride, relu=True):
    """3x3 conv (pad=1) as 9 shifted (M, C) @ (C, N) taps accumulated over an
    'arbitrary' grid axis into an f32 VMEM accumulator (no im2col slab).
    Output keeps its native channel count (no 128-lane padding waste)."""
    B, H, W, C = x.shape
    Cp, N = w.shape[1], w.shape[2]
    Ho = (H + 2 - 3) // stride + 1
    Wo = (W + 2 - 3) // stride + 1
    xp = jnp.pad(x, ((0, 0), (1, 1), (1, 1), (0, Cp - C))).astype(jnp.bfloat16)
    shifted = [xp[:, di:di + stride * Ho:stride, dj:dj + stride * Wo:stride, :]
               for di in range(3) for dj in range(3)]
    M = B * Ho * Wo
    TM = min(TILE_CAP, _round_up(M, 16))
    Mp = _round_up(M, TM)
    taps = jnp.pad(jnp.stack(shifted, 0).reshape(9, M, Cp),
                   ((0, 0), (0, Mp - M), (0, 0)))
    out = pl.pallas_call(
        partial(_conv_tap_kernel, relu=relu),
        out_shape=jax.ShapeDtypeStruct((Mp, N), jnp.bfloat16),
        grid=(Mp // TM, 9),
        in_specs=[pl.BlockSpec((None, TM, Cp), lambda i, t: (t, i, 0)),
                  pl.BlockSpec((None, Cp, N), lambda i, t: (t, 0, 0)),
                  pl.BlockSpec((1, N), lambda i, t: (0, 0))],
        out_specs=pl.BlockSpec((TM, N), lambda i, t: (i, 0)),
        scratch_shapes=[pltpu.VMEM((TM, N), jnp.float32)],
        compiler_params=_cparams(("parallel", "arbitrary")),
    )(taps, w, b)
    return out[:M].reshape(B, Ho, Wo, N)


def _corr_token_kernel(f1_ref, f2_ref, wc_ref, bc_ref, o_ref, acc_ref, *, scale):
    kv = pl.program_id(2)

    @pl.when(kv == 0)
    def _():
        acc_ref[...] = jnp.zeros_like(acc_ref)

    s = lax.dot_general(f1_ref[...], f2_ref[...], (((1,), (1,)), ((), ())),
                        preferred_element_type=jnp.float32) * scale
    acc_ref[...] += jnp.dot(s.astype(jnp.bfloat16), wc_ref[...],
                            preferred_element_type=jnp.float32)

    @pl.when(kv == pl.num_programs(2) - 1)
    def _():
        o_ref[...] = (acc_ref[...] + bc_ref[...]).astype(o_ref.dtype)


def pallas_corr_tokens(f1, f2, w_cost, b_cost, scale):
    """tokens = (f1 @ f2^T * scale) @ w_cost + b_cost, fused so the (B, L, L)
    cost volume never touches HBM."""
    B, L, D = f1.shape
    Dm = w_cost.shape[1]
    TQ = min(TILE_CAP, _round_up(L, 16))
    TK = min(TILE_CAP, _round_up(L, 16))
    Lqp, Lkp = _round_up(L, TQ), _round_up(L, TK)
    f1p = jnp.pad(f1, ((0, 0), (0, Lqp - L), (0, 0)))
    f2p = jnp.pad(f2, ((0, 0), (0, Lkp - L), (0, 0)))
    wcp = jnp.pad(w_cost, ((0, Lkp - L), (0, 0)))   # zero rows for padded keys
    out = pl.pallas_call(
        partial(_corr_token_kernel, scale=scale),
        out_shape=jax.ShapeDtypeStruct((B, Lqp, Dm), jnp.bfloat16),
        grid=(B, Lqp // TQ, Lkp // TK),
        in_specs=[pl.BlockSpec((None, TQ, D), lambda b, i, j: (b, i, 0)),
                  pl.BlockSpec((None, TK, D), lambda b, i, j: (b, j, 0)),
                  pl.BlockSpec((TK, Dm), lambda b, i, j: (j, 0)),
                  pl.BlockSpec((1, Dm), lambda b, i, j: (0, 0))],
        out_specs=pl.BlockSpec((None, TQ, Dm), lambda b, i, j: (b, i, 0)),
        scratch_shapes=[pltpu.VMEM((TQ, Dm), jnp.float32)],
        compiler_params=_cparams(("parallel", "parallel", "arbitrary")),
    )(f1p, f2p, wcp, b_cost)
    return out[:, :L, :]


def _flash_attn_kernel(q_ref, k_ref, v_ref, o_ref, m_sc, l_sc, acc_sc,
                       *, scale, lk_real, tk):
    """Flash attention with online softmax; lane-dense (TQ, 128) state."""
    kv = pl.program_id(2)

    @pl.when(kv == 0)
    def _():
        m_sc[...] = jnp.full_like(m_sc, -jnp.inf)
        l_sc[...] = jnp.zeros_like(l_sc)
        acc_sc[...] = jnp.zeros_like(acc_sc)

    s = lax.dot_general(q_ref[...], k_ref[...], (((1,), (1,)), ((), ())),
                        preferred_element_type=jnp.float32) * scale
    cols = kv * tk + lax.broadcasted_iota(jnp.int32, s.shape, 1)
    s = jnp.where(cols < lk_real, s, -1e30)          # finite mask -> NaN-safe

    m_prev = m_sc[...]                                # lanes all equal
    m_new = jnp.maximum(m_prev, jnp.max(s, axis=-1, keepdims=True))
    alpha = jnp.exp(m_prev - m_new)
    p = jnp.exp(s - m_new[:, 0:1])
    l_sc[...] = alpha * l_sc[...] + jnp.sum(p, axis=-1, keepdims=True)
    acc_sc[...] = alpha * acc_sc[...] + jnp.dot(
        p.astype(jnp.bfloat16), v_ref[...], preferred_element_type=jnp.float32)
    m_sc[...] = m_new

    @pl.when(kv == pl.num_programs(2) - 1)
    def _():
        o_ref[...] = (acc_sc[...] *
                      pl.reciprocal(l_sc[...], approx=True)).astype(o_ref.dtype)


def pallas_attention(q, k, v, scale):
    """q/k/v: (B, L, 128) bf16 (head dim pre-padded to 128 via the QKV weights)."""
    B, Lq, D = q.shape
    _, Lk, _ = k.shape
    TQ = min(TILE_CAP, _round_up(Lq, 16))
    TK = min(TILE_CAP, _round_up(Lk, 16))
    Lqp, Lkp = _round_up(Lq, TQ), _round_up(Lk, TK)
    qp = jnp.pad(q, ((0, 0), (0, Lqp - Lq), (0, 0)))
    kp = jnp.pad(k, ((0, 0), (0, Lkp - Lk), (0, 0)))
    vp = jnp.pad(v, ((0, 0), (0, Lkp - Lk), (0, 0)))
    # TODO(synk): sweep pipeline_mode=pl.Buffered(3) on the k/v specs when the
    # per-step compute is small enough to expose DMA latency.
    out = pl.pallas_call(
        partial(_flash_attn_kernel, scale=scale, lk_real=Lk, tk=TK),
        out_shape=jax.ShapeDtypeStruct((B, Lqp, D), jnp.bfloat16),
        grid=(B, Lqp // TQ, Lkp // TK),
        in_specs=[pl.BlockSpec((None, TQ, D), lambda b, qi, ki: (b, qi, 0)),
                  pl.BlockSpec((None, TK, D), lambda b, qi, ki: (b, ki, 0)),
                  pl.BlockSpec((None, TK, D), lambda b, qi, ki: (b, ki, 0))],
        out_specs=pl.BlockSpec((None, TQ, D), lambda b, qi, ki: (b, qi, 0)),
        scratch_shapes=[pltpu.VMEM((TQ, D), jnp.float32),
                        pltpu.VMEM((TQ, D), jnp.float32),
                        pltpu.VMEM((TQ, D), jnp.float32)],
        compiler_params=_cparams(("parallel", "parallel", "arbitrary")),
    )(qp, kp, vp)
    return out[:, :Lq, :]


# ----------------------------------------------------------------------------
# Parameter init (all lane-dense padding / slot placement done once here)
# ----------------------------------------------------------------------------
def _rand(key, fan_in, shape):
    return jax.random.normal(key, shape, jnp.float32) / math.sqrt(float(fan_in))


def _embed(sub, shape):
    out = jnp.zeros(shape, jnp.float32)
    out = out.at[tuple(slice(0, s) for s in sub.shape)].set(sub)
    return out.astype(jnp.bfloat16)


def init_encoder(key, in_ch, out_dim, out_pad):
    k1, k2, k3, k4 = jax.random.split(key, 4)
    c1 = _round_up(in_ch, 8)

    def conv_w(k, cin_real, cin_pad, cout):
        return _embed(_rand(k, cin_real * 9, (9, cin_real, cout)),
                      (9, cin_pad, cout))

    return {
        "w1": conv_w(k1, in_ch, c1, 16), "b1": jnp.zeros((1, 16), jnp.float32),
        "w2": conv_w(k2, 16, 16, 32),    "b2": jnp.zeros((1, 32), jnp.float32),
        "w3": conv_w(k3, 32, 32, 32),    "b3": jnp.zeros((1, 32), jnp.float32),
        "w4": _embed(_rand(k4, 32, (32, out_dim)), (32, out_pad)),
        "b4": jnp.zeros((1, out_pad), jnp.float32),
    }


def init_attn_layer(key, d):
    ks = jax.random.split(key, 6)
    # q/k/v weights placed in three 128-wide slots so the attention head dim
    # is lane-dense-padded "for free" by the projection itself.
    w_qkv = jnp.zeros((DP, 3 * DP), jnp.float32)
    for idx in range(3):
        w_qkv = w_qkv.at[:d, idx * DP:idx * DP + d].set(_rand(ks[idx], d, (d, d)))
    return {
        "d": d,
        "w_qkv": w_qkv.astype(jnp.bfloat16),
        "b_qkv": jnp.zeros((1, 3 * DP), jnp.float32),
        "wo": _embed(_rand(ks[3], d, (d, d)), (DP, DP)),
        "bo": jnp.zeros((1, DP), jnp.float32),
        "w1": _embed(_rand(ks[4], d, (d, 2 * d)), (DP, DP)),
        "b1": jnp.zeros((1, DP), jnp.float32),
        "w2": _embed(_rand(ks[5], 2 * d, (2 * d, d)), (DP, DP)),
        "b2": jnp.zeros((1, DP), jnp.float32),
        "ln1_g": jnp.pad(jnp.ones((1, d), jnp.float32), ((0, 0), (0, DP - d))),
        "ln1_b": jnp.zeros((1, DP), jnp.float32),
        "ln2_g": jnp.pad(jnp.ones((1, d), jnp.float32), ((0, 0), (0, DP - d))),
        "ln2_b": jnp.zeros((1, DP), jnp.float32),
    }


def init_decoder(key, d_ctx, d_mem):
    ks = jax.random.split(key, 5)
    w_kv = jnp.zeros((DP, 2 * DP), jnp.float32)
    w_kv = w_kv.at[:d_mem, :d_mem].set(_rand(ks[1], d_mem, (d_mem, d_mem)))
    w_kv = w_kv.at[:d_mem, DP:DP + d_mem].set(_rand(ks[2], d_mem, (d_mem, d_mem)))
    return {
        "d_mem": d_mem,
        "wq": _embed(_rand(ks[0], d_ctx, (d_ctx, d_mem)), (DP, DP)),
        "bq": jnp.zeros((1, DP), jnp.float32),
        "w_kv": w_kv.astype(jnp.bfloat16),
        "b_kv": jnp.zeros((1, 2 * DP), jnp.float32),
        "w_fh1": _embed(_rand(ks[3], d_mem, (d_mem, 2 * d_mem)), (DP, DP)),
        "b_fh1": jnp.zeros((1, DP), jnp.float32),
        "w_fh2": _embed(_rand(ks[4], 2 * d_mem, (2 * d_mem, 2)), (DP, DP)),
        "b_fh2": jnp.zeros((1, DP), jnp.float32),
    }


# ----------------------------------------------------------------------------
# FlowFormer components
# ----------------------------------------------------------------------------
def run_encoder(x_nhwc, p):
    """Simplified BasicEncoder: three stride-2 Pallas convs (total /8) + 1x1 proj."""
    x = pallas_conv3x3(x_nhwc, p["w1"], p["b1"], stride=2, relu=True)
    x = pallas_conv3x3(x, p["w2"], p["b2"], stride=2, relu=True)
    x = pallas_conv3x3(x, p["w3"], p["b3"], stride=2, relu=True)
    B, h, w, C = x.shape
    tok = pallas_linear(x.reshape(B * h * w, C), p["w4"], p["b4"])
    return tok.reshape(B, h * w, -1), (h, w)


def cost_transformer_layer(tokens, p):
    """Pre-LN self-attention block; tokens stay in the padded (.., 128) layout."""
    B, L, _ = tokens.shape
    d = p["d"]
    x2d = tokens.reshape(B * L, DP)
    qkv = pallas_ln_linear(x2d, p["ln1_g"], p["ln1_b"], p["w_qkv"], p["b_qkv"],
                           k_real=d).reshape(B, L, 3 * DP)
    q, k, v = qkv[..., :DP], qkv[..., DP:2 * DP], qkv[..., 2 * DP:]
    a = pallas_attention(q, k, v, 1.0 / math.sqrt(d)).reshape(B * L, DP)
    tokens = tokens + pallas_linear(a, p["wo"], p["bo"]).reshape(B, L, DP)
    ffn = pallas_mlp(tokens.reshape(B * L, DP), p["w1"], p["b1"],
                     p["w2"], p["b2"], ln=True, g=p["ln2_g"], bt=p["ln2_b"],
                     k_real=d)
    return tokens + ffn.reshape(B, L, DP)


def memory_encoder(image1, image2, data, context, p, d_feat):
    # TODO(synk): the real MemoryEncoder patchifies the 4D cost volume and runs
    # several latent-cost transformer blocks; here: fused correlation->token
    # projection + one transformer block.
    f1, _ = run_encoder(image1, p["fnet"])
    f2, _ = run_encoder(image2, p["fnet"])
    tokens = pallas_corr_tokens(f1, f2, p["w_cost"], p["b_cost"],
                                1.0 / math.sqrt(d_feat))
    # TODO(synk): data["cost_maps"] (the full (B,L,L) volume) is not stored;
    # this skeleton's decoder never reads it and fusing avoids the HBM round
    # trip -- store a bf16 copy here if the GRU correlation-lookup path is added.
    return cost_transformer_layer(tokens, p["layer"])


def memory_decoder(cost_memory, context, data, p, hw, flow_init=None):
    # TODO(synk): real MemoryDecoder runs iterative GRU refinement and convex
    # upsampling; here: one cross-attention step + fused flow head + x8 upsample.
    B, L, _ = cost_memory.shape
    h, w = hw
    d = p["d_mem"]
    q = pallas_linear(context.reshape(B * L, DP), p["wq"], p["bq"]).reshape(B, L, DP)
    kv = pallas_linear(cost_memory.reshape(B * L, DP), p["w_kv"], p["b_kv"])
    kv = kv.reshape(B, L, 2 * DP)
    k, v = kv[..., :DP], kv[..., DP:]
    a = pallas_attention(q, k, v, 1.0 / math.sqrt(d)).reshape(B * L, DP)
    flow_low = pallas_mlp(a, p["w_fh1"], p["b_fh1"], p["w_fh2"], p["b_fh2"],
                          ln=False, out_dtype=jnp.float32)[:, :2]
    flow_low = flow_low.reshape(B, h, w, 2)
    if flow_init is not None:
        flow_low = flow_low + jnp.transpose(flow_init, (0, 2, 3, 1))
    flow_up = 8.0 * jnp.repeat(jnp.repeat(flow_low, 8, axis=1), 8, axis=2)
    return [jnp.transpose(flow_up, (0, 3, 1, 2))]              # (B, 2, H, W)


class FlowFormerPallas:
    def __init__(self, cfg, key, image_hw):
        self.cfg = cfg
        H, W = image_hw
        L = (H // 8) * (W // 8)
        d_feat, d_mem, d_ctx = 32, 32, 64
        self.d_feat = d_feat
        self.hw = (H // 8, W // 8)
        ks = jax.random.split(key, 6)
        in_ch = 6 if cfg["context_concat"] else 3
        self.ctx_params = init_encoder(ks[0], in_ch, d_ctx, DP)
        self.menc_params = {
            "fnet": init_encoder(ks[1], 3, d_feat, d_feat),
            "w_cost": _embed(_rand(ks[2], L, (L, d_mem)), (L, DP)),
            "b_cost": jnp.zeros((1, DP), jnp.float32),
            "layer": init_attn_layer(ks[3], d_mem),
        }
        self.mdec_params = init_decoder(ks[4], d_ctx, d_mem)

    def __call__(self, image1, image2, output=None, flow_init=None):
        image1 = (2.0 * (image1 / 255.0) - 1.0).astype(jnp.bfloat16)
        image2 = (2.0 * (image2 / 255.0) - 1.0).astype(jnp.bfloat16)
        # Single NCHW->NHWC conversion; everything downstream stays NHWC / 2D.
        im1 = jnp.transpose(image1, (0, 2, 3, 1))
        im2 = jnp.transpose(image2, (0, 2, 3, 1))
        data = {}
        if self.cfg["context_concat"]:
            context, _ = run_encoder(jnp.concatenate([im1, im2], axis=-1),
                                     self.ctx_params)
        else:
            context, _ = run_encoder(im1, self.ctx_params)
        cost_memory = memory_encoder(im1, im2, data, context,
                                     self.menc_params, self.d_feat)
        return memory_decoder(cost_memory, context, data, self.mdec_params,
                              self.hw, flow_init=flow_init)


# ----------------------------------------------------------------------------
if __name__ == "__main__":
    cfg = {"cnet": "basicencoder", "context_concat": False, "pretrain": False}
    key = jax.random.PRNGKey(0)
    k_params, k_img1, k_img2 = jax.random.split(key, 3)

    B, C, H, W = 2, 3, 32, 32
    image1 = jax.random.uniform(k_img1, (B, C, H, W), jnp.float32, 0.0, 255.0)
    image2 = jax.random.uniform(k_img2, (B, C, H, W), jnp.float32, 0.0, 255.0)

    model = FlowFormerPallas(cfg, k_params, (H, W))
    fwd = jax.jit(lambda a, b: model(a, b))
    flow_predictions = fwd(image1, image2)
    flow = jax.block_until_ready(flow_predictions[0])
    assert flow.shape == (B, 2, H, W) and flow.dtype == jnp.float32
    assert bool(jnp.all(jnp.isfinite(flow)))
    print("KERNEL_OK")
</pallas_src>

<mosaic_0001>
module attributes {stable_mosaic.version = 11 : i64} {
  func.func @_conv_tap_kernel(%arg0: i32, %arg1: i32, %arg2: memref<1x256x8xbf16, #tpu.memory_space<vmem>>, %arg3: memref<1x8x16xbf16, #tpu.memory_space<vmem>>, %arg4: memref<1x16xf32, #tpu.memory_space<vmem>>, %arg5: memref<256x16xbf16, #tpu.memory_space<vmem>>, %arg6: memref<256x16xf32, #tpu.memory_space<vmem>>) attributes {dimension_semantics = [#tpu.dimension_semantics<parallel>, #tpu.dimension_semantics<arbitrary>], iteration_bounds = array<i64: 2, 9>, scalar_prefetch = 0 : i64, scratch_operands = 1 : i64, tpu.core_type = #tpu.core_type<tc>, window_params = [{transform_indices = @transform_0, window_bounds = array<i64: 1, 256, 8>}, {transform_indices = @transform_1, window_bounds = array<i64: 1, 8, 16>}, {pipeline_mode = #tpu.pipeline_mode<synchronous>, transform_indices = @transform_2, window_bounds = array<i64: 1, 16>}, {transform_indices = @transform_3, window_bounds = array<i64: 256, 16>}]} {
    %c0_i32 = arith.constant 0 : i32
    %0 = arith.cmpi eq, %arg1, %c0_i32 : i32
    %1 = arith.extui %0 : i1 to i32
    %c0_i32_0 = arith.constant 0 : i32
    %2 = arith.cmpi ne, %1, %c0_i32_0 : i32
    scf.if %2 {
      %cst_11 = arith.constant 0.000000e+00 : f32
      %14 = vector.broadcast %cst_11 : f32 to vector<256x16xf32>
      %c0_12 = arith.constant 0 : index
      %c0_13 = arith.constant 0 : index
      %15 = vector.load %arg6[%c0_12, %c0_13] : memref<256x16xf32, #tpu.memory_space<vmem>>, vector<256x16xf32>
      tpu.vector_store %arg6[%c0_12, %c0_13], %14 {strides = array<i32>} : memref<256x16xf32, #tpu.memory_space<vmem>>, vector<256x16xf32>,
    } else {
    }
    %c0 = arith.constant 0 : index
    %c0_1 = arith.constant 0 : index
    %3 = vector.load %arg6[%c0, %c0_1] : memref<256x16xf32, #tpu.memory_space<vmem>>, vector<256x16xf32>
    %c0_2 = arith.constant 0 : index
    %c0_3 = arith.constant 0 : index
    %c0_4 = arith.constant 0 : index
    %4 = vector.load %arg2[%c0_2, %c0_3, %c0_4] : memref<1x256x8xbf16, #tpu.memory_space<vmem>>, vector<1x256x8xbf16>
    %5 = vector.shape_cast %4 : vector<1x256x8xbf16> to vector<256x8xbf16>
    %c0_5 = arith.constant 0 : index
    %c0_6 = arith.constant 0 : index
    %c0_7 = arith.constant 0 : index
    %6 = vector.load %arg3[%c0_5, %c0_6, %c0_7] : memref<1x8x16xbf16, #tpu.memory_space<vmem>>, vector<1x8x16xbf16>
    %7 = vector.shape_cast %6 : vector<1x8x16xbf16> to vector<8x16xbf16>
    %cst = arith.constant dense<0.000000e+00> : vector<256x16xf32>
    %8 = tpu.matmul %5, %7, %cst {dimension_numbers = #tpu.dot_dimension_numbers<[1], [0], [0], [1], [0, 0, 1, 1], [], []>} : vector<256x8xbf16>, vector<8x16xbf16>, vector<256x16xf32> -> vector<256x16xf32>
    %9 = arith.addf %3, %8 : vector<256x16xf32>
    %c0_8 = arith.constant 0 : index
    %c0_9 = arith.constant 0 : index
    %10 = vector.load %arg6[%c0_8, %c0_9] : memref<256x16xf32, #tpu.memory_space<vmem>>, vector<256x16xf32>
    tpu.vector_store %arg6[%c0_8, %c0_9], %9 {strides = array<i32>} : memref<256x16xf32, #tpu.memory_space<vmem>>, vector<256x16xf32>,
    %c8_i32 = arith.constant 8 : i32
    %11 = arith.cmpi eq, %arg1, %c8_i32 : i32
    %12 = arith.extui %11 : i1 to i32
    %c0_i32_10 = arith.constant 0 : i32
    %13 = arith.cmpi ne, %12, %c0_i32_10 : i32
    scf.if %13 {
      %c0_11 = arith.constant 0 : index
      %c0_12 = arith.constant 0 : index
      %14 = vector.load %arg6[%c0_11, %c0_12] : memref<256x16xf32, #tpu.memory_space<vmem>>, vector<256x16xf32>
      %c0_13 = arith.constant 0 : index
      %c0_14 = arith.constant 0 : index
      %15 = vector.load %arg4[%c0_13, %c0_14] : memref<1x16xf32, #tpu.memory_space<vmem>>, vector<1x16xf32>
      %16 = vector.broadcast %15 : vector<1x16xf32> to vector<256x16xf32>
      %17 = arith.addf %14, %16 : vector<256x16xf32>
      %cst_15 = arith.constant 0.000000e+00 : f32
      %18 = vector.broadcast %cst_15 : f32 to vector<256x16xf32>
      %19 = arith.maximumf %17, %18 : vector<256x16xf32>
      %20 = arith.truncf %19 : vector<256x16xf32> to vector<256x16xbf16>
      %c0_16 = arith.constant 0 : index
      %c0_17 = arith.constant 0 : index
      %21 = vector.load %arg5[%c0_16, %c0_17] : memref<256x16xbf16, #tpu.memory_space<vmem>>, vector<256x16xbf16>
      tpu.vector_store %arg5[%c0_16, %c0_17], %20 {strides = array<i32>} : memref<256x16xbf16, #tpu.memory_space<vmem>>, vector<256x16xbf16>,
    } else {
    }
    return
  }
  func.func @transform_0(%arg0: i32, %arg1: i32) -> (i32, i32, i32) {
    %c0_i32 = arith.constant 0 : i32
    %c0_i32_0 = arith.constant 0 : i32
    return %arg1, %arg0, %c0_i32 : i32, i32, i32
  }
  func.func @transform_1(%arg0: i32, %arg1: i32) -> (i32, i32, i32) {
    %c0_i32 = arith.constant 0 : i32
    %c0_i32_0 = arith.constant 0 : i32
    %c0_i32_1 = arith.constant 0 : i32
    return %arg1, %c0_i32, %c0_i32_0 : i32, i32, i32
  }
  func.func @transform_2(%arg0: i32, %arg1: i32) -> (i32, i32) {
    %c0_i32 = arith.constant 0 : i32
    %c0_i32_0 = arith.constant 0 : i32
    %c0_i32_1 = arith.constant 0 : i32
    return %c0_i32, %c0_i32_0 : i32, i32
  }
  func.func @transform_3(%arg0: i32, %arg1: i32) -> (i32, i32) {
    %c0_i32 = arith.constant 0 : i32
    %c0_i32_0 = arith.constant 0 : i32
    return %arg0, %c0_i32 : i32, i32
  }
}

module attributes {stable_mosaic.version = 11 : i64} {
  func.func @_conv_tap_kernel(%arg0: i32, %arg1: i32, %arg2: memref<1x128x16xbf16, #tpu.memory_space<vmem>>, %arg3: memref<1x16x32xbf16, #tpu.memory_space<vmem>>, %arg4: memref<1x32xf32, #tpu.memory_space<vmem>>, %arg5: memref<128x32xbf16, #tpu.memory_space<vmem>>, %arg6: memref<128x32xf32, #tpu.memory_space<vmem>>) attributes {dimension_semantics = [#tpu.dimension_semantics<parallel>, #tpu.dimension_semantics<arbitrary>], iteration_bounds = array<i64: 1, 9>, scalar_prefetch = 0 : i64, scratch_operands = 1 : i64, tpu.core_type = #tpu.core_type<tc>, window_params = [{transform_indices = @transform_0, window_bounds = array<i64: 1, 128, 16>}, {transform_indices = @transform_1, window_bounds = array<i64: 1, 16, 32>}, {pipeline_mode = #tpu.pipeline_mode<synchronous>, transform_indices = @transform_2, window_bounds = array<i64: 1, 32>}, {transform_indices = @transform_3, window_bounds = array<i64: 128, 32>}]} {
    %c0_i32 = arith.constant 0 : i32
    %0 = arith.cmpi eq, %arg1, %c0_i32 : i32
    %1 = arith.extui %0 : i1 to i32
    %c0_i32_0 = arith.constant 0 : i32
    %2 = arith.cmpi ne, %1, %c0_i32_0 : i32
    scf.if %2 {
      %cst_11 = arith.constant 0.000000e+00 : f32
      %14 = vector.broadcast %cst_11 : f32 to vector<128x32xf32>
      %c0_12 = arith.constant 0 : index
      %c0_13 = arith.constant 0 : index
      %15 = vector.load %arg6[%c0_12, %c0_13] : memref<128x32xf32, #tpu.memory_space<vmem>>, vector<128x32xf32>
      tpu.vector_store %arg6[%c0_12, %c0_13], %14 {strides = array<i32>} : memref<128x32xf32, #tpu.memory_space<vmem>>, vector<128x32xf32>,
    } else {
    }
    %c0 = arith.constant 0 : index
    %c0_1 = arith.constant 0 : index
    %3 = vector.load %arg6[%c0, %c0_1] : memref<128x32xf32, #tpu.memory_space<vmem>>, vector<128x32xf32>
    %c0_2 = arith.constant 0 : index
    %c0_3 = arith.constant 0 : index
    %c0_4 = arith.constant 0 : index
    %4 = vector.load %arg2[%c0_2, %c0_3, %c0_4] : memref<1x128x16xbf16, #tpu.memory_space<vmem>>, vector<1x128x16xbf16>
    %5 = vector.shape_cast %4 : vector<1x128x16xbf16> to vector<128x16xbf16>
    %c0_5 = arith.constant 0 : index
    %c0_6 = arith.constant 0 : index
    %c0_7 = arith.constant 0 : index
    %6 = vector.load %arg3[%c0_5, %c0_6, %c0_7] : memref<1x16x32xbf16, #tpu.memory_space<vmem>>, vector<1x16x32xbf16>
    %7 = vector.shape_cast %6 : vector<1x16x32xbf16> to vector<16x32xbf16>
    %cst = arith.constant dense<0.000000e+00> : vector<128x32xf32>
    %8 = tpu.matmul %5, %7, %cst {dimension_numbers = #tpu.dot_dimension_numbers<[1], [0], [0], [1], [0, 0, 1, 1], [], []>} : vector<128x16xbf16>, vector<16x32xbf16>, vector<128x32xf32> -> vector<128x32xf32>
    %9 = arith.addf %3, %8 : vector<128x32xf32>
    %c0_8 = arith.constant 0 : index
    %c0_9 = arith.constant 0 : index
    %10 = vector.load %arg6[%c0_8, %c0_9] : memref<128x32xf32, #tpu.memory_space<vmem>>, vector<128x32xf32>
    tpu.vector_store %arg6[%c0_8, %c0_9], %9 {strides = array<i32>} : memref<128x32xf32, #tpu.memory_space<vmem>>, vector<128x32xf32>,
    %c8_i32 = arith.constant 8 : i32
    %11 = arith.cmpi eq, %arg1, %c8_i32 : i32
    %12 = arith.extui %11 : i1 to i32
    %c0_i32_10 = arith.constant 0 : i32
    %13 = arith.cmpi ne, %12, %c0_i32_10 : i32
    scf.if %13 {
      %c0_11 = arith.constant 0 : index
      %c0_12 = arith.constant 0 : index
      %14 = vector.load %arg6[%c0_11, %c0_12] : memref<128x32xf32, #tpu.memory_space<vmem>>, vector<128x32xf32>
      %c0_13 = arith.constant 0 : index
      %c0_14 = arith.constant 0 : index
      %15 = vector.load %arg4[%c0_13, %c0_14] : memref<1x32xf32, #tpu.memory_space<vmem>>, vector<1x32xf32>
      %16 = vector.broadcast %15 : vector<1x32xf32> to vector<128x32xf32>
      %17 = arith.addf %14, %16 : vector<128x32xf32>
      %cst_15 = arith.constant 0.000000e+00 : f32
      %18 = vector.broadcast %cst_15 : f32 to vector<128x32xf32>
      %19 = arith.maximumf %17, %18 : vector<128x32xf32>
      %20 = arith.truncf %19 : vector<128x32xf32> to vector<128x32xbf16>
      %c0_16 = arith.constant 0 : index
      %c0_17 = arith.constant 0 : index
      %21 = vector.load %arg5[%c0_16, %c0_17] : memref<128x32xbf16, #tpu.memory_space<vmem>>, vector<128x32xbf16>
      tpu.vector_store %arg5[%c0_16, %c0_17], %20 {strides = array<i32>} : memref<128x32xbf16, #tpu.memory_space<vmem>>, vector<128x32xbf16>,
    } else {
    }
    return
  }
  func.func @transform_0(%arg0: i32, %arg1: i32) -> (i32, i32, i32) {
    %c0_i32 = arith.constant 0 : i32
    %c0_i32_0 = arith.constant 0 : i32
    return %arg1, %arg0, %c0_i32 : i32, i32, i32
  }
  func.func @transform_1(%arg0: i32, %arg1: i32) -> (i32, i32, i32) {
    %c0_i32 = arith.constant 0 : i32
    %c0_i32_0 = arith.constant 0 : i32
    %c0_i32_1 = arith.constant 0 : i32
    return %arg1, %c0_i32, %c0_i32_0 : i32, i32, i32
  }
  func.func @transform_2(%arg0: i32, %arg1: i32) -> (i32, i32) {
    %c0_i32 = arith.constant 0 : i32
    %c0_i32_0 = arith.constant 0 : i32
    %c0_i32_1 = arith.constant 0 : i32
    return %c0_i32, %c0_i32_0 : i32, i32
  }
  func.func @transform_3(%arg0: i32, %arg1: i32) -> (i32, i32) {
    %c0_i32 = arith.constant 0 : i32
    %c0_i32_0 = arith.constant 0 : i32
    return %arg0, %c0_i32 : i32, i32
  }
}

module attributes {stable_mosaic.version = 11 : i64} {
  func.func @_linear_kernel(%arg0: i32, %arg1: memref<32x128xbf16, #tpu.memory_space<vmem>>, %arg2: memref<128x128xbf16, #tpu.memory_space<vmem>>, %arg3: memref<1x128xf32, #tpu.memory_space<vmem>>, %arg4: memref<32x128xbf16, #tpu.memory_space<vmem>>) attributes {dimension_semantics = [#tpu.dimension_semantics<parallel>], iteration_bounds = array<i64: 1>, scalar_prefetch = 0 : i64, scratch_operands = 0 : i64, tpu.core_type = #tpu.core_type<tc>, window_params = [{transform_indices = @transform_0, window_bounds = array<i64: 32, 128>}, {pipeline_mode = #tpu.pipeline_mode<synchronous>, transform_indices = @transform_1, window_bounds = array<i64: 128, 128>}, {pipeline_mode = #tpu.pipeline_mode<synchronous>, transform_indices = @transform_2, window_bounds = array<i64: 1, 128>}, {transform_indices = @transform_3, window_bounds = array<i64: 32, 128>}]} {
    %c0 = arith.constant 0 : index
    %c0_0 = arith.constant 0 : index
    %0 = vector.load %arg1[%c0, %c0_0] : memref<32x128xbf16, #tpu.memory_space<vmem>>, vector<32x128xbf16>
    %c0_1 = arith.constant 0 : index
    %c0_2 = arith.constant 0 : index
    %1 = vector.load %arg2[%c0_1, %c0_2] : memref<128x128xbf16, #tpu.memory_space<vmem>>, vector<128x128xbf16>
    %cst = arith.constant dense<0.000000e+00> : vector<32x128xf32>
    %2 = tpu.matmul %0, %1, %cst {dimension_numbers = #tpu.dot_dimension_numbers<[1], [0], [0], [1], [0, 0, 1, 1], [], []>} : vector<32x128xbf16>, vector<128x128xbf16>, vector<32x128xf32> -> vector<32x128xf32>
    %c0_3 = arith.constant 0 : index
    %c0_4 = arith.constant 0 : index
    %3 = vector.load %arg3[%c0_3, %c0_4] : memref<1x128xf32, #tpu.memory_space<vmem>>, vector<1x128xf32>
    %4 = vector.broadcast %3 : vector<1x128xf32> to vector<32x128xf32>
    %5 = arith.addf %2, %4 : vector<32x128xf32>
    %6 = arith.truncf %5 : vector<32x128xf32> to vector<32x128xbf16>
    %c0_5 = arith.constant 0 : index
    %c0_6 = arith.constant 0 : index
    %7 = vector.load %arg4[%c0_5, %c0_6] : memref<32x128xbf16, #tpu.memory_space<vmem>>, vector<32x128xbf16>
    tpu.vector_store %arg4[%c0_5, %c0_6], %6 {strides = array<i32>} : memref<32x128xbf16, #tpu.memory_space<vmem>>, vector<32x128xbf16>,
    return
  }
  func.func @transform_0(%arg0: i32) -> (i32, i32) {
    %c0_i32 = arith.constant 0 : i32
    %c0_i32_0 = arith.constant 0 : i32
    return %arg0, %c0_i32 : i32, i32
  }
  func.func @transform_1(%arg0: i32) -> (i32, i32) {
    %c0_i32 = arith.constant 0 : i32
    %c0_i32_0 = arith.constant 0 : i32
    %c0_i32_1 = arith.constant 0 : i32
    return %c0_i32, %c0_i32_0 : i32, i32
  }
  func.func @transform_2(%arg0: i32) -> (i32, i32) {
    %c0_i32 = arith.constant 0 : i32
    %c0_i32_0 = arith.constant 0 : i32
    %c0_i32_1 = arith.constant 0 : i32
    return %c0_i32, %c0_i32_0 : i32, i32
  }
  func.func @transform_3(%arg0: i32) -> (i32, i32) {
    %c0_i32 = arith.constant 0 : i32
    %c0_i32_0 = arith.constant 0 : i32
    return %arg0, %c0_i32 : i32, i32
  }
}

module attributes {stable_mosaic.version = 11 : i64} {
  func.func @_conv_tap_kernel(%arg0: i32, %arg1: i32, %arg2: memref<1x32x32xbf16, #tpu.memory_space<vmem>>, %arg3: memref<1x32x32xbf16, #tpu.memory_space<vmem>>, %arg4: memref<1x32xf32, #tpu.memory_space<vmem>>, %arg5: memref<32x32xbf16, #tpu.memory_space<vmem>>, %arg6: memref<32x32xf32, #tpu.memory_space<vmem>>) attributes {dimension_semantics = [#tpu.dimension_semantics<parallel>, #tpu.dimension_semantics<arbitrary>], iteration_bounds = array<i64: 1, 9>, scalar_prefetch = 0 : i64, scratch_operands = 1 : i64, tpu.core_type = #tpu.core_type<tc>, window_params = [{transform_indices = @transform_0, window_bounds = array<i64: 1, 32, 32>}, {transform_indices = @transform_1, window_bounds = array<i64: 1, 32, 32>}, {pipeline_mode = #tpu.pipeline_mode<synchronous>, transform_indices = @transform_2, window_bounds = array<i64: 1, 32>}, {transform_indices = @transform_3, window_bounds = array<i64: 32, 32>}]} {
    %c0_i32 = arith.constant 0 : i32
    %0 = arith.cmpi eq, %arg1, %c0_i32 : i32
    %1 = arith.extui %0 : i1 to i32
    %c0_i32_0 = arith.constant 0 : i32
    %2 = arith.cmpi ne, %1, %c0_i32_0 : i32
    scf.if %2 {
      %cst_11 = arith.constant 0.000000e+00 : f32
      %14 = vector.broadcast %cst_11 : f32 to vector<32x32xf32>
      %c0_12 = arith.constant 0 : index
      %c0_13 = arith.constant 0 : index
      %15 = vector.load %arg6[%c0_12, %c0_13] : memref<32x32xf32, #tpu.memory_space<vmem>>, vector<32x32xf32>
      tpu.vector_store %arg6[%c0_12, %c0_13], %14 {strides = array<i32>} : memref<32x32xf32, #tpu.memory_space<vmem>>, vector<32x32xf32>,
    } else {
    }
    %c0 = arith.constant 0 : index
    %c0_1 = arith.constant 0 : index
    %3 = vector.load %arg6[%c0, %c0_1] : memref<32x32xf32, #tpu.memory_space<vmem>>, vector<32x32xf32>
    %c0_2 = arith.constant 0 : index
    %c0_3 = arith.constant 0 : index
    %c0_4 = arith.constant 0 : index
    %4 = vector.load %arg2[%c0_2, %c0_3, %c0_4] : memref<1x32x32xbf16, #tpu.memory_space<vmem>>, vector<1x32x32xbf16>
    %5 = vector.shape_cast %4 : vector<1x32x32xbf16> to vector<32x32xbf16>
    %c0_5 = arith.constant 0 : index
    %c0_6 = arith.constant 0 : index
    %c0_7 = arith.constant 0 : index
    %6 = vector.load %arg3[%c0_5, %c0_6, %c0_7] : memref<1x32x32xbf16, #tpu.memory_space<vmem>>, vector<1x32x32xbf16>
    %7 = vector.shape_cast %6 : vector<1x32x32xbf16> to vector<32x32xbf16>
    %cst = arith.constant dense<0.000000e+00> : vector<32x32xf32>
    %8 = tpu.matmul %5, %7, %cst {dimension_numbers = #tpu.dot_dimension_numbers<[1], [0], [0], [1], [0, 0, 1, 1], [], []>} : vector<32x32xbf16>, vector<32x32xbf16>, vector<32x32xf32> -> vector<32x32xf32>
    %9 = arith.addf %3, %8 : vector<32x32xf32>
    %c0_8 = arith.constant 0 : index
    %c0_9 = arith.constant 0 : index
    %10 = vector.load %arg6[%c0_8, %c0_9] : memref<32x32xf32, #tpu.memory_space<vmem>>, vector<32x32xf32>
    tpu.vector_store %arg6[%c0_8, %c0_9], %9 {strides = array<i32>} : memref<32x32xf32, #tpu.memory_space<vmem>>, vector<32x32xf32>,
    %c8_i32 = arith.constant 8 : i32
    %11 = arith.cmpi eq, %arg1, %c8_i32 : i32
    %12 = arith.extui %11 : i1 to i32
    %c0_i32_10 = arith.constant 0 : i32
    %13 = arith.cmpi ne, %12, %c0_i32_10 : i32
    scf.if %13 {
      %c0_11 = arith.constant 0 : index
      %c0_12 = arith.constant 0 : index
      %14 = vector.load %arg6[%c0_11, %c0_12] : memref<32x32xf32, #tpu.memory_space<vmem>>, vector<32x32xf32>
      %c0_13 = arith.constant 0 : index
      %c0_14 = arith.constant 0 : index
      %15 = vector.load %arg4[%c0_13, %c0_14] : memref<1x32xf32, #tpu.memory_space<vmem>>, vector<1x32xf32>
      %16 = vector.broadcast %15 : vector<1x32xf32> to vector<32x32xf32>
      %17 = arith.addf %14, %16 : vector<32x32xf32>
      %cst_15 = arith.constant 0.000000e+00 : f32
      %18 = vector.broadcast %cst_15 : f32 to vector<32x32xf32>
      %19 = arith.maximumf %17, %18 : vector<32x32xf32>
      %20 = arith.truncf %19 : vector<32x32xf32> to vector<32x32xbf16>
      %c0_16 = arith.constant 0 : index
      %c0_17 = arith.constant 0 : index
      %21 = vector.load %arg5[%c0_16, %c0_17] : memref<32x32xbf16, #tpu.memory_space<vmem>>, vector<32x32xbf16>
      tpu.vector_store %arg5[%c0_16, %c0_17], %20 {strides = array<i32>} : memref<32x32xbf16, #tpu.memory_space<vmem>>, vector<32x32xbf16>,
    } else {
    }
    return
  }
  func.func @transform_0(%arg0: i32, %arg1: i32) -> (i32, i32, i32) {
    %c0_i32 = arith.constant 0 : i32
    %c0_i32_0 = arith.constant 0 : i32
    return %arg1, %arg0, %c0_i32 : i32, i32, i32
  }
  func.func @transform_1(%arg0: i32, %arg1: i32) -> (i32, i32, i32) {
    %c0_i32 = arith.constant 0 : i32
    %c0_i32_0 = arith.constant 0 : i32
    %c0_i32_1 = arith.constant 0 : i32
    return %arg1, %c0_i32, %c0_i32_0 : i32, i32, i32
  }
  func.func @transform_2(%arg0: i32, %arg1: i32) -> (i32, i32) {
    %c0_i32 = arith.constant 0 : i32
    %c0_i32_0 = arith.constant 0 : i32
    %c0_i32_1 = arith.constant 0 : i32
    return %c0_i32, %c0_i32_0 : i32, i32
  }
  func.func @transform_3(%arg0: i32, %arg1: i32) -> (i32, i32) {
    %c0_i32 = arith.constant 0 : i32
    %c0_i32_0 = arith.constant 0 : i32
    return %arg0, %c0_i32 : i32, i32
  }
}

module attributes {stable_mosaic.version = 11 : i64} {
  func.func @_linear_kernel(%arg0: i32, %arg1: memref<32x32xbf16, #tpu.memory_space<vmem>>, %arg2: memref<32x128xbf16, #tpu.memory_space<vmem>>, %arg3: memref<1x128xf32, #tpu.memory_space<vmem>>, %arg4: memref<32x128xbf16, #tpu.memory_space<vmem>>) attributes {dimension_semantics = [#tpu.dimension_semantics<parallel>], iteration_bounds = array<i64: 1>, scalar_prefetch = 0 : i64, scratch_operands = 0 : i64, tpu.core_type = #tpu.core_type<tc>, window_params = [{transform_indices = @transform_0, window_bounds = array<i64: 32, 32>}, {pipeline_mode = #tpu.pipeline_mode<synchronous>, transform_indices = @transform_1, window_bounds = array<i64: 32, 128>}, {pipeline_mode = #tpu.pipeline_mode<synchronous>, transform_indices = @transform_2, window_bounds = array<i64: 1, 128>}, {transform_indices = @transform_3, window_bounds = array<i64: 32, 128>}]} {
    %c0 = arith.constant 0 : index
    %c0_0 = arith.constant 0 : index
    %0 = vector.load %arg1[%c0, %c0_0] : memref<32x32xbf16, #tpu.memory_space<vmem>>, vector<32x32xbf16>
    %c0_1 = arith.constant 0 : index
    %c0_2 = arith.constant 0 : index
    %1 = vector.load %arg2[%c0_1, %c0_2] : memref<32x128xbf16, #tpu.memory_space<vmem>>, vector<32x128xbf16>
    %cst = arith.constant dense<0.000000e+00> : vector<32x128xf32>
    %2 = tpu.matmul %0, %1, %cst {dimension_numbers = #tpu.dot_dimension_numbers<[1], [0], [0], [1], [0, 0, 1, 1], [], []>} : vector<32x32xbf16>, vector<32x128xbf16>, vector<32x128xf32> -> vector<32x128xf32>
    %c0_3 = arith.constant 0 : index
    %c0_4 = arith.constant 0 : index
    %3 = vector.load %arg3[%c0_3, %c0_4] : memref<1x128xf32, #tpu.memory_space<vmem>>, vector<1x128xf32>
    %4 = vector.broadcast %3 : vector<1x128xf32> to vector<32x128xf32>
    %5 = arith.addf %2, %4 : vector<32x128xf32>
    %6 = arith.truncf %5 : vector<32x128xf32> to vector<32x128xbf16>
    %c0_5 = arith.constant 0 : index
    %c0_6 = arith.constant 0 : index
    %7 = vector.load %arg4[%c0_5, %c0_6] : memref<32x128xbf16, #tpu.memory_space<vmem>>, vector<32x128xbf16>
    tpu.vector_store %arg4[%c0_5, %c0_6], %6 {strides = array<i32>} : memref<32x128xbf16, #tpu.memory_space<vmem>>, vector<32x128xbf16>,
    return
  }
  func.func @transform_0(%arg0: i32) -> (i32, i32) {
    %c0_i32 = arith.constant 0 : i32
    %c0_i32_0 = arith.constant 0 : i32
    return %arg0, %c0_i32 : i32, i32
  }
  func.func @transform_1(%arg0: i32) -> (i32, i32) {
    %c0_i32 = arith.constant 0 : i32
    %c0_i32_0 = arith.constant 0 : i32
    %c0_i32_1 = arith.constant 0 : i32
    return %c0_i32, %c0_i32_0 : i32, i32
  }
  func.func @transform_2(%arg0: i32) -> (i32, i32) {
    %c0_i32 = arith.constant 0 : i32
    %c0_i32_0 = arith.constant 0 : i32
    %c0_i32_1 = arith.constant 0 : i32
    return %c0_i32, %c0_i32_0 : i32, i32
  }
  func.func @transform_3(%arg0: i32) -> (i32, i32) {
    %c0_i32 = arith.constant 0 : i32
    %c0_i32_0 = arith.constant 0 : i32
    return %arg0, %c0_i32 : i32, i32
  }
}

module attributes {stable_mosaic.version = 11 : i64} {
  func.func @_linear_kernel(%arg0: i32, %arg1: memref<32x32xbf16, #tpu.memory_space<vmem>>, %arg2: memref<32x32xbf16, #tpu.memory_space<vmem>>, %arg3: memref<1x32xf32, #tpu.memory_space<vmem>>, %arg4: memref<32x32xbf16, #tpu.memory_space<vmem>>) attributes {dimension_semantics = [#tpu.dimension_semantics<parallel>], iteration_bounds = array<i64: 1>, scalar_prefetch = 0 : i64, scratch_operands = 0 : i64, tpu.core_type = #tpu.core_type<tc>, window_params = [{transform_indices = @transform_0, window_bounds = array<i64: 32, 32>}, {pipeline_mode = #tpu.pipeline_mode<synchronous>, transform_indices = @transform_1, window_bounds = array<i64: 32, 32>}, {pipeline_mode = #tpu.pipeline_mode<synchronous>, transform_indices = @transform_2, window_bounds = array<i64: 1, 32>}, {transform_indices = @transform_3, window_bounds = array<i64: 32, 32>}]} {
    %c0 = arith.constant 0 : index
    %c0_0 = arith.constant 0 : index
    %0 = vector.load %arg1[%c0, %c0_0] : memref<32x32xbf16, #tpu.memory_space<vmem>>, vector<32x32xbf16>
    %c0_1 = arith.constant 0 : index
    %c0_2 = arith.constant 0 : index
    %1 = vector.load %arg2[%c0_1, %c0_2] : memref<32x32xbf16, #tpu.memory_space<vmem>>, vector<32x32xbf16>
    %cst = arith.constant dense<0.000000e+00> : vector<32x32xf32>
    %2 = tpu.matmul %0, %1, %cst {dimension_numbers = #tpu.dot_dimension_numbers<[1], [0], [0], [1], [0, 0, 1, 1], [], []>} : vector<32x32xbf16>, vector<32x32xbf16>, vector<32x32xf32> -> vector<32x32xf32>
    %c0_3 = arith.constant 0 : index
    %c0_4 = arith.constant 0 : index
    %3 = vector.load %arg3[%c0_3, %c0_4] : memref<1x32xf32, #tpu.memory_space<vmem>>, vector<1x32xf32>
    %4 = vector.broadcast %3 : vector<1x32xf32> to vector<32x32xf32>
    %5 = arith.addf %2, %4 : vector<32x32xf32>
    %6 = arith.truncf %5 : vector<32x32xf32> to vector<32x32xbf16>
    %c0_5 = arith.constant 0 : index
    %c0_6 = arith.constant 0 : index
    %7 = vector.load %arg4[%c0_5, %c0_6] : memref<32x32xbf16, #tpu.memory_space<vmem>>, vector<32x32xbf16>
    tpu.vector_store %arg4[%c0_5, %c0_6], %6 {strides = array<i32>} : memref<32x32xbf16, #tpu.memory_space<vmem>>, vector<32x32xbf16>,
    return
  }
  func.func @transform_0(%arg0: i32) -> (i32, i32) {
    %c0_i32 = arith.constant 0 : i32
    %c0_i32_0 = arith.constant 0 : i32
    return %arg0, %c0_i32 : i32, i32
  }
  func.func @transform_1(%arg0: i32) -> (i32, i32) {
    %c0_i32 = arith.constant 0 : i32
    %c0_i32_0 = arith.constant 0 : i32
    %c0_i32_1 = arith.constant 0 : i32
    return %c0_i32, %c0_i32_0 : i32, i32
  }
  func.func @transform_2(%arg0: i32) -> (i32, i32) {
    %c0_i32 = arith.constant 0 : i32
    %c0_i32_0 = arith.constant 0 : i32
    %c0_i32_1 = arith.constant 0 : i32
    return %c0_i32, %c0_i32_0 : i32, i32
  }
  func.func @transform_3(%arg0: i32) -> (i32, i32) {
    %c0_i32 = arith.constant 0 : i32
    %c0_i32_0 = arith.constant 0 : i32
    return %arg0, %c0_i32 : i32, i32
  }
}

module attributes {stable_mosaic.version = 11 : i64} {
  func.func @_corr_token_kernel(%arg0: i32, %arg1: i32, %arg2: i32, %arg3: memref<1x16x32xbf16, #tpu.memory_space<vmem>>, %arg4: memref<1x16x32xbf16, #tpu.memory_space<vmem>>, %arg5: memref<16x128xbf16, #tpu.memory_space<vmem>>, %arg6: memref<1x128xf32, #tpu.memory_space<vmem>>, %arg7: memref<1x16x128xbf16, #tpu.memory_space<vmem>>, %arg8: memref<16x128xf32, #tpu.memory_space<vmem>>) attributes {dimension_semantics = [#tpu.dimension_semantics<parallel>, #tpu.dimension_semantics<parallel>, #tpu.dimension_semantics<arbitrary>], iteration_bounds = array<i64: 2, 1, 1>, scalar_prefetch = 0 : i64, scratch_operands = 1 : i64, tpu.core_type = #tpu.core_type<tc>, window_params = [{transform_indices = @transform_0, window_bounds = array<i64: 1, 16, 32>}, {transform_indices = @transform_1, window_bounds = array<i64: 1, 16, 32>}, {transform_indices = @transform_2, window_bounds = array<i64: 16, 128>}, {pipeline_mode = #tpu.pipeline_mode<synchronous>, transform_indices = @transform_3, window_bounds = array<i64: 1, 128>}, {transform_indices = @transform_4, window_bounds = array<i64: 1, 16, 128>}]} {
    %c0_i32 = arith.constant 0 : i32
    %0 = arith.cmpi eq, %arg2, %c0_i32 : i32
    %1 = arith.extui %0 : i1 to i32
    %c0_i32_0 = arith.constant 0 : i32
    %2 = arith.cmpi ne, %1, %c0_i32_0 : i32
    scf.if %2 {
      %cst_16 = arith.constant 0.000000e+00 : f32
      %19 = vector.broadcast %cst_16 : f32 to vector<16x128xf32>
      %c0_17 = arith.constant 0 : index
      %c0_18 = arith.constant 0 : index
      %20 = vector.load %arg8[%c0_17, %c0_18] : memref<16x128xf32, #tpu.memory_space<vmem>>, vector<16x128xf32>
      tpu.vector_store %arg8[%c0_17, %c0_18], %19 {strides = array<i32>} : memref<16x128xf32, #tpu.memory_space<vmem>>, vector<16x128xf32>,
    } else {
    }
    %c0 = arith.constant 0 : index
    %c0_1 = arith.constant 0 : index
    %c0_2 = arith.constant 0 : index
    %3 = vector.load %arg3[%c0, %c0_1, %c0_2] : memref<1x16x32xbf16, #tpu.memory_space<vmem>>, vector<1x16x32xbf16>
    %4 = vector.shape_cast %3 : vector<1x16x32xbf16> to vector<16x32xbf16>
    %c0_3 = arith.constant 0 : index
    %c0_4 = arith.constant 0 : index
    %c0_5 = arith.constant 0 : index
    %5 = vector.load %arg4[%c0_3, %c0_4, %c0_5] : memref<1x16x32xbf16, #tpu.memory_space<vmem>>, vector<1x16x32xbf16>
    %6 = vector.shape_cast %5 : vector<1x16x32xbf16> to vector<16x32xbf16>
    %cst = arith.constant dense<0.000000e+00> : vector<16x16xf32>
    %7 = tpu.matmul %4, %6, %cst {dimension_numbers = #tpu.dot_dimension_numbers<[1], [1], [0], [0], [0, 0, 1, 0], [], []>} : vector<16x32xbf16>, vector<16x32xbf16>, vector<16x16xf32> -> vector<16x16xf32>
    %cst_6 = arith.constant 0.176776692 : f32
    %8 = vector.broadcast %cst_6 : f32 to vector<16x16xf32>
    %9 = arith.mulf %7, %8 : vector<16x16xf32>
    %c0_7 = arith.constant 0 : index
    %c0_8 = arith.constant 0 : index
    %10 = vector.load %arg8[%c0_7, %c0_8] : memref<16x128xf32, #tpu.memory_space<vmem>>, vector<16x128xf32>
    %11 = arith.truncf %9 : vector<16x16xf32> to vector<16x16xbf16>
    %c0_9 = arith.constant 0 : index
    %c0_10 = arith.constant 0 : index
    %12 = vector.load %arg5[%c0_9, %c0_10] : memref<16x128xbf16, #tpu.memory_space<vmem>>, vector<16x128xbf16>
    %cst_11 = arith.constant dense<0.000000e+00> : vector<16x128xf32>
    %13 = tpu.matmul %11, %12, %cst_11 {dimension_numbers = #tpu.dot_dimension_numbers<[1], [0], [0], [1], [0, 0, 1, 1], [], []>} : vector<16x16xbf16>, vector<16x128xbf16>, vector<16x128xf32> -> vector<16x128xf32>
    %14 = arith.addf %10, %13 : vector<16x128xf32>
    %c0_12 = arith.constant 0 : index
    %c0_13 = arith.constant 0 : index
    %15 = vector.load %arg8[%c0_12, %c0_13] : memref<16x128xf32, #tpu.memory_space<vmem>>, vector<16x128xf32>
    tpu.vector_store %arg8[%c0_12, %c0_13], %14 {strides = array<i32>} : memref<16x128xf32, #tpu.memory_space<vmem>>, vector<16x128xf32>,
    %c0_i32_14 = arith.constant 0 : i32
    %16 = arith.cmpi eq, %arg2, %c0_i32_14 : i32
    %17 = arith.extui %16 : i1 to i32
    %c0_i32_15 = arith.constant 0 : i32
    %18 = arith.cmpi ne, %17, %c0_i32_15 : i32
    scf.if %18 {
      %c0_16 = arith.constant 0 : index
      %c0_17 = arith.constant 0 : index
      %19 = vector.load %arg8[%c0_16, %c0_17] : memref<16x128xf32, #tpu.memory_space<vmem>>, vector<16x128xf32>
      %c0_18 = arith.constant 0 : index
      %c0_19 = arith.constant 0 : index
      %20 = vector.load %arg6[%c0_18, %c0_19] : memref<1x128xf32, #tpu.memory_space<vmem>>, vector<1x128xf32>
      %21 = vector.broadcast %20 : vector<1x128xf32> to vector<16x128xf32>
      %22 = arith.addf %19, %21 : vector<16x128xf32>
      %23 = arith.truncf %22 : vector<16x128xf32> to vector<16x128xbf16>
      %c0_20 = arith.constant 0 : index
      %c0_21 = arith.constant 0 : index
      %c0_22 = arith.constant 0 : index
      %24 = vector.load %arg7[%c0_20, %c0_21, %c0_22] : memref<1x16x128xbf16, #tpu.memory_space<vmem>>, vector<1x16x128xbf16>
      %25 = vector.shape_cast %24 : vector<1x16x128xbf16> to vector<16x128xbf16>
      %26 = vector.shape_cast %23 : vector<16x128xbf16> to vector<1x16x128xbf16>
      tpu.vector_store %arg7[%c0_20, %c0_21, %c0_22], %26 {strides = array<i32>} : memref<1x16x128xbf16, #tpu.memory_space<vmem>>, vector<1x16x128xbf16>,
    } else {
    }
    return
  }
  func.func @transform_0(%arg0: i32, %arg1: i32, %arg2: i32) -> (i32, i32, i32) {
    %c0_i32 = arith.constant 0 : i32
    %c0_i32_0 = arith.constant 0 : i32
    return %arg0, %arg1, %c0_i32 : i32, i32, i32
  }
  func.func @transform_1(%arg0: i32, %arg1: i32, %arg2: i32) -> (i32, i32, i32) {
    %c0_i32 = arith.constant 0 : i32
    %c0_i32_0 = arith.constant 0 : i32
    return %arg0, %arg2, %c0_i32 : i32, i32, i32
  }
  func.func @transform_2(%arg0: i32, %arg1: i32, %arg2: i32) -> (i32, i32) {
    %c0_i32 = arith.constant 0 : i32
    %c0_i32_0 = arith.constant 0 : i32
    return %arg2, %c0_i32 : i32, i32
  }
  func.func @transform_3(%arg0: i32, %arg1: i32, %arg2: i32) -> (i32, i32) {
    %c0_i32 = arith.constant 0 : i32
    %c0_i32_0 = arith.constant 0 : i32
    %c0_i32_1 = arith.constant 0 : i32
    return %c0_i32, %c0_i32_0 : i32, i32
  }
  func.func @transform_4(%arg0: i32, %arg1: i32, %arg2: i32) -> (i32, i32, i32) {
    %c0_i32 = arith.constant 0 : i32
    %c0_i32_0 = arith.constant 0 : i32
    return %arg0, %arg1, %c0_i32 : i32, i32, i32
  }
}

module attributes {stable_mosaic.version = 11 : i64} {
  func.func @_ln_linear_kernel(%arg0: i32, %arg1: memref<32x128xbf16, #tpu.memory_space<vmem>>, %arg2: memref<1x128xf32, #tpu.memory_space<vmem>>, %arg3: memref<1x128xf32, #tpu.memory_space<vmem>>, %arg4: memref<128x384xbf16, #tpu.memory_space<vmem>>, %arg5: memref<1x384xf32, #tpu.memory_space<vmem>>, %arg6: memref<32x384xbf16, #tpu.memory_space<vmem>>) attributes {dimension_semantics = [#tpu.dimension_semantics<parallel>], iteration_bounds = array<i64: 1>, scalar_prefetch = 0 : i64, scratch_operands = 0 : i64, tpu.core_type = #tpu.core_type<tc>, window_params = [{transform_indices = @transform_0, window_bounds = array<i64: 32, 128>}, {pipeline_mode = #tpu.pipeline_mode<synchronous>, transform_indices = @transform_1, window_bounds = array<i64: 1, 128>}, {pipeline_mode = #tpu.pipeline_mode<synchronous>, transform_indices = @transform_2, window_bounds = array<i64: 1, 128>}, {pipeline_mode = #tpu.pipeline_mode<synchronous>, transform_indices = @transform_3, window_bounds = array<i64: 128, 384>}, {pipeline_mode = #tpu.pipeline_mode<synchronous>, transform_indices = @transform_4, window_bounds = array<i64: 1, 384>}, {transform_indices = @transform_5, window_bounds = array<i64: 32, 384>}]} {
    %c0 = arith.constant 0 : index
    %c0_0 = arith.constant 0 : index
    %0 = vector.load %arg1[%c0, %c0_0] : memref<32x128xbf16, #tpu.memory_space<vmem>>, vector<32x128xbf16>
    %1 = arith.extf %0 : vector<32x128xbf16> to vector<32x128xf32>
    %c0_1 = arith.constant 0 : index
    %c0_2 = arith.constant 0 : index
    %2 = vector.load %arg2[%c0_1, %c0_2] : memref<1x128xf32, #tpu.memory_space<vmem>>, vector<1x128xf32>
    %c0_3 = arith.constant 0 : index
    %c0_4 = arith.constant 0 : index
    %3 = vector.load %arg3[%c0_3, %c0_4] : memref<1x128xf32, #tpu.memory_space<vmem>>, vector<1x128xf32>
    %cst = arith.constant dense<0.000000e+00> : vector<32xf32>
    %4 = vector.multi_reduction <add>, %1, %cst [1] : vector<32x128xf32> to vector<32xf32>
    %5 = vector.shape_cast %4 : vector<32xf32> to vector<32x1xf32>
    %cst_5 = arith.constant 3.125000e-02 : f32
    %6 = vector.broadcast %cst_5 : f32 to vector<32x1xf32>
    %7 = arith.mulf %5, %6 : vector<32x1xf32>
    %8 = tpu.iota {dimensions = array<i32: 1>} : vector<32x128xi32>
    %c32_i32 = arith.constant 32 : i32
    %9 = vector.broadcast %c32_i32 : i32 to vector<32x128xi32>
    %10 = arith.cmpi slt, %8, %9 : vector<32x128xi32>
    %11 = vector.broadcast %7 : vector<32x1xf32> to vector<32x128xf32>
    %12 = arith.subf %1, %11 : vector<32x128xf32>
    %cst_6 = arith.constant 0.000000e+00 : f32
    %13 = vector.broadcast %cst_6 : f32 to vector<32x128xf32>
    %14 = arith.select %10, %12, %13 : vector<32x128xi1>, vector<32x128xf32>
    %15 = arith.mulf %14, %14 : vector<32x128xf32>
    %cst_7 = arith.constant dense<0.000000e+00> : vector<32xf32>
    %16 = vector.multi_reduction <add>, %15, %cst_7 [1] : vector<32x128xf32> to vector<32xf32>
    %17 = vector.shape_cast %16 : vector<32xf32> to vector<32x1xf32>
    %cst_8 = arith.constant 3.125000e-02 : f32
    %18 = vector.broadcast %cst_8 : f32 to vector<32x1xf32>
    %19 = arith.mulf %17, %18 : vector<32x1xf32>
    %cst_9 = arith.constant 9.99999974E-6 : f32
    %20 = vector.broadcast %cst_9 : f32 to vector<32x1xf32>
    %21 = arith.addf %19, %20 : vector<32x1xf32>
    %22 = math.rsqrt %21 : vector<32x1xf32>
    %23 = vector.broadcast %22 : vector<32x1xf32> to vector<32x128xf32>
    %24 = arith.mulf %14, %23 : vector<32x128xf32>
    %25 = vector.broadcast %2 : vector<1x128xf32> to vector<32x128xf32>
    %26 = arith.mulf %24, %25 : vector<32x128xf32>
    %27 = vector.broadcast %3 : vector<1x128xf32> to vector<32x128xf32>
    %28 = arith.addf %26, %27 : vector<32x128xf32>
    %29 = arith.truncf %28 : vector<32x128xf32> to vector<32x128xbf16>
    %c0_10 = arith.constant 0 : index
    %c0_11 = arith.constant 0 : index
    %30 = vector.load %arg4[%c0_10, %c0_11] : memref<128x384xbf16, #tpu.memory_space<vmem>>, vector<128x384xbf16>
    %cst_12 = arith.constant dense<0.000000e+00> : vector<32x384xf32>
    %31 = tpu.matmul %29, %30, %cst_12 {dimension_numbers = #tpu.dot_dimension_numbers<[1], [0], [0], [1], [0, 0, 1, 1], [], []>} : vector<32x128xbf16>, vector<128x384xbf16>, vector<32x384xf32> -> vector<32x384xf32>
    %c0_13 = arith.constant 0 : index
    %c0_14 = arith.constant 0 : index
    %32 = vector.load %arg5[%c0_13, %c0_14] : memref<1x384xf32, #tpu.memory_space<vmem>>, vector<1x384xf32>
    %33 = vector.broadcast %32 : vector<1x384xf32> to vector<32x384xf32>
    %34 = arith.addf %31, %33 : vector<32x384xf32>
    %35 = arith.truncf %34 : vector<32x384xf32> to vector<32x384xbf16>
    %c0_15 = arith.constant 0 : index
    %c0_16 = arith.constant 0 : index
    %36 = vector.load %arg6[%c0_15, %c0_16] : memref<32x384xbf16, #tpu.memory_space<vmem>>, vector<32x384xbf16>
    tpu.vector_store %arg6[%c0_15, %c0_16], %35 {strides = array<i32>} : memref<32x384xbf16, #tpu.memory_space<vmem>>, vector<32x384xbf16>,
    return
  }
  func.func @transform_0(%arg0: i32) -> (i32, i32) {
    %c0_i32 = arith.constant 0 : i32
    %c0_i32_0 = arith.constant 0 : i32
    return %arg0, %c0_i32 : i32, i32
  }
  func.func @transform_1(%arg0: i32) -> (i32, i32) {
    %c0_i32 = arith.constant 0 : i32
    %c0_i32_0 = arith.constant 0 : i32
    %c0_i32_1 = arith.constant 0 : i32
    return %c0_i32, %c0_i32_0 : i32, i32
  }
  func.func @transform_2(%arg0: i32) -> (i32, i32) {
    %c0_i32 = arith.constant 0 : i32
    %c0_i32_0 = arith.constant 0 : i32
    %c0_i32_1 = arith.constant 0 : i32
    return %c0_i32, %c0_i32_0 : i32, i32
  }
  func.func @transform_3(%arg0: i32) -> (i32, i32) {
    %c0_i32 = arith.constant 0 : i32
    %c0_i32_0 = arith.constant 0 : i32
    %c0_i32_1 = arith.constant 0 : i32
    return %c0_i32, %c0_i32_0 : i32, i32
  }
  func.func @transform_4(%arg0: i32) -> (i32, i32) {
    %c0_i32 = arith.constant 0 : i32
    %c0_i32_0 = arith.constant 0 : i32
    %c0_i32_1 = arith.constant 0 : i32
    return %c0_i32, %c0_i32_0 : i32, i32
  }
  func.func @transform_5(%arg0: i32) -> (i32, i32) {
    %c0_i32 = arith.constant 0 : i32
    %c0_i32_0 = arith.constant 0 : i32
    return %arg0, %c0_i32 : i32, i32
  }
}

module attributes {stable_mosaic.version = 11 : i64} {
  func.func @_flash_attn_kernel(%arg0: i32, %arg1: i32, %arg2: i32, %arg3: memref<1x16x128xbf16, #tpu.memory_space<vmem>>, %arg4: memref<1x16x128xbf16, #tpu.memory_space<vmem>>, %arg5: memref<1x16x128xbf16, #tpu.memory_space<vmem>>, %arg6: memref<1x16x128xbf16, #tpu.memory_space<vmem>>, %arg7: memref<16x128xf32, #tpu.memory_space<vmem>>, %arg8: memref<16x128xf32, #tpu.memory_space<vmem>>, %arg9: memref<16x128xf32, #tpu.memory_space<vmem>>) attributes {dimension_semantics = [#tpu.dimension_semantics<parallel>, #tpu.dimension_semantics<parallel>, #tpu.dimension_semantics<arbitrary>], iteration_bounds = array<i64: 2, 1, 1>, scalar_prefetch = 0 : i64, scratch_operands = 3 : i64, tpu.core_type = #tpu.core_type<tc>, window_params = [{transform_indices = @transform_0, window_bounds = array<i64: 1, 16, 128>}, {transform_indices = @transform_1, window_bounds = array<i64: 1, 16, 128>}, {transform_indices = @transform_2, window_bounds = array<i64: 1, 16, 128>}, {transform_indices = @transform_3, window_bounds = array<i64: 1, 16, 128>}]} {
    %c0_i32 = arith.constant 0 : i32
    %0 = arith.cmpi eq, %arg2, %c0_i32 : i32
    %1 = arith.extui %0 : i1 to i32
    %c0_i32_0 = arith.constant 0 : i32
    %2 = arith.cmpi ne, %1, %c0_i32_0 : i32
    scf.if %2 {
      %cst_29 = arith.constant 0xFF800000 : f32
      %48 = vector.broadcast %cst_29 : f32 to vector<16x128xf32>
      %c0_30 = arith.constant 0 : index
      %c0_31 = arith.constant 0 : index
      %49 = vector.load %arg7[%c0_30, %c0_31] : memref<16x128xf32, #tpu.memory_space<vmem>>, vector<16x128xf32>
      tpu.vector_store %arg7[%c0_30, %c0_31], %48 {strides = array<i32>} : memref<16x128xf32, #tpu.memory_space<vmem>>, vector<16x128xf32>,
      %cst_32 = arith.constant 0.000000e+00 : f32
      %50 = vector.broadcast %cst_32 : f32 to vector<16x128xf32>
      %c0_33 = arith.constant 0 : index
      %c0_34 = arith.constant 0 : index
      %51 = vector.load %arg8[%c0_33, %c0_34] : memref<16x128xf32, #tpu.memory_space<vmem>>, vector<16x128xf32>
      tpu.vector_store %arg8[%c0_33, %c0_34], %50 {strides = array<i32>} : memref<16x128xf32, #tpu.memory_space<vmem>>, vector<16x128xf32>,
      %cst_35 = arith.constant 0.000000e+00 : f32
      %52 = vector.broadcast %cst_35 : f32 to vector<16x128xf32>
      %c0_36 = arith.constant 0 : index
      %c0_37 = arith.constant 0 : index
      %53 = vector.load %arg9[%c0_36, %c0_37] : memref<16x128xf32, #tpu.memory_space<vmem>>, vector<16x128xf32>
      tpu.vector_store %arg9[%c0_36, %c0_37], %52 {strides = array<i32>} : memref<16x128xf32, #tpu.memory_space<vmem>>, vector<16x128xf32>,
    } else {
    }
    %c0 = arith.constant 0 : index
    %c0_1 = arith.constant 0 : index
    %c0_2 = arith.constant 0 : index
    %3 = vector.load %arg3[%c0, %c0_1, %c0_2] : memref<1x16x128xbf16, #tpu.memory_space<vmem>>, vector<1x16x128xbf16>
    %4 = vector.shape_cast %3 : vector<1x16x128xbf16> to vector<16x128xbf16>
    %c0_3 = arith.constant 0 : index
    %c0_4 = arith.constant 0 : index
    %c0_5 = arith.constant 0 : index
    %5 = vector.load %arg4[%c0_3, %c0_4, %c0_5] : memref<1x16x128xbf16, #tpu.memory_space<vmem>>, vector<1x16x128xbf16>
    %6 = vector.shape_cast %5 : vector<1x16x128xbf16> to vector<16x128xbf16>
    %cst = arith.constant dense<0.000000e+00> : vector<16x16xf32>
    %7 = tpu.matmul %4, %6, %cst {dimension_numbers = #tpu.dot_dimension_numbers<[1], [1], [0], [0], [0, 0, 1, 0], [], []>} : vector<16x128xbf16>, vector<16x128xbf16>, vector<16x16xf32> -> vector<16x16xf32>
    %cst_6 = arith.constant 0.176776692 : f32
    %8 = vector.broadcast %cst_6 : f32 to vector<16x16xf32>
    %9 = arith.mulf %7, %8 : vector<16x16xf32>
    %c16_i32 = arith.constant 16 : i32
    %10 = arith.muli %arg2, %c16_i32 : i32
    %11 = tpu.iota {dimensions = array<i32: 1>} : vector<16x16xi32>
    %12 = vector.broadcast %10 : i32 to vector<16x16xi32>
    %13 = arith.addi %12, %11 : vector<16x16xi32>
    %c16_i32_7 = arith.constant 16 : i32
    %14 = vector.broadcast %c16_i32_7 : i32 to vector<16x16xi32>
    %15 = arith.cmpi slt, %13, %14 : vector<16x16xi32>
    %cst_8 = arith.constant -1.000000e+30 : f32
    %16 = vector.broadcast %cst_8 : f32 to vector<16x16xf32>
    %17 = arith.select %15, %9, %16 : vector<16x16xi1>, vector<16x16xf32>
    %c0_9 = arith.constant 0 : index
    %c0_10 = arith.constant 0 : index
    %18 = vector.load %arg7[%c0_9, %c0_10] : memref<16x128xf32, #tpu.memory_space<vmem>>, vector<16x128xf32>
    %cst_11 = arith.constant dense<0xFF800000> : vector<16xf32>
    %19 = vector.multi_reduction <maximumf>, %17, %cst_11 [1] : vector<16x16xf32> to vector<16xf32>
    %20 = vector.shape_cast %19 : vector<16xf32> to vector<16x1xf32>
    %21 = vector.broadcast %20 : vector<16x1xf32> to vector<16x128xf32>
    %22 = arith.maximumf %18, %21 : vector<16x128xf32>
    %23 = arith.subf %18, %22 : vector<16x128xf32>
    %24 = math.exp %23 : vector<16x128xf32>
    %25 = vector.extract_strided_slice %22 {offsets = [0, 0], sizes = [16, 1], strides = [1, 1]} : vector<16x128xf32> to vector<16x1xf32>
    %26 = vector.broadcast %25 : vector<16x1xf32> to vector<16x16xf32>
    %27 = arith.subf %17, %26 : vector<16x16xf32>
    %28 = math.exp %27 : vector<16x16xf32>
    %c0_12 = arith.constant 0 : index
    %c0_13 = arith.constant 0 : index
    %29 = vector.load %arg8[%c0_12, %c0_13] : memref<16x128xf32, #tpu.memory_space<vmem>>, vector<16x128xf32>
    %30 = arith.mulf %24, %29 : vector<16x128xf32>
    %cst_14 = arith.constant dense<0.000000e+00> : vector<16xf32>
    %31 = vector.multi_reduction <add>, %28, %cst_14 [1] : vector<16x16xf32> to vector<16xf32>
    %32 = vector.shape_cast %31 : vector<16xf32> to vector<16x1xf32>
    %33 = vector.broadcast %32 : vector<16x1xf32> to vector<16x128xf32>
    %34 = arith.addf %30, %33 : vector<16x128xf32>
    %c0_15 = arith.constant 0 : index
    %c0_16 = arith.constant 0 : index
    %35 = vector.load %arg8[%c0_15, %c0_16] : memref<16x128xf32, #tpu.memory_space<vmem>>, vector<16x128xf32>
    tpu.vector_store %arg8[%c0_15, %c0_16], %34 {strides = array<i32>} : memref<16x128xf32, #tpu.memory_space<vmem>>, vector<16x128xf32>,
    %c0_17 = arith.constant 0 : index
    %c0_18 = arith.constant 0 : index
    %36 = vector.load %arg9[%c0_17, %c0_18] : memref<16x128xf32, #tpu.memory_space<vmem>>, vector<16x128xf32>
    %37 = arith.mulf %24, %36 : vector<16x128xf32>
    %38 = arith.truncf %28 : vector<16x16xf32> to vector<16x16xbf16>
    %c0_19 = arith.constant 0 : index
    %c0_20 = arith.constant 0 : index
    %c0_21 = arith.constant 0 : index
    %39 = vector.load %arg5[%c0_19, %c0_20, %c0_21] : memref<1x16x128xbf16, #tpu.memory_space<vmem>>, vector<1x16x128xbf16>
    %40 = vector.shape_cast %39 : vector<1x16x128xbf16> to vector<16x128xbf16>
    %cst_22 = arith.constant dense<0.000000e+00> : vector<16x128xf32>
    %41 = tpu.matmul %38, %40, %cst_22 {dimension_numbers = #tpu.dot_dimension_numbers<[1], [0], [0], [1], [0, 0, 1, 1], [], []>} : vector<16x16xbf16>, vector<16x128xbf16>, vector<16x128xf32> -> vector<16x128xf32>
    %42 = arith.addf %37, %41 : vector<16x128xf32>
    %c0_23 = arith.constant 0 : index
    %c0_24 = arith.constant 0 : index
    %43 = vector.load %arg9[%c0_23, %c0_24] : memref<16x128xf32, #tpu.memory_space<vmem>>, vector<16x128xf32>
    tpu.vector_store %arg9[%c0_23, %c0_24], %42 {strides = array<i32>} : memref<16x128xf32, #tpu.memory_space<vmem>>, vector<16x128xf32>,
    %c0_25 = arith.constant 0 : index
    %c0_26 = arith.constant 0 : index
    %44 = vector.load %arg7[%c0_25, %c0_26] : memref<16x128xf32, #tpu.memory_space<vmem>>, vector<16x128xf32>
    tpu.vector_store %arg7[%c0_25, %c0_26], %22 {strides = array<i32>} : memref<16x128xf32, #tpu.memory_space<vmem>>, vector<16x128xf32>,
    %c0_i32_27 = arith.constant 0 : i32
    %45 = arith.cmpi eq, %arg2, %c0_i32_27 : i32
    %46 = arith.extui %45 : i1 to i32
    %c0_i32_28 = arith.constant 0 : i32
    %47 = arith.cmpi ne, %46, %c0_i32_28 : i32
    scf.if %47 {
      %c0_29 = arith.constant 0 : index
      %c0_30 = arith.constant 0 : index
      %48 = vector.load %arg9[%c0_29, %c0_30] : memref<16x128xf32, #tpu.memory_space<vmem>>, vector<16x128xf32>
      %c0_31 = arith.constant 0 : index
      %c0_32 = arith.constant 0 : index
      %49 = vector.load %arg8[%c0_31, %c0_32] : memref<16x128xf32, #tpu.memory_space<vmem>>, vector<16x128xf32>
      %50 = tpu.reciprocal %49 {approx = true} : vector<16x128xf32> -> vector<16x128xf32>
      %51 = arith.mulf %48, %50 : vector<16x128xf32>
      %52 = arith.truncf %51 : vector<16x128xf32> to vector<16x128xbf16>
      %c0_33 = arith.constant 0 : index
      %c0_34 = arith.constant 0 : index
      %c0_35 = arith.constant 0 : index
      %53 = vector.load %arg6[%c0_33, %c0_34, %c0_35] : memref<1x16x128xbf16, #tpu.memory_space<vmem>>, vector<1x16x128xbf16>
      %54 = vector.shape_cast %53 : vector<1x16x128xbf16> to vector<16x128xbf16>
      %55 = vector.shape_cast %52 : vector<16x128xbf16> to vector<1x16x128xbf16>
      tpu.vector_store %arg6[%c0_33, %c0_34, %c0_35], %55 {strides = array<i32>} : memref<1x16x128xbf16, #tpu.memory_space<vmem>>, vector<1x16x128xbf16>,
    } else {
    }
    return
  }
  func.func @transform_0(%arg0: i32, %arg1: i32, %arg2: i32) -> (i32, i32, i32) {
    %c0_i32 = arith.constant 0 : i32
    %c0_i32_0 = arith.constant 0 : i32
    return %arg0, %arg1, %c0_i32 : i32, i32, i32
  }
  func.func @transform_1(%arg0: i32, %arg1: i32, %arg2: i32) -> (i32, i32, i32) {
    %c0_i32 = arith.constant 0 : i32
    %c0_i32_0 = arith.constant 0 : i32
    return %arg0, %arg2, %c0_i32 : i32, i32, i32
  }
  func.func @transform_2(%arg0: i32, %arg1: i32, %arg2: i32) -> (i32, i32, i32) {
    %c0_i32 = arith.constant 0 : i32
    %c0_i32_0 = arith.constant 0 : i32
    return %arg0, %arg2, %c0_i32 : i32, i32, i32
  }
  func.func @transform_3(%arg0: i32, %arg1: i32, %arg2: i32) -> (i32, i32, i32) {
    %c0_i32 = arith.constant 0 : i32
    %c0_i32_0 = arith.constant 0 : i32
    return %arg0, %arg1, %c0_i32 : i32, i32, i32
  }
}

module attributes {stable_mosaic.version = 11 : i64} {
  func.func @_mlp_kernel(%arg0: i32, %arg1: memref<32x128xbf16, #tpu.memory_space<vmem>>, %arg2: memref<1x128xf32, #tpu.memory_space<vmem>>, %arg3: memref<1x128xf32, #tpu.memory_space<vmem>>, %arg4: memref<128x128xbf16, #tpu.memory_space<vmem>>, %arg5: memref<1x128xf32, #tpu.memory_space<vmem>>, %arg6: memref<128x128xbf16, #tpu.memory_space<vmem>>, %arg7: memref<1x128xf32, #tpu.memory_space<vmem>>, %arg8: memref<32x128xbf16, #tpu.memory_space<vmem>>) attributes {dimension_semantics = [#tpu.dimension_semantics<parallel>], iteration_bounds = array<i64: 1>, scalar_prefetch = 0 : i64, scratch_operands = 0 : i64, tpu.core_type = #tpu.core_type<tc>, window_params = [{transform_indices = @transform_0, window_bounds = array<i64: 32, 128>}, {pipeline_mode = #tpu.pipeline_mode<synchronous>, transform_indices = @transform_1, window_bounds = array<i64: 1, 128>}, {pipeline_mode = #tpu.pipeline_mode<synchronous>, transform_indices = @transform_2, window_bounds = array<i64: 1, 128>}, {pipeline_mode = #tpu.pipeline_mode<synchronous>, transform_indices = @transform_3, window_bounds = array<i64: 128, 128>}, {pipeline_mode = #tpu.pipeline_mode<synchronous>, transform_indices = @transform_4, window_bounds = array<i64: 1, 128>}, {pipeline_mode = #tpu.pipeline_mode<synchronous>, transform_indices = @transform_5, window_bounds = array<i64: 128, 128>}, {pipeline_mode = #tpu.pipeline_mode<synchronous>, transform_indices = @transform_6, window_bounds = array<i64: 1, 128>}, {transform_indices = @transform_7, window_bounds = array<i64: 32, 128>}]} {
    %c0 = arith.constant 0 : index
    %c0_0 = arith.constant 0 : index
    %0 = vector.load %arg1[%c0, %c0_0] : memref<32x128xbf16, #tpu.memory_space<vmem>>, vector<32x128xbf16>
    %1 = arith.extf %0 : vector<32x128xbf16> to vector<32x128xf32>
    %c0_1 = arith.constant 0 : index
    %c0_2 = arith.constant 0 : index
    %2 = vector.load %arg2[%c0_1, %c0_2] : memref<1x128xf32, #tpu.memory_space<vmem>>, vector<1x128xf32>
    %c0_3 = arith.constant 0 : index
    %c0_4 = arith.constant 0 : index
    %3 = vector.load %arg3[%c0_3, %c0_4] : memref<1x128xf32, #tpu.memory_space<vmem>>, vector<1x128xf32>
    %cst = arith.constant dense<0.000000e+00> : vector<32xf32>
    %4 = vector.multi_reduction <add>, %1, %cst [1] : vector<32x128xf32> to vector<32xf32>
    %5 = vector.shape_cast %4 : vector<32xf32> to vector<32x1xf32>
    %cst_5 = arith.constant 3.125000e-02 : f32
    %6 = vector.broadcast %cst_5 : f32 to vector<32x1xf32>
    %7 = arith.mulf %5, %6 : vector<32x1xf32>
    %8 = tpu.iota {dimensions = array<i32: 1>} : vector<32x128xi32>
    %c32_i32 = arith.constant 32 : i32
    %9 = vector.broadcast %c32_i32 : i32 to vector<32x128xi32>
    %10 = arith.cmpi slt, %8, %9 : vector<32x128xi32>
    %11 = vector.broadcast %7 : vector<32x1xf32> to vector<32x128xf32>
    %12 = arith.subf %1, %11 : vector<32x128xf32>
    %cst_6 = arith.constant 0.000000e+00 : f32
    %13 = vector.broadcast %cst_6 : f32 to vector<32x128xf32>
    %14 = arith.select %10, %12, %13 : vector<32x128xi1>, vector<32x128xf32>
    %15 = arith.mulf %14, %14 : vector<32x128xf32>
    %cst_7 = arith.constant dense<0.000000e+00> : vector<32xf32>
    %16 = vector.multi_reduction <add>, %15, %cst_7 [1] : vector<32x128xf32> to vector<32xf32>
    %17 = vector.shape_cast %16 : vector<32xf32> to vector<32x1xf32>
    %cst_8 = arith.constant 3.125000e-02 : f32
    %18 = vector.broadcast %cst_8 : f32 to vector<32x1xf32>
    %19 = arith.mulf %17, %18 : vector<32x1xf32>
    %cst_9 = arith.constant 9.99999974E-6 : f32
    %20 = vector.broadcast %cst_9 : f32 to vector<32x1xf32>
    %21 = arith.addf %19, %20 : vector<32x1xf32>
    %22 = math.rsqrt %21 : vector<32x1xf32>
    %23 = vector.broadcast %22 : vector<32x1xf32> to vector<32x128xf32>
    %24 = arith.mulf %14, %23 : vector<32x128xf32>
    %25 = vector.broadcast %2 : vector<1x128xf32> to vector<32x128xf32>
    %26 = arith.mulf %24, %25 : vector<32x128xf32>
    %27 = vector.broadcast %3 : vector<1x128xf32> to vector<32x128xf32>
    %28 = arith.addf %26, %27 : vector<32x128xf32>
    %29 = arith.truncf %28 : vector<32x128xf32> to vector<32x128xbf16>
    %c0_10 = arith.constant 0 : index
    %c0_11 = arith.constant 0 : index
    %30 = vector.load %arg4[%c0_10, %c0_11] : memref<128x128xbf16, #tpu.memory_space<vmem>>, vector<128x128xbf16>
    %cst_12 = arith.constant dense<0.000000e+00> : vector<32x128xf32>
    %31 = tpu.matmul %29, %30, %cst_12 {dimension_numbers = #tpu.dot_dimension_numbers<[1], [0], [0], [1], [0, 0, 1, 1], [], []>} : vector<32x128xbf16>, vector<128x128xbf16>, vector<32x128xf32> -> vector<32x128xf32>
    %c0_13 = arith.constant 0 : index
    %c0_14 = arith.constant 0 : index
    %32 = vector.load %arg5[%c0_13, %c0_14] : memref<1x128xf32, #tpu.memory_space<vmem>>, vector<1x128xf32>
    %33 = vector.broadcast %32 : vector<1x128xf32> to vector<32x128xf32>
    %34 = arith.addf %31, %33 : vector<32x128xf32>
    %cst_15 = arith.constant 0.000000e+00 : f32
    %35 = vector.broadcast %cst_15 : f32 to vector<32x128xf32>
    %36 = arith.maximumf %34, %35 : vector<32x128xf32>
    %37 = arith.truncf %36 : vector<32x128xf32> to vector<32x128xbf16>
    %c0_16 = arith.constant 0 : index
    %c0_17 = arith.constant 0 : index
    %38 = vector.load %arg6[%c0_16, %c0_17] : memref<128x128xbf16, #tpu.memory_space<vmem>>, vector<128x128xbf16>
    %cst_18 = arith.constant dense<0.000000e+00> : vector<32x128xf32>
    %39 = tpu.matmul %37, %38, %cst_18 {dimension_numbers = #tpu.dot_dimension_numbers<[1], [0], [0], [1], [0, 0, 1, 1], [], []>} : vector<32x128xbf16>, vector<128x128xbf16>, vector<32x128xf32> -> vector<32x128xf32>
    %c0_19 = arith.constant 0 : index
    %c0_20 = arith.constant 0 : index
    %40 = vector.load %arg7[%c0_19, %c0_20] : memref<1x128xf32, #tpu.memory_space<vmem>>, vector<1x128xf32>
    %41 = vector.broadcast %40 : vector<1x128xf32> to vector<32x128xf32>
    %42 = arith.addf %39, %41 : vector<32x128xf32>
    %43 = arith.truncf %42 : vector<32x128xf32> to vector<32x128xbf16>
    %c0_21 = arith.constant 0 : index
    %c0_22 = arith.constant 0 : index
    %44 = vector.load %arg8[%c0_21, %c0_22] : memref<32x128xbf16, #tpu.memory_space<vmem>>, vector<32x128xbf16>
    tpu.vector_store %arg8[%c0_21, %c0_22], %43 {strides = array<i32>} : memref<32x128xbf16, #tpu.memory_space<vmem>>, vector<32x128xbf16>,
    return
  }
  func.func @transform_0(%arg0: i32) -> (i32, i32) {
    %c0_i32 = arith.constant 0 : i32
    %c0_i32_0 = arith.constant 0 : i32
    return %arg0, %c0_i32 : i32, i32
  }
  func.func @transform_1(%arg0: i32) -> (i32, i32) {
    %c0_i32 = arith.constant 0 : i32
    %c0_i32_0 = arith.constant 0 : i32
    %c0_i32_1 = arith.constant 0 : i32
    return %c0_i32, %c0_i32_0 : i32, i32
  }
  func.func @transform_2(%arg0: i32) -> (i32, i32) {
    %c0_i32 = arith.constant 0 : i32
    %c0_i32_0 = arith.constant 0 : i32
    %c0_i32_1 = arith.constant 0 : i32
    return %c0_i32, %c0_i32_0 : i32, i32
  }
  func.func @transform_3(%arg0: i32) -> (i32, i32) {
    %c0_i32 = arith.constant 0 : i32
    %c0_i32_0 = arith.constant 0 : i32
    %c0_i32_1 = arith.constant 0 : i32
    return %c0_i32, %c0_i32_0 : i32, i32
  }
  func.func @transform_4(%arg0: i32) -> (i32, i32) {
    %c0_i32 = arith.constant 0 : i32
    %c0_i32_0 = arith.constant 0 : i32
    %c0_i32_1 = arith.constant 0 : i32
    return %c0_i32, %c0_i32_0 : i32, i32
  }
  func.func @transform_5(%arg0: i32) -> (i32, i32) {
    %c0_i32 = arith.constant 0 : i32
    %c0_i32_0 = arith.constant 0 : i32
    %c0_i32_1 = arith.constant 0 : i32
    return %c0_i32, %c0_i32_0 : i32, i32
  }
  func.func @transform_6(%arg0: i32) -> (i32, i32) {
    %c0_i32 = arith.constant 0 : i32
    %c0_i32_0 = arith.constant 0 : i32
    %c0_i32_1 = arith.constant 0 : i32
    return %c0_i32, %c0_i32_0 : i32, i32
  }
  func.func @transform_7(%arg0: i32) -> (i32, i32) {
    %c0_i32 = arith.constant 0 : i32
    %c0_i32_0 = arith.constant 0 : i32
    return %arg0, %c0_i32 : i32, i32
  }
}

module attributes {stable_mosaic.version = 11 : i64} {
  func.func @_linear_kernel(%arg0: i32, %arg1: memref<32x128xbf16, #tpu.memory_space<vmem>>, %arg2: memref<128x256xbf16, #tpu.memory_space<vmem>>, %arg3: memref<1x256xf32, #tpu.memory_space<vmem>>, %arg4: memref<32x256xbf16, #tpu.memory_space<vmem>>) attributes {dimension_semantics = [#tpu.dimension_semantics<parallel>], iteration_bounds = array<i64: 1>, scalar_prefetch = 0 : i64, scratch_operands = 0 : i64, tpu.core_type = #tpu.core_type<tc>, window_params = [{transform_indices = @transform_0, window_bounds = array<i64: 32, 128>}, {pipeline_mode = #tpu.pipeline_mode<synchronous>, transform_indices = @transform_1, window_bounds = array<i64: 128, 256>}, {pipeline_mode = #tpu.pipeline_mode<synchronous>, transform_indices = @transform_2, window_bounds = array<i64: 1, 256>}, {transform_indices = @transform_3, window_bounds = array<i64: 32, 256>}]} {
    %c0 = arith.constant 0 : index
    %c0_0 = arith.constant 0 : index
    %0 = vector.load %arg1[%c0, %c0_0] : memref<32x128xbf16, #tpu.memory_space<vmem>>, vector<32x128xbf16>
    %c0_1 = arith.constant 0 : index
    %c0_2 = arith.constant 0 : index
    %1 = vector.load %arg2[%c0_1, %c0_2] : memref<128x256xbf16, #tpu.memory_space<vmem>>, vector<128x256xbf16>
    %cst = arith.constant dense<0.000000e+00> : vector<32x256xf32>
    %2 = tpu.matmul %0, %1, %cst {dimension_numbers = #tpu.dot_dimension_numbers<[1], [0], [0], [1], [0, 0, 1, 1], [], []>} : vector<32x128xbf16>, vector<128x256xbf16>, vector<32x256xf32> -> vector<32x256xf32>
    %c0_3 = arith.constant 0 : index
    %c0_4 = arith.constant 0 : index
    %3 = vector.load %arg3[%c0_3, %c0_4] : memref<1x256xf32, #tpu.memory_space<vmem>>, vector<1x256xf32>
    %4 = vector.broadcast %3 : vector<1x256xf32> to vector<32x256xf32>
    %5 = arith.addf %2, %4 : vector<32x256xf32>
    %6 = arith.truncf %5 : vector<32x256xf32> to vector<32x256xbf16>
    %c0_5 = arith.constant 0 : index
    %c0_6 = arith.constant 0 : index
    %7 = vector.load %arg4[%c0_5, %c0_6] : memref<32x256xbf16, #tpu.memory_space<vmem>>, vector<32x256xbf16>
    tpu.vector_store %arg4[%c0_5, %c0_6], %6 {strides = array<i32>} : memref<32x256xbf16, #tpu.memory_space<vmem>>, vector<32x256xbf16>,
    return
  }
  func.func @transform_0(%arg0: i32) -> (i32, i32) {
    %c0_i32 = arith.constant 0 : i32
    %c0_i32_0 = arith.constant 0 : i32
    return %arg0, %c0_i32 : i32, i32
  }
  func.func @transform_1(%arg0: i32) -> (i32, i32) {
    %c0_i32 = arith.constant 0 : i32
    %c0_i32_0 = arith.constant 0 : i32
    %c0_i32_1 = arith.constant 0 : i32
    return %c0_i32, %c0_i32_0 : i32, i32
  }
  func.func @transform_2(%arg0: i32) -> (i32, i32) {
    %c0_i32 = arith.constant 0 : i32
    %c0_i32_0 = arith.constant 0 : i32
    %c0_i32_1 = arith.constant 0 : i32
    return %c0_i32, %c0_i32_0 : i32, i32
  }
  func.func @transform_3(%arg0: i32) -> (i32, i32) {
    %c0_i32 = arith.constant 0 : i32
    %c0_i32_0 = arith.constant 0 : i32
    return %arg0, %c0_i32 : i32, i32
  }
}

module attributes {stable_mosaic.version = 11 : i64} {
  func.func @_mlp_kernel(%arg0: i32, %arg1: memref<32x128xbf16, #tpu.memory_space<vmem>>, %arg2: memref<128x128xbf16, #tpu.memory_space<vmem>>, %arg3: memref<1x128xf32, #tpu.memory_space<vmem>>, %arg4: memref<128x128xbf16, #tpu.memory_space<vmem>>, %arg5: memref<1x128xf32, #tpu.memory_space<vmem>>, %arg6: memref<32x128xf32, #tpu.memory_space<vmem>>) attributes {dimension_semantics = [#tpu.dimension_semantics<parallel>], iteration_bounds = array<i64: 1>, scalar_prefetch = 0 : i64, scratch_operands = 0 : i64, tpu.core_type = #tpu.core_type<tc>, window_params = [{transform_indices = @transform_0, window_bounds = array<i64: 32, 128>}, {pipeline_mode = #tpu.pipeline_mode<synchronous>, transform_indices = @transform_1, window_bounds = array<i64: 128, 128>}, {pipeline_mode = #tpu.pipeline_mode<synchronous>, transform_indices = @transform_2, window_bounds = array<i64: 1, 128>}, {pipeline_mode = #tpu.pipeline_mode<synchronous>, transform_indices = @transform_3, window_bounds = array<i64: 128, 128>}, {pipeline_mode = #tpu.pipeline_mode<synchronous>, transform_indices = @transform_4, window_bounds = array<i64: 1, 128>}, {transform_indices = @transform_5, window_bounds = array<i64: 32, 128>}]} {
    %c0 = arith.constant 0 : index
    %c0_0 = arith.constant 0 : index
    %0 = vector.load %arg1[%c0, %c0_0] : memref<32x128xbf16, #tpu.memory_space<vmem>>, vector<32x128xbf16>
    %1 = arith.extf %0 : vector<32x128xbf16> to vector<32x128xf32>
    %2 = arith.truncf %1 : vector<32x128xf32> to vector<32x128xbf16>
    %c0_1 = arith.constant 0 : index
    %c0_2 = arith.constant 0 : index
    %3 = vector.load %arg2[%c0_1, %c0_2] : memref<128x128xbf16, #tpu.memory_space<vmem>>, vector<128x128xbf16>
    %cst = arith.constant dense<0.000000e+00> : vector<32x128xf32>
    %4 = tpu.matmul %2, %3, %cst {dimension_numbers = #tpu.dot_dimension_numbers<[1], [0], [0], [1], [0, 0, 1, 1], [], []>} : vector<32x128xbf16>, vector<128x128xbf16>, vector<32x128xf32> -> vector<32x128xf32>
    %c0_3 = arith.constant 0 : index
    %c0_4 = arith.constant 0 : index
    %5 = vector.load %arg3[%c0_3, %c0_4] : memref<1x128xf32, #tpu.memory_space<vmem>>, vector<1x128xf32>
    %6 = vector.broadcast %5 : vector<1x128xf32> to vector<32x128xf32>
    %7 = arith.addf %4, %6 : vector<32x128xf32>
    %cst_5 = arith.constant 0.000000e+00 : f32
    %8 = vector.broadcast %cst_5 : f32 to vector<32x128xf32>
    %9 = arith.maximumf %7, %8 : vector<32x128xf32>
    %10 = arith.truncf %9 : vector<32x128xf32> to vector<32x128xbf16>
    %c0_6 = arith.constant 0 : index
    %c0_7 = arith.constant 0 : index
    %11 = vector.load %arg4[%c0_6, %c0_7] : memref<128x128xbf16, #tpu.memory_space<vmem>>, vector<128x128xbf16>
    %cst_8 = arith.constant dense<0.000000e+00> : vector<32x128xf32>
    %12 = tpu.matmul %10, %11, %cst_8 {dimension_numbers = #tpu.dot_dimension_numbers<[1], [0], [0], [1], [0, 0, 1, 1], [], []>} : vector<32x128xbf16>, vector<128x128xbf16>, vector<32x128xf32> -> vector<32x128xf32>
    %c0_9 = arith.constant 0 : index
    %c0_10 = arith.constant 0 : index
    %13 = vector.load %arg5[%c0_9, %c0_10] : memref<1x128xf32, #tpu.memory_space<vmem>>, vector<1x128xf32>
    %14 = vector.broadcast %13 : vector<1x128xf32> to vector<32x128xf32>
    %15 = arith.addf %12, %14 : vector<32x128xf32>
    %c0_11 = arith.constant 0 : index
    %c0_12 = arith.constant 0 : index
    %16 = vector.load %arg6[%c0_11, %c0_12] : memref<32x128xf32, #tpu.memory_space<vmem>>, vector<32x128xf32>
    tpu.vector_store %arg6[%c0_11, %c0_12], %15 {strides = array<i32>} : memref<32x128xf32, #tpu.memory_space<vmem>>, vector<32x128xf32>,
    return
  }
  func.func @transform_0(%arg0: i32) -> (i32, i32) {
    %c0_i32 = arith.constant 0 : i32
    %c0_i32_0 = arith.constant 0 : i32
    return %arg0, %c0_i32 : i32, i32
  }
  func.func @transform_1(%arg0: i32) -> (i32, i32) {
    %c0_i32 = arith.constant 0 : i32
    %c0_i32_0 = arith.constant 0 : i32
    %c0_i32_1 = arith.constant 0 : i32
    return %c0_i32, %c0_i32_0 : i32, i32
  }
  func.func @transform_2(%arg0: i32) -> (i32, i32) {
    %c0_i32 = arith.constant 0 : i32
    %c0_i32_0 = arith.constant 0 : i32
    %c0_i32_1 = arith.constant 0 : i32
    return %c0_i32, %c0_i32_0 : i32, i32
  }
  func.func @transform_3(%arg0: i32) -> (i32, i32) {
    %c0_i32 = arith.constant 0 : i32
    %c0_i32_0 = arith.constant 0 : i32
    %c0_i32_1 = arith.constant 0 : i32
    return %c0_i32, %c0_i32_0 : i32, i32
  }
  func.func @transform_4(%arg0: i32) -> (i32, i32) {
    %c0_i32 = arith.constant 0 : i32
    %c0_i32_0 = arith.constant 0 : i32
    %c0_i32_1 = arith.constant 0 : i32
    return %c0_i32, %c0_i32_0 : i32, i32
  }
  func.func @transform_5(%arg0: i32) -> (i32, i32) {
    %c0_i32 = arith.constant 0 : i32
    %c0_i32_0 = arith.constant 0 : i32
    return %arg0, %c0_i32 : i32, i32
  }
}

</mosaic_0001>

<bundles_post_ra>
// kernel: _lambda_.25
= control target key start
LH: loop header
LB: loop body
LE: loop exit
PB: predicated region body
PF: predicated region fallthrough
CT: control target
= control target key end

     0   :  { %s1318_s12 = smov 0   ;;  %s1320_s13 = smov 0   ;;  %s1582_s0 = inlined_call_operand.vmem [shape: bf16[9,512,8], index: 0, kind: input, shape index: {}]   ;;  %s1583_s1 = inlined_call_operand.vmem [shape: bf16[9,8,16], index: 1, kind: input, shape index: {}]   ;;  %s1584_s2 = inlined_call_operand.vmem [shape: f32[1,16], index: 2, kind: input, shape index: {}]   ;;  %s1585_s3 = inlined_call_operand.vmem [shape: bf16[512,16], index: 3, kind: output, shape index: {}]  }
   0x1   :  { %s1322_s14 = smov 0   ;;  %s1324_s15 = smov 0  }
   0x2   :  { %s1326_s16 = smov 0  }
   0x3 LB: > { %s22_s17 = sadd.s32 1, %s1287_s14  ;;  %s25_s18 = sadd.s32 1, %s1291_s15  ;;  %s1295_s16 = sphi %s1326_s16, %s13_s16   ;;  %s1291_s15 = sphi %s1324_s15, %s1589_s15   ;;  %s1287_s14 = sphi %s1322_s14, %s1588_s14   ;;  %s1283_s13 = sphi %s1320_s13, %s1587_s13   ;;  %s1279_s12 = sphi %s1318_s12, %s1586_s12  }
   0x4   : > { %p23_p0 = scmp.ge.s32.totalorder %s22_s17, 9  ;;  %p1037_p1 = scmp.ge.s32.totalorder %s1295_s16, 1 }
   0x5   : > { %p165_p2 = scmp.lt.s32.totalorder %s1295_s16, 19 }
   0x6   : > { %s1591_s17 = smov (%p23_p0, %s22_s17), 0  ;;  %s1593_s18 = smov (!%p23_p0, %s25_s18), %s1291_s15 }
   0x7   : > { %p166_p3 = pnand %p1037_p1, %p165_p2  ;;  %p27_p4 = scmp.ge.s32.totalorder %s1593_s18, 2 }
   0x8   : > { %s1038_s19 = sshll.u32 (!%p166_p3), %s1283_s13, 5  ;;  %p198_p5 = scmp.lt.s32.totalorder (!%p166_p3), %s1279_s12, 8 }
   0x9   : > { %s1595_s18 = smov (%p27_p4, %s1593_s18), 0  ;;  %169 = sbr.rel (%p166_p3) target bundleno = 300 (0x12c), region = 32 }
   0xa   : > { %p200_p6 = scmp.lt.s32.totalorder (!%p166_p3), %s1038_s19, 63  ;;  %p1044_p7 = scmp.ne.s32.totalorder (!%p166_p3), %s1279_s12, 0 }
  0x10   : > { %s199_s20 = scalar_select %p198_p5, %s1279_s12, 8 }
  0x11   : > { %s1597_s19 = smov (!%p200_p6, %s1038_s19), 63  ;;  %221 = sbr.rel (%p1044_p7) target bundleno = 35 (0x23), region = 36 }
  0x12   : > { %s1039_s21 = sshll.u32 %s199_s20, 6  ;;  %s1041_s22 = sshll.u32 %s199_s20, 2  ;;  %vm222_vm0 = vcmask (!%p1044_p7), 130048   ;;  %v1297_v0 = vmov (!%p1044_p7), 0.0  }
  0x13   : > { %s203_s23 = sadd.s32 %s1039_s21, %s1597_s19  ;;  %s1355_s26 = scalar_lea.vmem %s1583_s1, %s1041_s22  ;;  %223 = vst.msk [vmem:[#allocation2] sm:$0xff] (!%p1044_p7), %vm222_vm0, %v1297_v0  ;;  %224 = vst.msk [vmem:[#allocation2 + $0x8] sm:$0xff] (!%p1044_p7), %vm222_vm0, %v1297_v0 }
  0x14   : > { %s1040_s27 = sshll.u32 %s203_s23, 2  ;;  %s1043_s28 = sshll.u32 %s1597_s19, 2  ;;  %225 = vst.msk [vmem:[#allocation2 + $0x10] sm:$0xff] (!%p1044_p7), %vm222_vm0, %v1297_v0  ;;  %226 = vst.msk [vmem:[#allocation2 + $0x18] sm:$0xff] (!%p1044_p7), %vm222_vm0, %v1297_v0 }
  0x15   : > { %s1360_s4 = scalar_lea.vmem %s1582_s0, %s1040_s27  ;;  %s1365_s7 = scalar_lea.vmem %s1585_s3, %s1043_s28  ;;  %227 = vst.msk [vmem:[#allocation2 + $0x20] sm:$0xff] (!%p1044_p7), %vm222_vm0, %v1297_v0  ;;  %228 = vst.msk [vmem:[#allocation2 + $0x28] sm:$0xff] (!%p1044_p7), %vm222_vm0, %v1297_v0 }
  0x16   : > { %229 = vst.msk [vmem:[#allocation2 + $0x30] sm:$0xff] (!%p1044_p7), %vm222_vm0, %v1297_v0  ;;  %230 = vst.msk [vmem:[#allocation2 + $0x38] sm:$0xff] (!%p1044_p7), %vm222_vm0, %v1297_v0 }
  0x17   : > { %231 = vst.msk [vmem:[#allocation2 + $0x40] sm:$0xff] (!%p1044_p7), %vm222_vm0, %v1297_v0  ;;  %232 = vst.msk [vmem:[#allocation2 + $0x48] sm:$0xff] (!%p1044_p7), %vm222_vm0, %v1297_v0 }
  0x18   : > { %233 = vst.msk [vmem:[#allocation2 + $0x50] sm:$0xff] %vm222_vm0, %v1297_v0  ;;  %234 = vst.msk [vmem:[#allocation2 + $0x58] sm:$0xff] %vm222_vm0, %v1297_v0 }
  0x19   : > { %235 = vst.msk [vmem:[#allocation2 + $0x60] sm:$0xff] %vm222_vm0, %v1297_v0  ;;  %236 = vst.msk [vmem:[#allocation2 + $0x68] sm:$0xff] %vm222_vm0, %v1297_v0 }
  0x1a   : > { %237 = vst.msk [vmem:[#allocation2 + $0x70] sm:$0xff] %vm222_vm0, %v1297_v0  ;;  %238 = vst.msk [vmem:[#allocation2 + $0x78] sm:$0xff] %vm222_vm0, %v1297_v0 }
  0x1b   : > { %239 = vst.msk [vmem:[#allocation2 + $0x80] sm:$0xff] %vm222_vm0, %v1297_v0  ;;  %240 = vst.msk [vmem:[#allocation2 + $0x88] sm:$0xff] %vm222_vm0, %v1297_v0 }
  0x1c   : > { %241 = vst.msk [vmem:[#allocation2 + $0x90] sm:$0xff] %vm222_vm0, %v1297_v0  ;;  %242 = vst.msk [vmem:[#allocation2 + $0x98] sm:$0xff] %vm222_vm0, %v1297_v0 }
  0x1d   : > { %243 = vst.msk [vmem:[#allocation2 + $0xa0] sm:$0xff] %vm222_vm0, %v1297_v0  ;;  %244 = vst.msk [vmem:[#allocation2 + $0xa8] sm:$0xff] %vm222_vm0, %v1297_v0 }
  0x1e   : > { %245 = vst.msk [vmem:[#allocation2 + $0xb0] sm:$0xff] %vm222_vm0, %v1297_v0  ;;  %246 = vst.msk [vmem:[#allocation2 + $0xb8] sm:$0xff] %vm222_vm0, %v1297_v0 }
  0x1f   : > { %247 = vst.msk [vmem:[#allocation2 + $0xc0] sm:$0xff] %vm222_vm0, %v1297_v0  ;;  %248 = vst.msk [vmem:[#allocation2 + $0xc8] sm:$0xff] %vm222_vm0, %v1297_v0 }
  0x20   : > { %249 = vst.msk [vmem:[#allocation2 + $0xd0] sm:$0xff] %vm222_vm0, %v1297_v0  ;;  %250 = vst.msk [vmem:[#allocation2 + $0xd8] sm:$0xff] %vm222_vm0, %v1297_v0 }
  0x21   : > { %251 = vst.msk [vmem:[#allocation2 + $0xe0] sm:$0xff] %vm222_vm0, %v1297_v0  ;;  %252 = vst.msk [vmem:[#allocation2 + $0xe8] sm:$0xff] %vm222_vm0, %v1297_v0 }
  0x22   : > { %253 = vst.msk [vmem:[#allocation2 + $0xf0] sm:$0xff] %vm222_vm0, %v1297_v0  ;;  %254 = vst.msk [vmem:[#allocation2 + $0xf8] sm:$0xff] %vm222_vm0, %v1297_v0 }
  0x23 PF: > { %v319_v1 = vld [vmem:[%s1355_s26] sm:$0xf]  ;;  %vm449_vm1 = vcmask 1043456   ;;  %vm400_vm2 = vcmask 64512   ;;  %v1243_v5 = vld [vmem:[%s1360_s4 + $0x8] sm:$0xff]   ;;  %v1245_v7 = vld [vmem:[%s1360_s4 + $0x10] sm:$0xff]  }
  0x24   : > { %v1241_v2 = vld [vmem:[%s1360_s4] sm:$0xff]   ;;  %1198 = vmatprep.subr.msk.bf16.mxu0 %vm449_vm1, %v319_v1  ;;  %1199 = vmatprep.subr.msk.bf16.mxu1 %vm449_vm1, %v319_v1  ;;  %v451_v3 = vsel %vm449_vm1, %v319_v1, 0  ;;  %v1244_v6 = vld [vmem:[%s1360_s4 + $0x48] sm:$0xff]   ;;  %v1246_v8 = vld [vmem:[%s1360_s4 + $0x50] sm:$0xff]   ;;  %vm646_vm3 = vcmask 130048   ;;  %p1077_p8 = scmp.ne.s32.totalorder %s1279_s12, 8 }
  0x25   : > { %1163 = vmatpush3.bf16.msra.mxu0 %v451_v3  ;;  %1197 = vmatpush3.bf16.msra.mxu1 %v451_v3  ;;  %v1242_v4 = vld [vmem:[%s1360_s4 + $0x40] sm:$0xff]   ;;  %v1247_v9 = vld [vmem:[%s1360_s4 + $0x18] sm:$0xff]   ;;  %v1251_v13 = vld [vmem:[%s1360_s4 + $0x28] sm:$0xff]   ;;  %vm914_vm4 = vcmask (!%p1077_p8), 125952  }
  0x26   : > { %1164 = vmatprep.mubr.msk.bf16.mxu0 %vm400_vm2, %v1241_v2  ;;  %1180 = vmatprep.mubr.msk.bf16.mxu1 %vm400_vm2, %v1242_v4  ;;  %v1248_v10 = vld [vmem:[%s1360_s4 + $0x58] sm:$0xff]   ;;  %v1249_v11 = vld [vmem:[%s1360_s4 + $0x20] sm:$0xff]   ;;  %v1252_v14 = vld [vmem:[%s1360_s4 + $0x68] sm:$0xff]  }
  0x27   : > { %v1250_v12 = vld [vmem:[%s1360_s4 + $0x60] sm:$0xff]   ;;  %v1253_v15 = vld [vmem:[%s1360_s4 + $0x30] sm:$0xff]   ;;  %v1255_v17 = vld [vmem:[%s1360_s4 + $0x38] sm:$0xff]  }
  0x28   : > { %1165 = vmatmul.mubr.msk.bf16.vlgmr.msra.gmra.mrb[0].mxu0 %vm400_vm2, %v1243_v5  ;;  %1181 = vmatmul.mubr.msk.bf16.vlgmr.msra.gmra.mrb[0].mxu1 %vm400_vm2, %v1244_v6  ;;  %v1254_v16 = vld [vmem:[%s1360_s4 + $0x70] sm:$0xff]   ;;  %v1256_v18 = vld [vmem:[%s1360_s4 + $0x78] sm:$0xff]   ;;  %v255_v21 = vld [vmem:[#allocation2] sm:$0xff] }
  0x29   : > { %1168 = vmatprep.mubr.msk.bf16.mxu0 %vm400_vm2, %v1245_v7  ;;  %1184 = vmatprep.mubr.msk.bf16.mxu1 %vm400_vm2, %v1246_v8  ;;  %v257_v19 = vld [vmem:[#allocation2 + $0x10] sm:$0xff]  ;;  %v271_v23 = vld [vmem:[#allocation2 + $0x80] sm:$0xff]  ;;  %v258_v24 = vld [vmem:[#allocation2 + $0x18] sm:$0xff] }
  0x2a   : > { %v273_v20 = vld [vmem:[#allocation2 + $0x90] sm:$0xff]  ;;  %v274_v28 = vld [vmem:[#allocation2 + $0x98] sm:$0xff]  ;;  %v256_v29 = vld [vmem:[#allocation2 + $0x8] sm:$0xff] }
  0x2b   : > { %v272_v34 = vld [vmem:[#allocation2 + $0x88] sm:$0xff]  ;;  %v261_v43 = vld [vmem:[#allocation2 + $0x30] sm:$0xff]  ;;  %v259_v45 = vld [vmem:[#allocation2 + $0x20] sm:$0xff] }
  0x2c   : > { %v277_v44 = vld [vmem:[#allocation2 + $0xb0] sm:$0xff]  ;;  %v275_v47 = vld [vmem:[#allocation2 + $0xa0] sm:$0xff]  ;;  %v262_v48 = vld [vmem:[#allocation2 + $0x38] sm:$0xff] }
  0x2d   : > { %v278_v52 = vld [vmem:[#allocation2 + $0xb8] sm:$0xff]  ;;  %v260_v53 = vld [vmem:[#allocation2 + $0x28] sm:$0xff]  ;;  %v265_v3 = vld [vmem:[#allocation2 + $0x50] sm:$0xff] }
  0x2e   : > { %v276_v58 = vld [vmem:[#allocation2 + $0xa8] sm:$0xff]  ;;  %v281_v4 = vld [vmem:[#allocation2 + $0xd0] sm:$0xff]  ;;  %v263_v5 = vld [vmem:[#allocation2 + $0x40] sm:$0xff] }
  0x2f   : > { %v279_v7 = vld [vmem:[#allocation2 + $0xc0] sm:$0xff]  ;;  %v266_v8 = vld [vmem:[#allocation2 + $0x58] sm:$0xff] }
  0x30   : > { %1169 = vmatmul.mubr.msk.bf16.gmra.mrb[4].mxu0 %vm400_vm2, %v1247_v9  ;;  %1185 = vmatmul.mubr.msk.bf16.gmra.mrb[4].mxu1 %vm400_vm2, %v1248_v10 }
  0x31   : > { %1172 = vmatprep.mubr.msk.bf16.mxu0 %vm400_vm2, %v1249_v11  ;;  %1188 = vmatprep.mubr.msk.bf16.mxu1 %vm400_vm2, %v1250_v12  ;;  %v282_v12 = vld [vmem:[#allocation2 + $0xd8] sm:$0xff] }
  0x38   : > { %1173 = vmatmul.mubr.msk.bf16.gmra.mrb[8].mxu0 %vm400_vm2, %v1251_v13  ;;  %1189 = vmatmul.mubr.msk.bf16.gmra.mrb[8].mxu1 %vm400_vm2, %v1252_v14  ;;  %v264_v13 = vld [vmem:[#allocation2 + $0x48] sm:$0xff] }
  0x39   : > { %1176 = vmatprep.mubr.msk.bf16.mxu0 %vm400_vm2, %v1253_v15  ;;  %1192 = vmatprep.mubr.msk.bf16.mxu1 %vm400_vm2, %v1254_v16 }
  0x40   : > { %1177 = vmatmul.mubr.msk.bf16.gmra.mrb[12].mxu0 %vm400_vm2, %v1255_v17  ;;  %1193 = vmatmul.mubr.msk.bf16.gmra.mrb[12].mxu1 %vm400_vm2, %v1256_v18  ;;  %v280_v18 = vld [vmem:[#allocation2 + $0xc8] sm:$0xff] }
  0xfb   : > { %v1166_v22 = vpop.f32.mrb[0].mxu0  ;;  %v1182_v26 = vpop.f32.mrb[0].mxu1 }
  0xfc   : > { %v616_v25 = vadd.f32 %v1166_v22, %v257_v19  ;;  %v487_v27 = vpop.f32.mrb[1].mxu0  ;;  %v632_v30 = vadd.f32 %v1182_v26, %v273_v20  ;;  %v551_v32 = vpop.f32.mrb[1].mxu1 }
  0xfd   : > { %v614_v31 = vadd.f32 %v487_v27, %v255_v21  ;;  %v1167_v33 = vpop.f32.mrb[2].mxu0  ;;  %v630_v35 = vadd.f32 %v551_v32, %v271_v23  ;;  %v1183_v37 = vpop.f32.mrb[2].mxu1  ;;  %v269_v27 = vld [vmem:[#allocation2 + $0x70] sm:$0xff]  ;;  %v270_v32 = vld [vmem:[#allocation2 + $0x78] sm:$0xff] }
  0xfe   : > { %649 = vst.msk [vmem:[#allocation2 + $0x10] sm:$0xff] %vm646_vm3, %v616_v25  ;;  %v617_v36 = vadd.f32 %v1167_v33, %v258_v24  ;;  %v490_v38 = vpop.f32.mrb[3].mxu0  ;;  %665 = vst.msk [vmem:[#allocation2 + $0x90] sm:$0xff] %vm646_vm3, %v632_v30  ;;  %v633_v39 = vadd.f32 %v1183_v37, %v274_v28  ;;  %v554_v41 = vpop.f32.mrb[3].mxu1  ;;  %v285_v28 = vld [vmem:[#allocation2 + $0xf0] sm:$0xff]  ;;  %v268_v37 = vld [vmem:[#allocation2 + $0x68] sm:$0xff] }
  0xff   : > { %647 = vst.msk [vmem:[#allocation2] sm:$0xff] %vm646_vm3, %v614_v31  ;;  %v615_v40 = vadd.f32 %v490_v38, %v256_v29  ;;  %663 = vst.msk [vmem:[#allocation2 + $0x80] sm:$0xff] %vm646_vm3, %v630_v35  ;;  %v631_v42 = vadd.f32 %v554_v41, %v272_v34  ;;  %v267_v29 = vld [vmem:[#allocation2 + $0x60] sm:$0xff] }
 0x100   : > { %650 = vst.msk [vmem:[#allocation2 + $0x18] sm:$0xff] %vm646_vm3, %v617_v36  ;;  %666 = vst.msk [vmem:[#allocation2 + $0x98] sm:$0xff] %vm646_vm3, %v633_v39  ;;  %v283_v31 = vld [vmem:[#allocation2 + $0xe0] sm:$0xff]  ;;  %v286_v36 = vld [vmem:[#allocation2 + $0xf8] sm:$0xff] }
 0x101   : > { %648 = vst.msk [vmem:[#allocation2 + $0x8] sm:$0xff] %vm646_vm3, %v615_v40  ;;  %664 = vst.msk [vmem:[#allocation2 + $0x88] sm:$0xff] %vm646_vm3, %v631_v42  ;;  %v284_v42 = vld [vmem:[#allocation2 + $0xe8] sm:$0xff] }
 0x103   : > { %v1170_v46 = vpop.f32.mrb[4].mxu0  ;;  %v1186_v50 = vpop.f32.mrb[4].mxu1 }
 0x104   : > { %v620_v49 = vadd.f32 %v1170_v46, %v261_v43  ;;  %v503_v51 = vpop.f32.mrb[5].mxu0  ;;  %v636_v54 = vadd.f32 %v1186_v50, %v277_v44  ;;  %v567_v56 = vpop.f32.mrb[5].mxu1 }
 0x105   : > { %v618_v55 = vadd.f32 %v503_v51, %v259_v45  ;;  %v1171_v57 = vpop.f32.mrb[6].mxu0  ;;  %v634_v59 = vadd.f32 %v567_v56, %v275_v47  ;;  %v1187_v61 = vpop.f32.mrb[6].mxu1  ;;  %v685_v56 = vld [vmem:[#allocation2 + $0x10] sm:$0xff] (!%p1077_p8) }
 0x106   : > { %653 = vst.msk [vmem:[#allocation2 + $0x30] sm:$0xff] %vm646_vm3, %v620_v49  ;;  %v621_v60 = vadd.f32 %v1171_v57, %v262_v48  ;;  %v506_v62 = vpop.f32.mrb[7].mxu0  ;;  %669 = vst.msk [vmem:[#allocation2 + $0xb0] sm:$0xff] %vm646_vm3, %v636_v54  ;;  %v637_v63 = vadd.f32 %v1187_v61, %v278_v52  ;;  %v570_v1 = vpop.f32.mrb[7].mxu1  ;;  %v683_v51 = vld [vmem:[#allocation2] sm:$0xff] (!%p1077_p8) }
 0x107   : > { %651 = vst.msk [vmem:[#allocation2 + $0x20] sm:$0xff] %vm646_vm3, %v618_v55  ;;  %v619_v0 = vadd.f32 %v506_v62, %v260_v53  ;;  %667 = vst.msk [vmem:[#allocation2 + $0xa0] sm:$0xff] %vm646_vm3, %v634_v59  ;;  %v635_v2 = vadd.f32 %v570_v1, %v276_v58  ;;  %v1469_v52 = vld [vmem:[%s1584_s2] ss:$0 sm:$0xff] (!%p1077_p8)  ;;  %v686_v57 = vld [vmem:[#allocation2 + $0x18] sm:$0xff] (!%p1077_p8) }
 0x108   : > { %654 = vst.msk [vmem:[#allocation2 + $0x38] sm:$0xff] %vm646_vm3, %v621_v60  ;;  %670 = vst.msk [vmem:[#allocation2 + $0xb8] sm:$0xff] %vm646_vm3, %v637_v63  ;;  %v684_v53 = vld [vmem:[#allocation2 + $0x8] sm:$0xff] (!%p1077_p8)  ;;  %v722_v54 = vadd.f32 (!%p1077_p8), %v1469_v52, %v683_v51  ;;  %v724_v59 = vadd.f32 (!%p1077_p8), %v1469_v52, %v685_v56  ;;  %v725_v60 = vadd.f32 (!%p1077_p8), %v1469_v52, %v686_v57 }
 0x109   : > { %652 = vst.msk [vmem:[#allocation2 + $0x28] sm:$0xff] %vm646_vm3, %v619_v0  ;;  %668 = vst.msk [vmem:[#allocation2 + $0xa8] sm:$0xff] %vm646_vm3, %v635_v2  ;;  %v723_v55 = vadd.f32 (!%p1077_p8), %v1469_v52, %v684_v53 }
 0x10a   : > { %v754_v1 = vmax.f32 (!%p1077_p8), %v722_v54, 0.0 }
 0x10b   : > { %v1174_v6 = vpop.f32.mrb[8].mxu0  ;;  %v1190_v10 = vpop.f32.mrb[8].mxu1  ;;  %v755_v2 = vmax.f32 (!%p1077_p8), %v723_v55, 0.0 }
 0x10c   : > { %v624_v9 = vadd.f32 %v1174_v6, %v265_v3  ;;  %v519_v11 = vpop.f32.mrb[9].mxu0  ;;  %v640_v14 = vadd.f32 %v1190_v10, %v281_v4  ;;  %v583_v16 = vpop.f32.mrb[9].mxu1  ;;  %v757_v6 = vmax.f32 (!%p1077_p8), %v725_v60, 0.0 }
 0x10d   : > { %v622_v15 = vadd.f32 %v519_v11, %v263_v5  ;;  %v1175_v17 = vpop.f32.mrb[10].mxu0  ;;  %v638_v19 = vadd.f32 %v583_v16, %v279_v7  ;;  %v1191_v21 = vpop.f32.mrb[10].mxu1  ;;  %v689_v63 = vld [vmem:[#allocation2 + $0x30] sm:$0xff] (!%p1077_p8)  ;;  %v756_v5 = vmax.f32 (!%p1077_p8), %v724_v59, 0.0  ;;  %v1113_v11 = vpack.c.bf16 (!%p1077_p8), %v754_v1, %v754_v1 }
 0x10e   : > { %657 = vst.msk [vmem:[#allocation2 + $0x50] sm:$0xff] %vm646_vm3, %v624_v9  ;;  %v625_v20 = vadd.f32 %v1175_v17, %v266_v8  ;;  %v522_v22 = vpop.f32.mrb[11].mxu0  ;;  %673 = vst.msk [vmem:[#allocation2 + $0xd0] sm:$0xff] %vm646_vm3, %v640_v14  ;;  %v641_v23 = vadd.f32 %v1191_v21, %v282_v12  ;;  %v586_v25 = vpop.f32.mrb[11].mxu1  ;;  %v687_v58 = vld [vmem:[#allocation2 + $0x20] sm:$0xff] (!%p1077_p8)  ;;  %v728_v4 = vadd.f32 (!%p1077_p8), %v1469_v52, %v689_v63  ;;  %v705_v56 = vld [vmem:[#allocation2 + $0xb0] sm:$0xff] (!%p1077_p8) }
 0x10f   : > { %655 = vst.msk [vmem:[#allocation2 + $0x40] sm:$0xff] %vm646_vm3, %v622_v15  ;;  %v623_v24 = vadd.f32 %v522_v22, %v264_v13  ;;  %671 = vst.msk [vmem:[#allocation2 + $0xc0] sm:$0xff] %vm646_vm3, %v638_v19  ;;  %v639_v26 = vadd.f32 %v586_v25, %v280_v18  ;;  %v726_v61 = vadd.f32 (!%p1077_p8), %v1469_v52, %v687_v58  ;;  %v690_v0 = vld [vmem:[#allocation2 + $0x38] sm:$0xff] (!%p1077_p8) }
 0x110   : > { %658 = vst.msk [vmem:[#allocation2 + $0x58] sm:$0xff] %vm646_vm3, %v625_v20  ;;  %674 = vst.msk [vmem:[#allocation2 + $0xd8] sm:$0xff] %vm646_vm3, %v641_v23  ;;  %v688_v62 = vld [vmem:[#allocation2 + $0x28] sm:$0xff] (!%p1077_p8)  ;;  %v729_v8 = vadd.f32 (!%p1077_p8), %v1469_v52, %v690_v0  ;;  %v1114_v12 = vpack.c.bf16 (!%p1077_p8), %v755_v2, %v755_v2  ;;  %v760_v14 = vmax.f32 (!%p1077_p8), %v728_v4, 0.0  ;;  %v1115_v18 = vpack.c.bf16 (!%p1077_p8), %v756_v5, %v756_v5 }
 0x111   : > { %656 = vst.msk [vmem:[#allocation2 + $0x48] sm:$0xff] %vm646_vm3, %v623_v24  ;;  %672 = vst.msk [vmem:[#allocation2 + $0xc8] sm:$0xff] %vm646_vm3, %v639_v26  ;;  %v727_v3 = vadd.f32 (!%p1077_p8), %v1469_v52, %v688_v62  ;;  %v758_v7 = vmax.f32 (!%p1077_p8), %v726_v61, 0.0  ;;  %v1116_v19 = vpack.c.bf16 (!%p1077_p8), %v757_v6, %v757_v6  ;;  %v704_v55 = vld [vmem:[#allocation2 + $0xa8] sm:$0xff] (!%p1077_p8)  ;;  %v706_v61 = vld [vmem:[#allocation2 + $0xb8] sm:$0xff] (!%p1077_p8)  ;;  %v744_v5 = vadd.f32 (!%p1077_p8), %v1469_v52, %v705_v56 }
 0x112   : > { %v761_v21 = vmax.f32 (!%p1077_p8), %v729_v8, 0.0  ;;  %915 = vst.msk [vmem:[%s1365_s7] sm:$0xf] (!%p1077_p8), %vm914_vm4, %v1113_v11  ;;  %916 = vst.msk [vmem:[%s1365_s7 + $0x4] sm:$0xf] (!%p1077_p8), %vm914_vm4, %v1114_v12  ;;  %v1119_v25 = vpack.c.bf16 (!%p1077_p8), %v760_v14, %v760_v14  ;;  %v743_v4 = vadd.f32 (!%p1077_p8), %v1469_v52, %v704_v55 }
 0x113   : > { %v1178_v30 = vpop.f32.mrb[12].mxu0  ;;  %v1194_v34 = vpop.f32.mrb[12].mxu1  ;;  %682 = sbr.rel (%p1077_p8) target bundleno = 300 (0x12c), region = 40  ;;  %v759_v13 = vmax.f32 (!%p1077_p8), %v727_v3, 0.0  ;;  %v1117_v20 = vpack.c.bf16 (!%p1077_p8), %v758_v7, %v758_v7  ;;  %917 = vst.msk [vmem:[%s1365_s7 + $0x8] sm:$0xf] (!%p1077_p8), %vm914_vm4, %v1115_v18 }
 0x114   : > { %v628_v33 = vadd.f32 %v1178_v30, %v269_v27  ;;  %v535_v35 = vpop.f32.mrb[13].mxu0  ;;  %v644_v38 = vadd.f32 %v1194_v34, %v285_v28  ;;  %v599_v40 = vpop.f32.mrb[13].mxu1  ;;  %918 = vst.msk [vmem:[%s1365_s7 + $0xc] sm:$0xf] (!%p1077_p8), %vm914_vm4, %v1116_v19  ;;  %921 = vst.msk [vmem:[%s1365_s7 + $0x18] sm:$0xf] (!%p1077_p8), %vm914_vm4, %v1119_v25 }
 0x115   : > { %v626_v39 = vadd.f32 %v535_v35, %v267_v29  ;;  %v1179_v41 = vpop.f32.mrb[14].mxu0  ;;  %v642_v43 = vadd.f32 %v599_v40, %v283_v31  ;;  %v1195_v45 = vpop.f32.mrb[14].mxu1  ;;  %v693_v15 = vld [vmem:[#allocation2 + $0x50] sm:$0xff] (!%p1077_p8)  ;;  %v1118_v24 = vpack.c.bf16 (!%p1077_p8), %v759_v13, %v759_v13  ;;  %919 = vst.msk [vmem:[%s1365_s7 + $0x10] sm:$0xf] (!%p1077_p8), %vm914_vm4, %v1117_v20  ;;  %v1120_v29 = vpack.c.bf16 (!%p1077_p8), %v761_v21, %v761_v21 }
 0x116   : > { %661 = vst.msk [vmem:[#allocation2 + $0x70] sm:$0xff] %vm646_vm3, %v628_v33  ;;  %v629_v44 = vadd.f32 %v1179_v41, %v270_v32  ;;  %v538_v46 = vpop.f32.mrb[15].mxu0  ;;  %677 = vst.msk [vmem:[#allocation2 + $0xf0] sm:$0xff] %vm646_vm3, %v644_v38  ;;  %v645_v47 = vadd.f32 %v1195_v45, %v286_v36  ;;  %v602_v49 = vpop.f32.mrb[15].mxu1  ;;  %v691_v9 = vld [vmem:[#allocation2 + $0x40] sm:$0xff] (!%p1077_p8)  ;;  %v732_v30 = vadd.f32 (!%p1077_p8), %v1469_v52, %v693_v15  ;;  %v775_v14 = vmax.f32 (!%p1077_p8), %v743_v4, 0.0 }
 0x117   : > { %659 = vst.msk [vmem:[#allocation2 + $0x60] sm:$0xff] %vm646_vm3, %v626_v39  ;;  %v627_v48 = vadd.f32 %v538_v46, %v268_v37  ;;  %675 = vst.msk [vmem:[#allocation2 + $0xe0] sm:$0xff] %vm646_vm3, %v642_v43  ;;  %v643_v50 = vadd.f32 %v602_v49, %v284_v42  ;;  %v694_v16 = vld [vmem:[#allocation2 + $0x58] sm:$0xff] (!%p1077_p8)  ;;  %v730_v26 = vadd.f32 (!%p1077_p8), %v1469_v52, %v691_v9  ;;  %v699_v41 = vld [vmem:[#allocation2 + $0x80] sm:$0xff] (!%p1077_p8)  ;;  %v776_v15 = vmax.f32 (!%p1077_p8), %v744_v5, 0.0 }
 0x118   : > { %662 = vst.msk [vmem:[#allocation2 + $0x78] sm:$0xff] %vm646_vm3, %v629_v44  ;;  %678 = vst.msk [vmem:[#allocation2 + $0xf8] sm:$0xff] %vm646_vm3, %v645_v47  ;;  %v692_v10 = vld [vmem:[#allocation2 + $0x48] sm:$0xff] (!%p1077_p8)  ;;  %v733_v31 = vadd.f32 (!%p1077_p8), %v1469_v52, %v694_v16  ;;  %v764_v37 = vmax.f32 (!%p1077_p8), %v732_v30, 0.0  ;;  %v701_v47 = vld [vmem:[#allocation2 + $0x90] sm:$0xff] (!%p1077_p8)  ;;  %v738_v59 = vadd.f32 (!%p1077_p8), %v1469_v52, %v699_v41  ;;  %v745_v9 = vadd.f32 (!%p1077_p8), %v1469_v52, %v706_v61 }
 0x119   : > { %660 = vst.msk [vmem:[#allocation2 + $0x68] sm:$0xff] %vm646_vm3, %v627_v48  ;;  %676 = vst.msk [vmem:[#allocation2 + $0xe8] sm:$0xff] %vm646_vm3, %v643_v50  ;;  %v731_v27 = vadd.f32 (!%p1077_p8), %v1469_v52, %v692_v10  ;;  %v762_v33 = vmax.f32 (!%p1077_p8), %v730_v26, 0.0  ;;  %v700_v42 = vld [vmem:[#allocation2 + $0x88] sm:$0xff] (!%p1077_p8)  ;;  %v702_v48 = vld [vmem:[#allocation2 + $0x98] sm:$0xff] (!%p1077_p8)  ;;  %v740_v63 = vadd.f32 (!%p1077_p8), %v1469_v52, %v701_v47  ;;  %v1134_v25 = vpack.c.bf16 (!%p1077_p8), %v775_v14, %v775_v14 }
 0x11a   : > { %920 = vst.msk [vmem:[%s1365_s7 + $0x14] sm:$0xf] %vm914_vm4, %v1118_v24  ;;  %922 = vst.msk [vmem:[%s1365_s7 + $0x1c] sm:$0xf] %vm914_vm4, %v1120_v29  ;;  %v765_v38 = vmax.f32 %v733_v31, 0.0  ;;  %v703_v49 = vld [vmem:[#allocation2 + $0xa0] sm:$0xff]  ;;  %v1123_v50 = vpack.c.bf16 %v764_v37, %v764_v37  ;;  %v739_v60 = vadd.f32 %v1469_v52, %v700_v42  ;;  %v741_v0 = vadd.f32 %v1469_v52, %v702_v48 }
 0x11b   : > { %v763_v34 = vmax.f32 %v731_v27, 0.0  ;;  %v1121_v43 = vpack.c.bf16 %v762_v33, %v762_v33  ;;  %v742_v1 = vadd.f32 %v1469_v52, %v703_v49  ;;  %v770_v2 = vmax.f32 %v738_v59, 0.0  ;;  %v707_v10 = vld [vmem:[#allocation2 + $0xc0] sm:$0xff]  ;;  %v708_v11 = vld [vmem:[#allocation2 + $0xc8] sm:$0xff]  ;;  %v709_v16 = vld [vmem:[#allocation2 + $0xd0] sm:$0xff] }
 0x11c   : > { %v1124_v51 = vpack.c.bf16 %v765_v38, %v765_v38  ;;  %925 = vst.msk [vmem:[%s1365_s7 + $0x28] sm:$0xf] %vm914_vm4, %v1123_v50  ;;  %v771_v3 = vmax.f32 %v739_v60, 0.0  ;;  %v772_v6 = vmax.f32 %v740_v63, 0.0  ;;  %v773_v7 = vmax.f32 %v741_v0, 0.0 }
 0x11d   : > { %v697_v23 = vld [vmem:[#allocation2 + $0x70] sm:$0xff]  ;;  %v1122_v44 = vpack.c.bf16 %v763_v34, %v763_v34  ;;  %923 = vst.msk [vmem:[%s1365_s7 + $0x20] sm:$0xf] %vm914_vm4, %v1121_v43  ;;  %v774_v8 = vmax.f32 %v742_v1, 0.0  ;;  %v1129_v12 = vpack.c.bf16 %v770_v2, %v770_v2  ;;  %v1135_v26 = vpack.c.bf16 %v776_v15, %v776_v15  ;;  %936 = vst.msk [vmem:[%s1365_s7 + $0x54] sm:$0xf] %vm914_vm4, %v1134_v25 }
 0x11e   : > { %v695_v17 = vld [vmem:[#allocation2 + $0x60] sm:$0xff]  ;;  %v736_v36 = vadd.f32 %v1469_v52, %v697_v23  ;;  %926 = vst.msk [vmem:[%s1365_s7 + $0x2c] sm:$0xf] %vm914_vm4, %v1124_v51  ;;  %v1130_v13 = vpack.c.bf16 %v771_v3, %v771_v3  ;;  %v1131_v19 = vpack.c.bf16 %v772_v6, %v772_v6  ;;  %v1132_v20 = vpack.c.bf16 %v773_v7, %v773_v7  ;;  %v713_v24 = vld [vmem:[#allocation2 + $0xf0] sm:$0xff] }
 0x11f   : > { %v698_v28 = vld [vmem:[#allocation2 + $0x78] sm:$0xff]  ;;  %v734_v32 = vadd.f32 %v1469_v52, %v695_v17  ;;  %924 = vst.msk [vmem:[%s1365_s7 + $0x24] sm:$0xf] %vm914_vm4, %v1122_v44  ;;  %v711_v18 = vld [vmem:[#allocation2 + $0xe0] sm:$0xff]  ;;  %v1133_v21 = vpack.c.bf16 %v774_v8, %v774_v8  ;;  %931 = vst.msk [vmem:[%s1365_s7 + $0x40] sm:$0xf] %vm914_vm4, %v1129_v12  ;;  %v746_v27 = vadd.f32 %v1469_v52, %v707_v10 }
 0x120   : > { %v696_v22 = vld [vmem:[#allocation2 + $0x68] sm:$0xff]  ;;  %v737_v40 = vadd.f32 %v1469_v52, %v698_v28  ;;  %v768_v46 = vmax.f32 %v736_v36, 0.0  ;;  %v710_v17 = vld [vmem:[#allocation2 + $0xd8] sm:$0xff]  ;;  %932 = vst.msk [vmem:[%s1365_s7 + $0x44] sm:$0xf] %vm914_vm4, %v1130_v13  ;;  %v747_v28 = vadd.f32 %v1469_v52, %v708_v11  ;;  %v748_v31 = vadd.f32 %v1469_v52, %v709_v16 }
 0x121   : > { %v735_v35 = vadd.f32 %v1469_v52, %v696_v22  ;;  %v766_v39 = vmax.f32 %v734_v32, 0.0  ;;  %v777_v22 = vmax.f32 %v745_v9, 0.0  ;;  %v712_v23 = vld [vmem:[#allocation2 + $0xe8] sm:$0xff]  ;;  %v714_v29 = vld [vmem:[#allocation2 + $0xf8] sm:$0xff]  ;;  %933 = vst.msk [vmem:[%s1365_s7 + $0x48] sm:$0xf] %vm914_vm4, %v1131_v19  ;;  %v749_v32 = vadd.f32 %v1469_v52, %v710_v17 }
 0x122   : > { %v769_v54 = vmax.f32 %v737_v40, 0.0  ;;  %v1127_v58 = vpack.c.bf16 %v768_v46, %v768_v46  ;;  %934 = vst.msk [vmem:[%s1365_s7 + $0x4c] sm:$0xf] %vm914_vm4, %v1132_v20  ;;  %935 = vst.msk [vmem:[%s1365_s7 + $0x50] sm:$0xf] %vm914_vm4, %v1133_v21  ;;  %v750_v33 = vadd.f32 %v1469_v52, %v711_v18  ;;  %v778_v34 = vmax.f32 %v746_v27, 0.0 }
 0x123   : > { %v767_v45 = vmax.f32 %v735_v35, 0.0  ;;  %v1125_v53 = vpack.c.bf16 %v766_v39, %v766_v39  ;;  %v1136_v30 = vpack.c.bf16 %v777_v22, %v777_v22  ;;  %937 = vst.msk [vmem:[%s1365_s7 + $0x58] sm:$0xf] %vm914_vm4, %v1135_v26  ;;  %v779_v35 = vmax.f32 %v747_v28, 0.0 }
 0x124   : > { %v1128_v62 = vpack.c.bf16 %v769_v54, %v769_v54  ;;  %929 = vst.msk [vmem:[%s1365_s7 + $0x38] sm:$0xf] %vm914_vm4, %v1127_v58  ;;  %v751_v36 = vadd.f32 %v1469_v52, %v712_v23  ;;  %v752_v37 = vadd.f32 %v1469_v52, %v713_v24  ;;  %v780_v38 = vmax.f32 %v748_v31, 0.0 }
 0x125   : > { %v1126_v57 = vpack.c.bf16 %v767_v45, %v767_v45  ;;  %927 = vst.msk [vmem:[%s1365_s7 + $0x30] sm:$0xf] %vm914_vm4, %v1125_v53  ;;  %938 = vst.msk [vmem:[%s1365_s7 + $0x5c] sm:$0xf] %vm914_vm4, %v1136_v30  ;;  %v781_v39 = vmax.f32 %v749_v32, 0.0  ;;  %v782_v40 = vmax.f32 %v750_v33, 0.0  ;;  %v753_v41 = vadd.f32 %v1469_v52, %v714_v29 }
 0x126   : > { %930 = vst.msk [vmem:[%s1365_s7 + $0x3c] sm:$0xf] %vm914_vm4, %v1128_v62  ;;  %v1137_v42 = vpack.c.bf16 %v778_v34, %v778_v34  ;;  %v1138_v43 = vpack.c.bf16 %v779_v35, %v779_v35  ;;  %v783_v44 = vmax.f32 %v751_v36, 0.0  ;;  %v784_v45 = vmax.f32 %v752_v37, 0.0 }
 0x127   : > { %928 = vst.msk [vmem:[%s1365_s7 + $0x34] sm:$0xf] %vm914_vm4, %v1126_v57  ;;  %v1139_v46 = vpack.c.bf16 %v780_v38, %v780_v38  ;;  %v1140_v47 = vpack.c.bf16 %v781_v39, %v781_v39  ;;  %v1141_v48 = vpack.c.bf16 %v782_v40, %v782_v40  ;;  %v785_v49 = vmax.f32 %v753_v41, 0.0 }
 0x128   : > { %939 = vst.msk [vmem:[%s1365_s7 + $0x60] sm:$0xf] %vm914_vm4, %v1137_v42  ;;  %940 = vst.msk [vmem:[%s1365_s7 + $0x64] sm:$0xf] %vm914_vm4, %v1138_v43  ;;  %v1142_v50 = vpack.c.bf16 %v783_v44, %v783_v44  ;;  %v1143_v51 = vpack.c.bf16 %v784_v45, %v784_v45 }
 0x129   : > { %941 = vst.msk [vmem:[%s1365_s7 + $0x68] sm:$0xf] %vm914_vm4, %v1139_v46  ;;  %942 = vst.msk [vmem:[%s1365_s7 + $0x6c] sm:$0xf] %vm914_vm4, %v1140_v47  ;;  %v1144_v52 = vpack.c.bf16 %v785_v49, %v785_v49 }
 0x12a   : > { %943 = vst.msk [vmem:[%s1365_s7 + $0x70] sm:$0xf] %vm914_vm4, %v1141_v48  ;;  %944 = vst.msk [vmem:[%s1365_s7 + $0x74] sm:$0xf] %vm914_vm4, %v1142_v50 }
 0x12b   : > { %945 = vst.msk [vmem:[%s1365_s7 + $0x78] sm:$0xf] %vm914_vm4, %v1143_v51  ;;  %946 = vst.msk [vmem:[%s1365_s7 + $0x7c] sm:$0xf] %vm914_vm4, %v1144_v52 }
 0x12c PF: > { %s13_s16 = sadd.s32 1, %s1295_s16   ;;  %s1586_s12 = smov %s1287_s14 }
 0x12d   : > { %p10_p9 = scmp.ge.s32.totalorder %s13_s16, 20   ;;  %s1587_s13 = smov %s1291_s15 }
 0x12e   : > { %s1588_s14 = smov %s1591_s17  ;;  %s1589_s15 = smov %s1595_s18 }
 0x12f   :  { %12 = sbr.rel (!%p10_p9) target bundleno = 3 (0x3), region = 73 }

// kernel: _lambda_.22
= control target key start
LH: loop header
LB: loop body
LE: loop exit
PB: predicated region body
PF: predicated region fallthrough
CT: control target
= control target key end

     0   :  { %s871_s12 = smov 0   ;;  %s873_s13 = smov 0   ;;  %s1027_s0 = inlined_call_operand.vmem [shape: bf16[9,128,16], index: 0, kind: input, shape index: {}]   ;;  %s1028_s1 = inlined_call_operand.vmem [shape: bf16[9,16,32], index: 1, kind: input, shape index: {}]   ;;  %s1029_s2 = inlined_call_operand.vmem [shape: f32[1,32], index: 2, kind: input, shape index: {}]   ;;  %s1030_s3 = inlined_call_operand.vmem [shape: bf16[128,32], index: 3, kind: output, shape index: {}]  }
   0x1   :  { %s875_s14 = smov 0  }
   0x2 LB: > { %s22_s15 = sadd.s32 1, %s844_s13  ;;  %p700_p0 = scmp.ge.s32.totalorder %s848_s14, 1  ;;  %s848_s14 = sphi %s875_s14, %s13_s14   ;;  %s844_s13 = sphi %s873_s13, %s1032_s13   ;;  %s840_s12 = sphi %s871_s12, %s1031_s12  }
   0x3   : > { %p23_p1 = scmp.ge.s32.totalorder %s22_s15, 9  ;;  %p166_p2 = scmp.lt.s32.totalorder %s848_s14, 10 }
   0x5   : > { %s1034_s15 = smov (%p23_p1, %s22_s15), 0  ;;  %p167_p3 = pnand %p700_p0, %p166_p2 }
   0x6   : > { %p200_p4 = scmp.lt.s32.totalorder (!%p167_p3), %s840_s12, 8  ;;  %p705_p5 = scmp.ne.s32.totalorder (!%p167_p3), %s840_s12, 0 }
   0x7   : > { %170 = sbr.rel (%p167_p3) target bundleno = 270 (0x10e), region = 32 }
   0xe   : > { %s201_s16 = scalar_select %p200_p4, %s840_s12, 8 }
   0xf   : > { %224 = sbr.rel (%p705_p5) target bundleno = 24 (0x18), region = 36  ;;  %vm225_vm0 = vcmask (!%p705_p5), 261120   ;;  %v850_v0 = vmov (!%p705_p5), 0.0  }
  0x10   : > { %s745_s17 = sshll.u32 %s201_s16, 6  ;;  %s746_s18 = sshll.u32 %s201_s16, 3  ;;  %226 = vst.msk [vmem:[#allocation2] sm:$0xff] (!%p705_p5), %vm225_vm0, %v850_v0  ;;  %227 = vst.msk [vmem:[#allocation2 + $0x8] sm:$0xff] (!%p705_p5), %vm225_vm0, %v850_v0 }
  0x11   : > { %s896_s21 = scalar_lea.vmem %s1027_s0, %s745_s17  ;;  %s213_s24 = scalar_lea.vmem %s1028_s1, %s746_s18  ;;  %228 = vst.msk [vmem:[#allocation2 + $0x10] sm:$0xff] (!%p705_p5), %vm225_vm0, %v850_v0  ;;  %229 = vst.msk [vmem:[#allocation2 + $0x18] sm:$0xff] (!%p705_p5), %vm225_vm0, %v850_v0 }
  0x12   : > { %230 = vst.msk [vmem:[#allocation2 + $0x20] sm:$0xff] (!%p705_p5), %vm225_vm0, %v850_v0  ;;  %231 = vst.msk [vmem:[#allocation2 + $0x28] sm:$0xff] (!%p705_p5), %vm225_vm0, %v850_v0 }
  0x13   : > { %232 = vst.msk [vmem:[#allocation2 + $0x30] sm:$0xff] (!%p705_p5), %vm225_vm0, %v850_v0  ;;  %233 = vst.msk [vmem:[#allocation2 + $0x38] sm:$0xff] (!%p705_p5), %vm225_vm0, %v850_v0 }
  0x14   : > { %234 = vst.msk [vmem:[#allocation2 + $0x40] sm:$0xff] (!%p705_p5), %vm225_vm0, %v850_v0  ;;  %235 = vst.msk [vmem:[#allocation2 + $0x48] sm:$0xff] (!%p705_p5), %vm225_vm0, %v850_v0 }
  0x15   : > { %236 = vst.msk [vmem:[#allocation2 + $0x50] sm:$0xff] (!%p705_p5), %vm225_vm0, %v850_v0  ;;  %237 = vst.msk [vmem:[#allocation2 + $0x58] sm:$0xff] (!%p705_p5), %vm225_vm0, %v850_v0 }
  0x16   : > { %238 = vst.msk [vmem:[#allocation2 + $0x60] sm:$0xff] %vm225_vm0, %v850_v0  ;;  %239 = vst.msk [vmem:[#allocation2 + $0x68] sm:$0xff] %vm225_vm0, %v850_v0 }
  0x17   : > { %240 = vst.msk [vmem:[#allocation2 + $0x70] sm:$0xff] %vm225_vm0, %v850_v0  ;;  %241 = vst.msk [vmem:[#allocation2 + $0x78] sm:$0xff] %vm225_vm0, %v850_v0 }
  0x18 PF: > { %v817_v1 = vld [vmem:[%s213_s24] sm:$0xff]   ;;  %vm322_vm1 = vcmask 130048   ;;  %v820_v4 = vld [vmem:[%s896_s21 + $0x8] sm:$0xff]   ;;  %v822_v6 = vld [vmem:[%s896_s21 + $0x10] sm:$0xff]   ;;  %vm460_vm2 = vcmask 261120   ;;  %p723_p6 = scmp.ne.s32.totalorder %s840_s12, 8 }
  0x19   : > { %v818_v2 = vld [vmem:[%s896_s21] sm:$0xff]   ;;  %772 = vmatprep.subr.bf16.mxu0 %v817_v1  ;;  %790 = vmatprep.subr.bf16.mxu1 %v817_v1  ;;  %v821_v5 = vld [vmem:[%s896_s21 + $0x28] sm:$0xff]   ;;  %v823_v7 = vld [vmem:[%s896_s21 + $0x30] sm:$0xff]   ;;  %vm600_vm3 = vcmask (!%p723_p6), 257024  }
  0x1a   : > { %v819_v3 = vld [vmem:[%s896_s21 + $0x20] sm:$0xff]   ;;  %773 = vmatpush3.bf16.msra.mxu0 %v817_v1  ;;  %791 = vmatpush3.bf16.msra.mxu1 %v817_v1  ;;  %v824_v8 = vld [vmem:[%s896_s21 + $0x18] sm:$0xff]   ;;  %v244_v10 = vld [vmem:[#allocation2 + $0x10] sm:$0xff] }
  0x1b   : > { %774 = vmatprep.mubr.msk.bf16.mxu0 %vm322_vm1, %v818_v2  ;;  %782 = vmatprep.mubr.msk.bf16.mxu1 %vm322_vm1, %v819_v3  ;;  %v825_v9 = vld [vmem:[%s896_s21 + $0x38] sm:$0xff]   ;;  %v242_v12 = vld [vmem:[#allocation2] sm:$0xff]  ;;  %v243_v22 = vld [vmem:[#allocation2 + $0x8] sm:$0xff] }
  0x1c   : > { %v245_v16 = vld [vmem:[#allocation2 + $0x18] sm:$0xff]  ;;  %v248_v34 = vld [vmem:[#allocation2 + $0x30] sm:$0xff]  ;;  %v246_v36 = vld [vmem:[#allocation2 + $0x20] sm:$0xff] }
  0x1d   : > { %775 = vmatmul.mubr.msk.bf16.vlgmr.msra.gmra.mrb[0].mxu0 %vm322_vm1, %v820_v4  ;;  %783 = vmatmul.mubr.msk.bf16.vlgmr.msra.gmra.mrb[0].mxu1 %vm322_vm1, %v821_v5  ;;  %v250_v13 = vld [vmem:[#allocation2 + $0x40] sm:$0xff]  ;;  %v251_v23 = vld [vmem:[#allocation2 + $0x48] sm:$0xff]  ;;  %v249_v40 = vld [vmem:[#allocation2 + $0x38] sm:$0xff] }
  0x1e   : > { %778 = vmatprep.mubr.msk.bf16.mxu0 %vm322_vm1, %v822_v6  ;;  %786 = vmatprep.mubr.msk.bf16.mxu1 %vm322_vm1, %v823_v7  ;;  %v252_v11 = vld [vmem:[#allocation2 + $0x50] sm:$0xff]  ;;  %v253_v17 = vld [vmem:[#allocation2 + $0x58] sm:$0xff]  ;;  %v254_v37 = vld [vmem:[#allocation2 + $0x60] sm:$0xff] }
  0x1f   : > { %v256_v35 = vld [vmem:[#allocation2 + $0x70] sm:$0xff]  ;;  %v257_v41 = vld [vmem:[#allocation2 + $0x78] sm:$0xff]  ;;  %v247_v46 = vld [vmem:[#allocation2 + $0x28] sm:$0xff] }
  0x20   : > { %v255_v47 = vld [vmem:[#allocation2 + $0x68] sm:$0xff]  ;;  %v724_v59 = vld [vmem:[%s1029_s2] ss:$0 sm:$0xff] (!%p723_p6) }
  0x25   : > { %779 = vmatmul.mubr.msk.bf16.gmra.mrb[4].mxu0 %vm322_vm1, %v824_v8  ;;  %787 = vmatmul.mubr.msk.bf16.gmra.mrb[4].mxu1 %vm322_vm1, %v825_v9 }
  0xf0   : > { %v776_v14 = vpop.f32.mrb[0].mxu0  ;;  %v784_v15 = vpop.f32.mrb[0].mxu1 }
  0xf1   : > { %v446_v18 = vadd.f32 %v776_v14, %v244_v10  ;;  %v454_v19 = vadd.f32 %v784_v15, %v252_v11  ;;  %v381_v20 = vpop.f32.mrb[1].mxu0  ;;  %v413_v21 = vpop.f32.mrb[1].mxu1 }
  0xf2   : > { %v444_v24 = vadd.f32 %v381_v20, %v242_v12  ;;  %v452_v25 = vadd.f32 %v413_v21, %v250_v13  ;;  %v777_v26 = vpop.f32.mrb[2].mxu0  ;;  %v785_v27 = vpop.f32.mrb[2].mxu1 }
  0xf3   : > { %463 = vst.msk [vmem:[#allocation2 + $0x10] sm:$0xff] %vm460_vm2, %v446_v18  ;;  %471 = vst.msk [vmem:[#allocation2 + $0x50] sm:$0xff] %vm460_vm2, %v454_v19  ;;  %v447_v28 = vadd.f32 %v777_v26, %v245_v16  ;;  %v455_v29 = vadd.f32 %v785_v27, %v253_v17  ;;  %v384_v30 = vpop.f32.mrb[3].mxu0  ;;  %v416_v31 = vpop.f32.mrb[3].mxu1 }
  0xf4   : > { %461 = vst.msk [vmem:[#allocation2] sm:$0xff] %vm460_vm2, %v444_v24  ;;  %469 = vst.msk [vmem:[#allocation2 + $0x40] sm:$0xff] %vm460_vm2, %v452_v25  ;;  %v445_v32 = vadd.f32 %v384_v30, %v243_v22  ;;  %v453_v33 = vadd.f32 %v416_v31, %v251_v23 }
  0xf5   : > { %464 = vst.msk [vmem:[#allocation2 + $0x18] sm:$0xff] %vm460_vm2, %v447_v28  ;;  %472 = vst.msk [vmem:[#allocation2 + $0x58] sm:$0xff] %vm460_vm2, %v455_v29 }
  0xf6   : > { %462 = vst.msk [vmem:[#allocation2 + $0x8] sm:$0xff] %vm460_vm2, %v445_v32  ;;  %470 = vst.msk [vmem:[#allocation2 + $0x48] sm:$0xff] %vm460_vm2, %v453_v33 }
  0xf8   : > { %v780_v38 = vpop.f32.mrb[4].mxu0  ;;  %v788_v39 = vpop.f32.mrb[4].mxu1  ;;  %480 = sbr.rel (%p723_p6) target bundleno = 270 (0x10e), region = 40 }
  0xf9   : > { %v450_v42 = vadd.f32 %v780_v38, %v248_v34  ;;  %v458_v43 = vadd.f32 %v788_v39, %v256_v35  ;;  %v397_v44 = vpop.f32.mrb[5].mxu0  ;;  %v429_v45 = vpop.f32.mrb[5].mxu1 }
  0xfa   : > { %v448_v48 = vadd.f32 %v397_v44, %v246_v36  ;;  %v456_v49 = vadd.f32 %v429_v45, %v254_v37  ;;  %v781_v50 = vpop.f32.mrb[6].mxu0  ;;  %v789_v51 = vpop.f32.mrb[6].mxu1  ;;  %v483_v63 = vld [vmem:[#allocation2 + $0x10] sm:$0xff] (!%p723_p6) }
  0xfb   : > { %467 = vst.msk [vmem:[#allocation2 + $0x30] sm:$0xff] %vm460_vm2, %v450_v42  ;;  %475 = vst.msk [vmem:[#allocation2 + $0x70] sm:$0xff] %vm460_vm2, %v458_v43  ;;  %v451_v52 = vadd.f32 %v781_v50, %v249_v40  ;;  %v459_v53 = vadd.f32 %v789_v51, %v257_v41  ;;  %v400_v54 = vpop.f32.mrb[7].mxu0  ;;  %v432_v55 = vpop.f32.mrb[7].mxu1  ;;  %v481_v58 = vld [vmem:[#allocation2] sm:$0xff] (!%p723_p6)  ;;  %v506_v2 = vadd.f32 (!%p723_p6), %v724_v59, %v483_v63  ;;  %v491_v22 = vld [vmem:[#allocation2 + $0x50] sm:$0xff] (!%p723_p6) }
  0xfc   : > { %465 = vst.msk [vmem:[#allocation2 + $0x20] sm:$0xff] %vm460_vm2, %v448_v48  ;;  %473 = vst.msk [vmem:[#allocation2 + $0x60] sm:$0xff] %vm460_vm2, %v456_v49  ;;  %v449_v56 = vadd.f32 %v400_v54, %v247_v46  ;;  %v457_v57 = vadd.f32 %v432_v55, %v255_v47  ;;  %v504_v61 = vadd.f32 (!%p723_p6), %v724_v59, %v481_v58  ;;  %v484_v0 = vld [vmem:[#allocation2 + $0x18] sm:$0xff] (!%p723_p6)  ;;  %v489_v16 = vld [vmem:[#allocation2 + $0x40] sm:$0xff] (!%p723_p6) }
  0xfd   : > { %468 = vst.msk [vmem:[#allocation2 + $0x38] sm:$0xff] %vm460_vm2, %v451_v52  ;;  %476 = vst.msk [vmem:[#allocation2 + $0x78] sm:$0xff] %vm460_vm2, %v459_v53  ;;  %v482_v60 = vld [vmem:[#allocation2 + $0x8] sm:$0xff] (!%p723_p6)  ;;  %v507_v3 = vadd.f32 (!%p723_p6), %v724_v59, %v484_v0  ;;  %v522_v12 = vmax.f32 (!%p723_p6), %v506_v2, 0.0  ;;  %v492_v23 = vld [vmem:[#allocation2 + $0x58] sm:$0xff] (!%p723_p6)  ;;  %v512_v33 = vadd.f32 (!%p723_p6), %v724_v59, %v489_v16  ;;  %v514_v37 = vadd.f32 (!%p723_p6), %v724_v59, %v491_v22 }
  0xfe   : > { %466 = vst.msk [vmem:[#allocation2 + $0x28] sm:$0xff] %vm460_vm2, %v449_v56  ;;  %474 = vst.msk [vmem:[#allocation2 + $0x68] sm:$0xff] %vm460_vm2, %v457_v57  ;;  %v505_v62 = vadd.f32 (!%p723_p6), %v724_v59, %v482_v60  ;;  %v520_v8 = vmax.f32 (!%p723_p6), %v504_v61, 0.0  ;;  %v490_v17 = vld [vmem:[#allocation2 + $0x48] sm:$0xff] (!%p723_p6)  ;;  %v515_v38 = vadd.f32 (!%p723_p6), %v724_v59, %v492_v23 }
  0xff   : > { %v523_v13 = vmax.f32 %v507_v3, 0.0  ;;  %v749_v25 = vpack.c.bf16 %v522_v12, %v522_v12  ;;  %v513_v34 = vadd.f32 %v724_v59, %v490_v17  ;;  %v528_v40 = vmax.f32 %v512_v33, 0.0 }
 0x100   : > { %v521_v9 = vmax.f32 %v505_v62, 0.0  ;;  %v747_v18 = vpack.c.bf16 %v520_v8, %v520_v8  ;;  %v530_v44 = vmax.f32 %v514_v37, 0.0  ;;  %v531_v45 = vmax.f32 %v515_v38, 0.0 }
 0x101   : > { %v750_v26 = vpack.c.bf16 %v523_v13, %v523_v13  ;;  %603 = vst.msk [vmem:[%s1030_s3 + $0x8] sm:$0xf] %vm600_vm3, %v749_v25  ;;  %v529_v41 = vmax.f32 %v513_v34, 0.0  ;;  %v755_v48 = vpack.c.bf16 %v528_v40, %v528_v40 }
 0x102   : > { %v487_v6 = vld [vmem:[#allocation2 + $0x30] sm:$0xff]  ;;  %v748_v19 = vpack.c.bf16 %v521_v9, %v521_v9  ;;  %601 = vst.msk [vmem:[%s1030_s3] sm:$0xf] %vm600_vm3, %v747_v18  ;;  %v757_v52 = vpack.c.bf16 %v530_v44, %v530_v44  ;;  %v758_v53 = vpack.c.bf16 %v531_v45, %v531_v45 }
 0x103   : > { %v485_v1 = vld [vmem:[#allocation2 + $0x20] sm:$0xff]  ;;  %v510_v11 = vadd.f32 %v724_v59, %v487_v6  ;;  %v495_v30 = vld [vmem:[#allocation2 + $0x70] sm:$0xff]  ;;  %604 = vst.msk [vmem:[%s1030_s3 + $0xc] sm:$0xf] %vm600_vm3, %v750_v26  ;;  %v756_v49 = vpack.c.bf16 %v529_v41, %v529_v41  ;;  %609 = vst.msk [vmem:[%s1030_s3 + $0x20] sm:$0xf] %vm600_vm3, %v755_v48 }
 0x104   : > { %v508_v4 = vadd.f32 %v724_v59, %v485_v1  ;;  %v488_v7 = vld [vmem:[#allocation2 + $0x38] sm:$0xff]  ;;  %v493_v24 = vld [vmem:[#allocation2 + $0x60] sm:$0xff]  ;;  %602 = vst.msk [vmem:[%s1030_s3 + $0x4] sm:$0xf] %vm600_vm3, %v748_v19  ;;  %v518_v43 = vadd.f32 %v724_v59, %v495_v30  ;;  %611 = vst.msk [vmem:[%s1030_s3 + $0x28] sm:$0xf] %vm600_vm3, %v757_v52 }
 0x105   : > { %v486_v5 = vld [vmem:[#allocation2 + $0x28] sm:$0xff]  ;;  %v511_v15 = vadd.f32 %v724_v59, %v488_v7  ;;  %v526_v21 = vmax.f32 %v510_v11, 0.0  ;;  %v496_v35 = vld [vmem:[#allocation2 + $0x78] sm:$0xff]  ;;  %v516_v39 = vadd.f32 %v724_v59, %v493_v24  ;;  %610 = vst.msk [vmem:[%s1030_s3 + $0x24] sm:$0xf] %vm600_vm3, %v756_v49 }
 0x106   : > { %v509_v10 = vadd.f32 %v724_v59, %v486_v5  ;;  %v524_v14 = vmax.f32 %v508_v4, 0.0  ;;  %v494_v29 = vld [vmem:[#allocation2 + $0x68] sm:$0xff]  ;;  %v519_v47 = vadd.f32 %v724_v59, %v496_v35  ;;  %v534_v51 = vmax.f32 %v518_v43, 0.0  ;;  %612 = vst.msk [vmem:[%s1030_s3 + $0x2c] sm:$0xf] %vm600_vm3, %v758_v53 }
 0x107   : > { %v527_v28 = vmax.f32 %v511_v15, 0.0  ;;  %v753_v32 = vpack.c.bf16 %v526_v21, %v526_v21  ;;  %v517_v42 = vadd.f32 %v724_v59, %v494_v29  ;;  %v532_v46 = vmax.f32 %v516_v39, 0.0 }
 0x108   : > { %v525_v20 = vmax.f32 %v509_v10, 0.0  ;;  %v751_v27 = vpack.c.bf16 %v524_v14, %v524_v14  ;;  %v535_v55 = vmax.f32 %v519_v47, 0.0  ;;  %v761_v57 = vpack.c.bf16 %v534_v51, %v534_v51 }
 0x109   : > { %v754_v36 = vpack.c.bf16 %v527_v28, %v527_v28  ;;  %607 = vst.msk [vmem:[%s1030_s3 + $0x18] sm:$0xf] %vm600_vm3, %v753_v32  ;;  %v533_v50 = vmax.f32 %v517_v42, 0.0  ;;  %v759_v54 = vpack.c.bf16 %v532_v46, %v532_v46 }
 0x10a   : > { %v752_v31 = vpack.c.bf16 %v525_v20, %v525_v20  ;;  %605 = vst.msk [vmem:[%s1030_s3 + $0x10] sm:$0xf] %vm600_vm3, %v751_v27  ;;  %v762_v58 = vpack.c.bf16 %v535_v55, %v535_v55  ;;  %615 = vst.msk [vmem:[%s1030_s3 + $0x38] sm:$0xf] %vm600_vm3, %v761_v57 }
 0x10b   : > { %608 = vst.msk [vmem:[%s1030_s3 + $0x1c] sm:$0xf] %vm600_vm3, %v754_v36  ;;  %v760_v56 = vpack.c.bf16 %v533_v50, %v533_v50  ;;  %613 = vst.msk [vmem:[%s1030_s3 + $0x30] sm:$0xf] %vm600_vm3, %v759_v54 }
 0x10c   : > { %606 = vst.msk [vmem:[%s1030_s3 + $0x14] sm:$0xf] %vm600_vm3, %v752_v31  ;;  %616 = vst.msk [vmem:[%s1030_s3 + $0x3c] sm:$0xf] %vm600_vm3, %v762_v58 }
 0x10d   : > { %614 = vst.msk [vmem:[%s1030_s3 + $0x34] sm:$0xf] %vm600_vm3, %v760_v56 }
 0x10e PF: > { %s13_s14 = sadd.s32 1, %s848_s14   ;;  %s1031_s12 = smov %s844_s13 }
 0x10f   : > { %p10_p7 = scmp.ge.s32.totalorder %s13_s14, 11   ;;  %s1032_s13 = smov %s1034_s15 }
 0x111   :  { %12 = sbr.rel (!%p10_p7) target bundleno = 2 (0x2), region = 73 }

// kernel: _lambda_.38
= control target key start
LH: loop header
LB: loop body
LE: loop exit
PB: predicated region body
PF: predicated region fallthrough
CT: control target
= control target key end

     0   :  { %s304_s1 = inlined_call_operand.vmem [shape: bf16[128,128], index: 1, kind: input, shape index: {}]   ;;  %s305_s0 = inlined_call_operand.vmem [shape: bf16[32,128], index: 0, kind: input, shape index: {}]   ;;  %s306_s2 = inlined_call_operand.vmem [shape: f32[1,128], index: 2, kind: input, shape index: {}]   ;;  %s307_s3 = inlined_call_operand.vmem [shape: bf16[32,128], index: 3, kind: output, shape index: {}]  }
   0x1   :  { %v235_v0 = vld [vmem:[%s304_s1] sm:$0xff]   ;;  %v236_v1 = vld [vmem:[%s304_s1 + $0x8] sm:$0xff]   ;;  %v237_v2 = vld [vmem:[%s304_s1 + $0x10] sm:$0xff]  }
   0x2   :  { %215 = vmatprep.subr.bf16.mxu0 %v235_v0  ;;  %v238_v3 = vld [vmem:[%s304_s1 + $0x18] sm:$0xff]   ;;  %v243_v4 = vld [vmem:[%s305_s0] sm:$0xff]   ;;  %v240_v6 = vld [vmem:[%s304_s1 + $0x28] sm:$0xff]  }
   0x3   :  { %216 = vmatpush3.bf16.msra.mxu0 %v235_v0  ;;  %231 = vmatprep.mubr.bf16.mxu0 %v243_v4  ;;  %v239_v5 = vld [vmem:[%s304_s1 + $0x20] sm:$0xff]   ;;  %v241_v7 = vld [vmem:[%s304_s1 + $0x30] sm:$0xff]   ;;  %v242_v8 = vld [vmem:[%s304_s1 + $0x38] sm:$0xff]  }
   0x4   :  { %217 = vmatprep.subr.bf16.mxu0 %v236_v1  ;;  %v244_v9 = vld [vmem:[%s305_s0 + $0x8] sm:$0xff]   ;;  %v175_v11 = vld [vmem:[%s306_s2] ss:$0 sm:$0xff] }
   0x7   :  { %218 = vmatpush3.bf16.msra.mxu0 %v236_v1 }
   0x8   :  { %219 = vmatprep.subr.bf16.mxu0 %v237_v2 }
   0xb   :  { %220 = vmatpush3.bf16.msra.mxu0 %v237_v2 }
   0xc   :  { %221 = vmatprep.subr.bf16.mxu0 %v238_v3 }
   0xf   :  { %222 = vmatpush3.bf16.msra.mxu0 %v238_v3 }
  0x10   :  { %223 = vmatprep.subr.bf16.mxu0 %v239_v5 }
  0x13   :  { %224 = vmatpush3.bf16.msra.mxu0 %v239_v5 }
  0x14   :  { %225 = vmatprep.subr.bf16.mxu0 %v240_v6 }
  0x17   :  { %226 = vmatpush3.bf16.msra.mxu0 %v240_v6 }
  0x18   :  { %227 = vmatprep.subr.bf16.mxu0 %v241_v7 }
  0x1b   :  { %228 = vmatpush3.bf16.msra.mxu0 %v241_v7 }
  0x1c   :  { %229 = vmatprep.subr.bf16.mxu0 %v242_v8 }
  0x1f   :  { %230 = vmatpush3.bf16.msra.mxu0 %v242_v8 }
  0x22   :  { %232 = vmatmul.mubr.bf16.vlgmr.msra.gmra.mrb[0].mxu0 %v244_v9 }
  0xf5   :  { %v233_v10 = vpop.f32.mrb[0].mxu0 }
  0xf6   :  { %v136_v12 = vpop.f32.mrb[1].mxu0  ;;  %v145_v14 = vadd.f32 %v233_v10, %v175_v11 }
  0xf7   :  { %v234_v13 = vpop.f32.mrb[2].mxu0  ;;  %v137_v17 = vadd.f32 %v175_v11, %v136_v12 }
  0xf8   :  { %v148_v15 = vadd.f32 %v234_v13, %v175_v11  ;;  %v139_v16 = vpop.f32.mrb[3].mxu0 }
  0xf9   :  { %v140_v18 = vadd.f32 %v175_v11, %v139_v16 }
  0xfa   :  { %v202_v19 = vpack.c.bf16 %v148_v15, %v145_v14 }
  0xfb   :  { %v197_v20 = vpack.c.bf16 %v140_v18, %v137_v17 }
  0xfc   :  { %204 = vst [vmem:[%s307_s3 + $0x8] sm:$0xff] %v202_v19  }
  0xfd   :  { %198 = vst [vmem:[%s307_s3] sm:$0xff] %v197_v20  }

// kernel: _lambda_.23
= control target key start
LH: loop header
LB: loop body
LE: loop exit
PB: predicated region body
PF: predicated region fallthrough
CT: control target
= control target key end

     0   :  { %s569_s12 = smov 0   ;;  %s571_s13 = smov 0   ;;  %s629_s0 = inlined_call_operand.vmem [shape: bf16[9,32,32], index: 0, kind: input, shape index: {}]   ;;  %s630_s1 = inlined_call_operand.vmem [shape: bf16[9,32,32], index: 1, kind: input, shape index: {}]   ;;  %s631_s2 = inlined_call_operand.vmem [shape: f32[1,32], index: 2, kind: input, shape index: {}]   ;;  %s632_s3 = inlined_call_operand.vmem [shape: bf16[32,32], index: 3, kind: output, shape index: {}]  }
   0x1   :  { %s573_s14 = smov 0  }
   0x2 LB: > { %s22_s15 = sadd.s32 1, %s542_s13  ;;  %p455_p0 = scmp.ge.s32.totalorder %s546_s14, 1  ;;  %s546_s14 = sphi %s573_s14, %s13_s14   ;;  %s542_s13 = sphi %s571_s13, %s634_s13   ;;  %s538_s12 = sphi %s569_s12, %s633_s12  }
   0x3   : > { %p23_p1 = scmp.ge.s32.totalorder %s22_s15, 9  ;;  %p166_p2 = scmp.lt.s32.totalorder %s546_s14, 10 }
   0x5   : > { %s636_s15 = smov (%p23_p1, %s22_s15), 0  ;;  %p167_p3 = pnand %p455_p0, %p166_p2 }
   0x6   : > { %p200_p4 = scmp.lt.s32.totalorder (!%p167_p3), %s538_s12, 8  ;;  %p460_p5 = scmp.ne.s32.totalorder (!%p167_p3), %s538_s12, 0 }
   0x7   : > { %170 = sbr.rel (%p167_p3) target bundleno = 263 (0x107), region = 32 }
   0xe   : > { %s201_s16 = scalar_select %p200_p4, %s538_s12, 8 }
   0xf   : > { %224 = sbr.rel (%p460_p5) target bundleno = 22 (0x16), region = 36  ;;  %vm225_vm0 = vcmask (!%p460_p5), 261120   ;;  %v548_v0 = vmov (!%p460_p5), 0.0  }
  0x10   : > { %s477_s17 = sshll.u32 %s201_s16, 4  ;;  %226 = vst.msk [vmem:[#allocation2] sm:$0xff] (!%p460_p5), %vm225_vm0, %v548_v0  ;;  %227 = vst.msk [vmem:[#allocation2 + $0x8] sm:$0xff] (!%p460_p5), %vm225_vm0, %v548_v0 }
  0x11   : > { %s207_s20 = scalar_lea.vmem %s629_s0, %s477_s17  ;;  %s213_s23 = scalar_lea.vmem %s630_s1, %s477_s17  ;;  %228 = vst.msk [vmem:[#allocation2 + $0x10] sm:$0xff] (!%p460_p5), %vm225_vm0, %v548_v0  ;;  %229 = vst.msk [vmem:[#allocation2 + $0x18] sm:$0xff] (!%p460_p5), %vm225_vm0, %v548_v0 }
  0x16 PF: > { %v520_v1 = vld [vmem:[%s213_s23] sm:$0xff]   ;;  %v521_v2 = vld [vmem:[%s213_s23 + $0x8] sm:$0xff]   ;;  %vm264_vm1 = vcmask 261120   ;;  %p467_p6 = scmp.ne.s32.totalorder %s538_s12, 8 }
  0x17   : > { %487 = vmatprep.subr.bf16.mxu0 %v520_v1  ;;  %v522_v3 = vld [vmem:[%s207_s20] sm:$0xff]   ;;  %v523_v4 = vld [vmem:[%s207_s20 + $0x8] sm:$0xff]   ;;  %vm367_vm2 = vcmask (!%p467_p6), 257024  }
  0x18   : > { %488 = vmatpush3.bf16.msra.mxu0 %v520_v1  ;;  %491 = vmatprep.mubr.msk.bf16.mxu0 %vm264_vm1, %v522_v3  ;;  %v232_v5 = vld [vmem:[#allocation2 + $0x10] sm:$0xff]  ;;  %v230_v6 = vld [vmem:[#allocation2] sm:$0xff]  ;;  %v233_v8 = vld [vmem:[#allocation2 + $0x18] sm:$0xff] }
  0x19   : > { %489 = vmatprep.subr.bf16.mxu0 %v521_v2  ;;  %v231_v11 = vld [vmem:[#allocation2 + $0x8] sm:$0xff]  ;;  %v468_v18 = vld [vmem:[%s631_s2] ss:$0 sm:$0xff] (!%p467_p6) }
  0x1c   : > { %490 = vmatpush3.bf16.msra.mxu0 %v521_v2 }
  0x1f   : > { %492 = vmatmul.mubr.msk.bf16.vlgmr.msra.gmra.mrb[0].mxu0 %vm264_vm1, %v523_v4 }
  0xf2   : > { %v493_v7 = vpop.f32.mrb[0].mxu0  ;;  %331 = sbr.rel (%p467_p6) target bundleno = 263 (0x107), region = 40 }
  0xf3   : > { %v322_v9 = vadd.f32 %v493_v7, %v232_v5  ;;  %v305_v10 = vpop.f32.mrb[1].mxu0 }
  0xf4   : > { %v320_v12 = vadd.f32 %v305_v10, %v230_v6  ;;  %v494_v13 = vpop.f32.mrb[2].mxu0 }
  0xf5   : > { %326 = vst.msk [vmem:[#allocation2 + $0x10] sm:$0xff] %vm264_vm1, %v322_v9  ;;  %v323_v14 = vadd.f32 %v494_v13, %v233_v8  ;;  %v308_v15 = vpop.f32.mrb[3].mxu0 }
  0xf6   : > { %324 = vst.msk [vmem:[#allocation2] sm:$0xff] %vm264_vm1, %v320_v12  ;;  %v321_v16 = vadd.f32 %v308_v15, %v231_v11 }
  0xf7   : > { %327 = vst.msk [vmem:[#allocation2 + $0x18] sm:$0xff] %vm264_vm1, %v323_v14 }
  0xf8   : > { %325 = vst.msk [vmem:[#allocation2 + $0x8] sm:$0xff] %vm264_vm1, %v321_v16 }
  0xfc   : > { %v334_v22 = vld [vmem:[#allocation2 + $0x10] sm:$0xff] }
  0xfd   : > { %v332_v17 = vld [vmem:[#allocation2] sm:$0xff]  ;;  %v345_v24 = vadd.f32 %v468_v18, %v334_v22 }
  0xfe   : > { %v343_v20 = vadd.f32 %v468_v18, %v332_v17  ;;  %v335_v23 = vld [vmem:[#allocation2 + $0x18] sm:$0xff] }
  0xff   : > { %v333_v19 = vld [vmem:[#allocation2 + $0x8] sm:$0xff]  ;;  %v346_v25 = vadd.f32 %v468_v18, %v335_v23  ;;  %v349_v28 = vmax.f32 %v345_v24, 0.0 }
 0x100   : > { %v344_v21 = vadd.f32 %v468_v18, %v333_v19  ;;  %v347_v26 = vmax.f32 %v343_v20, 0.0 }
 0x101   : > { %v350_v29 = vmax.f32 %v346_v25, 0.0  ;;  %v481_v32 = vpack.c.bf16 %v349_v28, %v349_v28 }
 0x102   : > { %v348_v27 = vmax.f32 %v344_v21, 0.0  ;;  %v479_v30 = vpack.c.bf16 %v347_v26, %v347_v26 }
 0x103   : > { %v482_v33 = vpack.c.bf16 %v350_v29, %v350_v29  ;;  %370 = vst.msk [vmem:[%s632_s3 + $0x8] sm:$0xf] %vm367_vm2, %v481_v32 }
 0x104   : > { %v480_v31 = vpack.c.bf16 %v348_v27, %v348_v27  ;;  %368 = vst.msk [vmem:[%s632_s3] sm:$0xf] %vm367_vm2, %v479_v30 }
 0x105   : > { %371 = vst.msk [vmem:[%s632_s3 + $0xc] sm:$0xf] %vm367_vm2, %v482_v33 }
 0x106   : > { %369 = vst.msk [vmem:[%s632_s3 + $0x4] sm:$0xf] %vm367_vm2, %v480_v31 }
 0x107 PF: > { %s13_s14 = sadd.s32 1, %s546_s14   ;;  %s633_s12 = smov %s542_s13 }
 0x108   : > { %p10_p7 = scmp.ge.s32.totalorder %s13_s14, 11   ;;  %s634_s13 = smov %s636_s15 }
 0x10a   :  { %12 = sbr.rel (!%p10_p7) target bundleno = 2 (0x2), region = 73 }

// kernel: _lambda_.24
= control target key start
LH: loop header
LB: loop body
LE: loop exit
PB: predicated region body
PF: predicated region fallthrough
CT: control target
= control target key end

     0   :  { %vm52_vm0 = vcmask 261120   ;;  %s215_s1 = inlined_call_operand.vmem [shape: bf16[32,128], index: 1, kind: input, shape index: {}]   ;;  %s216_s0 = inlined_call_operand.vmem [shape: bf16[32,32], index: 0, kind: input, shape index: {}]   ;;  %s217_s2 = inlined_call_operand.vmem [shape: f32[1,128], index: 2, kind: input, shape index: {}]   ;;  %s218_s3 = inlined_call_operand.vmem [shape: bf16[32,128], index: 3, kind: output, shape index: {}]  }
   0x1   :  { %v170_v0 = vld [vmem:[%s215_s1] sm:$0xff]   ;;  %v171_v1 = vld [vmem:[%s215_s1 + $0x8] sm:$0xff]  }
   0x2   :  { %162 = vmatprep.subr.bf16.mxu0 %v170_v0  ;;  %v172_v2 = vld [vmem:[%s216_s0] sm:$0xff]   ;;  %v173_v3 = vld [vmem:[%s216_s0 + $0x8] sm:$0xff]  }
   0x3   :  { %163 = vmatpush3.bf16.msra.mxu0 %v170_v0  ;;  %166 = vmatprep.mubr.msk.bf16.mxu0 %vm52_vm0, %v172_v2  ;;  %v132_v5 = vld [vmem:[%s217_s2] ss:$0 sm:$0xff] }
   0x4   :  { %164 = vmatprep.subr.bf16.mxu0 %v171_v1 }
   0x7   :  { %165 = vmatpush3.bf16.msra.mxu0 %v171_v1 }
   0xa   :  { %167 = vmatmul.mubr.msk.bf16.vlgmr.msra.gmra.mrb[0].mxu0 %vm52_vm0, %v173_v3 }
  0xdd   :  { %v168_v4 = vpop.f32.mrb[0].mxu0 }
  0xde   :  { %v93_v6 = vpop.f32.mrb[1].mxu0  ;;  %v102_v8 = vadd.f32 %v168_v4, %v132_v5 }
  0xdf   :  { %v169_v7 = vpop.f32.mrb[2].mxu0  ;;  %v94_v11 = vadd.f32 %v132_v5, %v93_v6 }
  0xe0   :  { %v105_v9 = vadd.f32 %v169_v7, %v132_v5  ;;  %v96_v10 = vpop.f32.mrb[3].mxu0 }
  0xe1   :  { %v97_v12 = vadd.f32 %v132_v5, %v96_v10 }
  0xe2   :  { %v155_v13 = vpack.c.bf16 %v105_v9, %v102_v8 }
  0xe3   :  { %v150_v14 = vpack.c.bf16 %v97_v12, %v94_v11 }
  0xe4   :  { %157 = vst [vmem:[%s218_s3 + $0x8] sm:$0xff] %v155_v13  }
  0xe5   :  { %151 = vst [vmem:[%s218_s3] sm:$0xff] %v150_v14  }

// kernel: _lambda_.28
= control target key start
LH: loop header
LB: loop body
LE: loop exit
PB: predicated region body
PF: predicated region fallthrough
CT: control target
= control target key end

     0   :  { %vm52_vm0 = vcmask 261120   ;;  %vm124_vm1 = vcmask 257024   ;;  %s211_s1 = inlined_call_operand.vmem [shape: bf16[32,32], index: 1, kind: input, shape index: {}]   ;;  %s212_s0 = inlined_call_operand.vmem [shape: bf16[32,32], index: 0, kind: input, shape index: {}]   ;;  %s213_s2 = inlined_call_operand.vmem [shape: f32[1,32], index: 2, kind: input, shape index: {}]   ;;  %s214_s3 = inlined_call_operand.vmem [shape: bf16[32,32], index: 3, kind: output, shape index: {}]  }
   0x1   :  { %v160_v0 = vld [vmem:[%s211_s1] sm:$0xff]   ;;  %v161_v1 = vld [vmem:[%s211_s1 + $0x8] sm:$0xff]  }
   0x2   :  { %152 = vmatprep.subr.bf16.mxu0 %v160_v0  ;;  %v162_v2 = vld [vmem:[%s212_s0] sm:$0xff]   ;;  %v163_v3 = vld [vmem:[%s212_s0 + $0x8] sm:$0xff]  }
   0x3   :  { %153 = vmatpush3.bf16.msra.mxu0 %v160_v0  ;;  %156 = vmatprep.mubr.msk.bf16.mxu0 %vm52_vm0, %v162_v2  ;;  %v133_v4 = vld [vmem:[%s213_s2] ss:$0 sm:$0xff] }
   0x4   :  { %154 = vmatprep.subr.bf16.mxu0 %v161_v1 }
   0x7   :  { %155 = vmatpush3.bf16.msra.mxu0 %v161_v1 }
   0xa   :  { %157 = vmatmul.mubr.msk.bf16.vlgmr.msra.gmra.mrb[0].mxu0 %vm52_vm0, %v163_v3 }
  0xdd   :  { %v158_v5 = vpop.f32.mrb[0].mxu0 }
  0xde   :  { %v102_v6 = vadd.f32 %v158_v5, %v133_v4  ;;  %v93_v7 = vpop.f32.mrb[1].mxu0 }
  0xdf   :  { %v94_v8 = vadd.f32 %v133_v4, %v93_v7  ;;  %v159_v9 = vpop.f32.mrb[2].mxu0 }
  0xe0   :  { %v146_v10 = vpack.c.bf16 %v102_v6, %v102_v6  ;;  %v105_v11 = vadd.f32 %v159_v9, %v133_v4  ;;  %v96_v12 = vpop.f32.mrb[3].mxu0 }
  0xe1   :  { %v144_v13 = vpack.c.bf16 %v94_v8, %v94_v8  ;;  %v97_v14 = vadd.f32 %v133_v4, %v96_v12 }
  0xe2   :  { %127 = vst.msk [vmem:[%s214_s3 + $0x8] sm:$0xf] %vm124_vm1, %v146_v10  ;;  %v147_v15 = vpack.c.bf16 %v105_v11, %v105_v11 }
  0xe3   :  { %125 = vst.msk [vmem:[%s214_s3] sm:$0xf] %vm124_vm1, %v144_v13  ;;  %v145_v16 = vpack.c.bf16 %v97_v14, %v97_v14 }
  0xe4   :  { %128 = vst.msk [vmem:[%s214_s3 + $0xc] sm:$0xf] %vm124_vm1, %v147_v15 }
  0xe5   :  { %126 = vst.msk [vmem:[%s214_s3 + $0x4] sm:$0xf] %vm124_vm1, %v145_v16 }

// kernel: _lambda_.33
= control target key start
LH: loop header
LB: loop body
LE: loop exit
PB: predicated region body
PF: predicated region fallthrough
CT: control target
= control target key end

     0   :  { %s708_s15 = smov 0   ;;  %s710_s16 = smov 0   ;;  %s755_s0 = inlined_call_operand.vmem [shape: bf16[2,16,32], index: 0, kind: input, shape index: {}]   ;;  %s756_s1 = inlined_call_operand.vmem [shape: bf16[2,16,32], index: 1, kind: input, shape index: {}]   ;;  %s757_s2 = inlined_call_operand.vmem [shape: bf16[16,128], index: 2, kind: input, shape index: {}]   ;;  %s758_s3 = inlined_call_operand.vmem [shape: f32[1,128], index: 3, kind: input, shape index: {}]   ;;  %s759_s4 = inlined_call_operand.vmem [shape: bf16[2,16,128], index: 4, kind: output, shape index: {}]  }
   0x1   :  { %s712_s17 = smov 0  }
   0x2 LB: > { %s33_s18 = sadd.s32 1, %s675_s16  ;;  %p585_p0 = scmp.ge.s32.totalorder %s679_s17, 1  ;;  %s679_s17 = sphi %s712_s17, %s14_s17   ;;  %s675_s16 = sphi %s710_s16, %s761_s16   ;;  %s671_s15 = sphi %s708_s15, %s760_s15  }
   0x3   : > { %p35_p1 = scmp.ge.s32.totalorder %s33_s18, 2  ;;  %p218_p2 = scmp.lt.s32.totalorder %s679_s17, 3 }
   0x5   : > { %s763_s18 = smov (%p35_p1, %s33_s18), 0  ;;  %p219_p3 = pnand %p585_p0, %p218_p2 }
   0x6   : > { %p267_p4 = scmp.lt.s32.totalorder (!%p219_p3), %s671_s15, 1  ;;  %v681_v0 = vmov (!%p219_p3), 0.0   ;;  %vm682_vm0 = vmmov (!%p219_p3), 0   ;;  %vm323_vm1 = vcmask (!%p219_p3), 261120   ;;  %v656_v4 = vld [vmem:[%s757_s2] sm:$0xff] (!%p219_p3)   ;;  %vm384_vm2 = vcmask (!%p219_p3), 130048  }
   0x7   : > { %222 = sbr.rel (%p219_p3) target bundleno = 463 (0x1cf), region = 36  ;;  %616 = vmatprep.subr.bf16.mxu0 (!%p219_p3), %v681_v0  ;;  %618 = vmatprep.mubr.msk.bf16.mxu0 (!%p219_p3), %vm682_vm0, %v681_v0  ;;  %v597_v13 = vld [vmem:[%s758_s3] ss:$0 sm:$0xff] (!%p219_p3) }
   0x8   : > { %622 = vmatprep.subr.bf16.mxu1 (!%p219_p3), %v681_v0  ;;  %624 = vmatprep.mubr.msk.bf16.mxu1 (!%p219_p3), %vm682_vm0, %v681_v0 }
   0x9   : > { %623 = vmatpush3.bf16.msra.mxu1 (!%p219_p3), %v656_v4 }
   0xe   : > { %s765_s15 = smov (!%p267_p4, %s671_s15), 1 }
   0xf   : > { %s726_s19 = sshll.u32 %s765_s15, 3 }
  0x10   : > { %s284_s22 = scalar_lea.vmem %s756_s1, %s726_s19  ;;  %s274_s25 = scalar_lea.vmem %s755_s0, %s726_s19 }
  0x11   : > { %v654_v1 = vld [vmem:[%s284_s22] sm:$0xff]   ;;  %s300_s6 = scalar_lea.vmem %s759_s4, %s726_s19 }
  0x12   : > { %v328_v2 = vsel %vm323_vm1, %v654_v1, 0  ;;  %v655_v3 = vld [vmem:[%s274_s25] sm:$0xff]  }
  0x13   : > { %617 = vmatpush3.bf16.xpose.msra.mxu0 %v328_v2 }
  0x1a   : > { %619 = vmatmul.mubr.msk.bf16.vlgmr.msra.gmra.mrb[0].mxu0 %vm323_vm1, %v655_v3 }
  0xed   : > { %v364_v5 = vpop.f32.mrb[0].mxu0 }
  0xee   : > { %v620_v6 = vpop.f32.mrb[1].mxu0  ;;  %v371_v8 = vmul.f32 0.17677669, %v364_v5 }
  0xef   : > { %v367_v7 = vpop.f32.mrb[2].mxu0 }
  0xf0   : > { %v372_v9 = vmul.f32 0.17677669, %v367_v7  ;;  %v621_v10 = vpop.f32.mrb[3].mxu0 }
  0xf2   : > { %v375_v11 = vpack.c.bf16 %v372_v9, %v371_v8 }
  0xf4   : > { %625 = vmatmul.mubr.msk.bf16.vlgmr.msra.gmra.mrb[0].mxu1 %vm384_vm2, %v375_v11 }
 0x1c7   : > { %v422_v12 = vpop.f32.mrb[0].mxu1 }
 0x1c8   : > { %v626_v14 = vpop.f32.mrb[1].mxu1  ;;  %v445_v16 = vadd.f32 %v597_v13, %v422_v12 }
 0x1c9   : > { %v425_v15 = vpop.f32.mrb[2].mxu1 }
 0x1ca   : > { %v446_v17 = vadd.f32 %v597_v13, %v425_v15  ;;  %v627_v18 = vpop.f32.mrb[3].mxu1 }
 0x1cc   : > { %v610_v19 = vpack.c.bf16 %v446_v17, %v445_v16 }
 0x1ce   : > { %611 = vst [vmem:[%s300_s6] sm:$0xff] %v610_v19  }
 0x1cf PF: > { %s14_s17 = sadd.s32 1, %s679_s17   ;;  %s760_s15 = smov %s675_s16 }
 0x1d0   : > { %p11_p5 = scmp.ge.s32.totalorder %s14_s17, 4   ;;  %s761_s16 = smov %s763_s18 }
 0x1d2   :  { %13 = sbr.rel (!%p11_p5) target bundleno = 2 (0x2), region = 80 }

// kernel: _lambda_.35
= control target key start
LH: loop header
LB: loop body
LE: loop exit
PB: predicated region body
PF: predicated region fallthrough
CT: control target
= control target key end

     0   :  { %s763_s12 = smov 0   ;;  %s765_s13 = smov 0   ;;  %s813_s0 = inlined_call_operand.vmem [shape: bf16[2,16,128], index: 0, kind: input, shape index: {}]   ;;  %s814_s1 = inlined_call_operand.vmem [shape: bf16[2,16,128], index: 1, kind: input, shape index: {}]   ;;  %s815_s2 = inlined_call_operand.vmem [shape: bf16[2,16,128], index: 2, kind: input, shape index: {}]   ;;  %s816_s3 = inlined_call_operand.vmem [shape: bf16[2,16,128], index: 3, kind: output, shape index: {}]  }
   0x1   :  { %s767_s14 = smov 0  }
   0x2 LB: > { %s32_s15 = sadd.s32 1, %s734_s13  ;;  %p628_p0 = scmp.ge.s32.totalorder %s738_s14, 1  ;;  %s738_s14 = sphi %s767_s14, %s13_s14   ;;  %s734_s13 = sphi %s765_s13, %s818_s13   ;;  %s730_s12 = sphi %s763_s12, %s817_s12  }
   0x3   : > { %p34_p1 = scmp.ge.s32.totalorder %s32_s15, 2  ;;  %p199_p2 = scmp.lt.s32.totalorder %s738_s14, 3 }
   0x5   : > { %s820_s15 = smov (%p34_p1, %s32_s15), 0  ;;  %p200_p3 = pnand %p628_p0, %p199_p2 }
   0x6   : > { %p250_p4 = scmp.lt.s32.totalorder (!%p200_p3), %s730_s12, 1  ;;  %v740_v0 = vmov (!%p200_p3), 0.0   ;;  %vm741_vm0 = vmmov (!%p200_p3), 0   ;;  %v742_v3 = vmov (!%p200_p3), 0   ;;  %v360_v4 = vlaneseq (!%p200_p3) }
   0x7   : > { %203 = sbr.rel (%p200_p3) target bundleno = 753 (0x2f1), region = 32  ;;  %660 = vmatprep.subr.bf16.mxu0 (!%p200_p3), %v740_v0  ;;  %662 = vmatprep.mubr.msk.bf16.mxu0 (!%p200_p3), %vm741_vm0, %v740_v0  ;;  %vm369_vm2 = vcmask (!%p200_p3), 130048  }
   0x8   : > { %666 = vmatprep.subr.bf16.mxu1 (!%p200_p3), %v740_v0  ;;  %668 = vmatprep.mubr.msk.bf16.mxu1 (!%p200_p3), %vm741_vm0, %v740_v0  ;;  %v361_v5 = vand.u32 (!%p200_p3), 127, %v360_v4 }
   0x9   : > { %699 = vset.pattern.permute.xlu1 (!%p200_p3), %v742_v3  ;;  %700 = vset.pattern.permute.xlu0 (!%p200_p3), %v742_v3 }
   0xa   : > { %vm364_vm1 = vcmp.lt.s32.totalorder (!%p200_p3), %v361_v5, 16 }
   0xe   : > { %s822_s12 = smov (!%p250_p4, %s730_s12), 1 }
   0xf   : > { %s781_s16 = sshll.u32 %s822_s12, 3 }
  0x10   : > { %s267_s19 = scalar_lea.vmem %s814_s1, %s781_s16  ;;  %s257_s22 = scalar_lea.vmem %s813_s0, %s781_s16 }
  0x11   : > { %v701_v1 = vld [vmem:[%s267_s19] sm:$0xff]   ;;  %s277_s25 = scalar_lea.vmem %s815_s2, %s781_s16  ;;  %s287_s28 = scalar_lea.vmem %s816_s3, %s781_s16 }
  0x12   : > { %661 = vmatpush3.bf16.xpose.msra.mxu0 %v701_v1  ;;  %v702_v2 = vld [vmem:[%s257_s22] sm:$0xff]  }
  0x13   : > { %v703_v18 = vld [vmem:[%s277_s25] sm:$0xff]  }
  0x14   : > { %667 = vmatpush3.bf16.msra.mxu1 %v703_v18 }
  0x19   : > { %663 = vmatmul.mubr.bf16.vlgmr.msra.gmra.mrb[0].mxu0 %v702_v2 }
  0xec   : > { %v350_v6 = vpop.f32.mrb[0].mxu0 }
  0xed   : > { %v357_v7 = vmul.f32 0.17677669, %v350_v6  ;;  %v664_v8 = vpop.f32.mrb[1].mxu0 }
  0xee   : > { %v353_v9 = vpop.f32.mrb[2].mxu0 }
  0xef   : > { %v358_v10 = vmul.f32 0.17677669, %v353_v9  ;;  %v665_v11 = vpop.f32.mrb[3].mxu0  ;;  %v365_v12 = vsel %vm364_vm1, %v357_v7, -1e+30 }
  0xf0   : > { %v370_v13 = vsel %vm369_vm2, %v365_v12, -inf }
  0xf1   : > { %371 = vmax.xlane.f32.xlu0 %v370_v13  ;;  %v366_v14 = vsel %vm364_vm1, %v358_v10, -1e+30 }
  0xf2   : > { %v373_v15 = vsel %vm369_vm2, %v366_v14, -inf }
  0xf5   : > { %374 = vmax.xlane.f32.xlu0 %v373_v15 }
 0x17e   : > { %v372_v16 = vpop.xlane.xlu0 %371 }
 0x17f   : > { %386 = vperm.xlu1 %699, %v372_v16   ;;  %v378_v30 = vsub.f32 -inf, %v372_v16 }
 0x181   : > { %v380_v32 = vmul.f32 1.442695, %v378_v30 }
 0x182   : > { %v375_v17 = vpop.xlane.xlu0 %374 }
 0x183   : > { %391 = vperm.xlu1 %699, %v375_v17   ;;  %v379_v31 = vsub.f32 -inf, %v375_v17 }
 0x185   : > { %v382_v33 = vmul.f32 1.442695, %v379_v31 }
 0x1fe   : > { %v387_v19 = vpop.permute.xlu1 %386 }
 0x1ff   : > { %v394_v20 = vsub.f32 %v365_v12, %v387_v19 }
 0x201   : > { %v396_v21 = vmul.f32 1.442695, %v394_v20 }
 0x202   : > { %v392_v22 = vpop.permute.xlu1 %391 }
 0x203   : > { %704 = vpow2.f32 %v396_v21  ;;  %v395_v23 = vsub.f32 %v366_v14, %v392_v22 }
 0x205   : > { %v398_v24 = vmul.f32 1.442695, %v395_v23 }
 0x207   : > { %706 = vpow2.f32 %v398_v24 }
 0x208   : > { %708 = vpow2.f32 %v380_v32 }
 0x209   : > { %710 = vpow2.f32 %v382_v33 }
 0x20d   : > { %v705_v25 = vpop.eup %704 }
 0x20e   : > { %v404_v26 = vsel %vm369_vm2, %v705_v25, 0.0 }
 0x20f   : > { %405 = vadd.xlane.f32.xlu0 %v404_v26 }
 0x211   : > { %v707_v27 = vpop.eup %706 }
 0x212   : > { %v407_v28 = vsel %vm369_vm2, %v707_v27, 0.0  ;;  %v418_v29 = vpack.c.bf16 %v707_v27, %v705_v25  ;;  %v709_v34 = vpop.eup %708 }
 0x213   : > { %408 = vadd.xlane.f32.xlu1 %v407_v28  ;;  %v711_v35 = vpop.eup %710  ;;  %v402_v37 = vmul.f32 0.0, %v709_v34 }
 0x214   : > { %669 = vmatmul.mubr.msk.bf16.vlgmr.msra.gmra.mrb[0].mxu1 %vm369_vm2, %v418_v29  ;;  %v403_v40 = vmul.f32 0.0, %v711_v35 }
 0x29c   : > { %v406_v36 = vpop.xlane.xlu0 %405 }
 0x29d   : > { %v410_v39 = vadd.f32 %v406_v36, %v402_v37 }
 0x29f   : > { %712 = vrcp.f32 %v410_v39 }
 0x2a0   : > { %v409_v38 = vpop.xlane.xlu1 %408 }
 0x2a1   : > { %v411_v41 = vadd.f32 %v409_v38, %v403_v40 }
 0x2a3   : > { %714 = vrcp.f32 %v411_v41 }
 0x2a9   : > { %v713_v45 = vpop.eup %712 }
 0x2ad   : > { %v715_v50 = vpop.eup %714 }
 0x2e7   : > { %v464_v42 = vpop.f32.mrb[0].mxu1 }
 0x2e8   : > { %v471_v43 = vadd.f32 %v464_v42, %v402_v37  ;;  %v670_v44 = vpop.f32.mrb[1].mxu1 }
 0x2e9   : > { %v467_v46 = vpop.f32.mrb[2].mxu1 }
 0x2ea   : > { %v486_v47 = vmul.f32 %v713_v45, %v471_v43  ;;  %v472_v48 = vadd.f32 %v467_v46, %v403_v40  ;;  %v671_v49 = vpop.f32.mrb[3].mxu1 }
 0x2ec   : > { %v487_v51 = vmul.f32 %v715_v50, %v472_v48 }
 0x2ee   : > { %v654_v52 = vpack.c.bf16 %v487_v51, %v486_v47 }
 0x2f0   : > { %655 = vst [vmem:[%s287_s28] sm:$0xff] %v654_v52  }
 0x2f1 PF: > { %s13_s14 = sadd.s32 1, %s738_s14   ;;  %s817_s12 = smov %s734_s13 }
 0x2f2   : > { %p10_p5 = scmp.ge.s32.totalorder %s13_s14, 4   ;;  %s818_s13 = smov %s820_s15 }
 0x2f4   :  { %12 = sbr.rel (!%p10_p5) target bundleno = 2 (0x2), region = 76 }

// kernel: _lambda_.34
= control target key start
LH: loop header
LB: loop body
LE: loop exit
PB: predicated region body
PF: predicated region fallthrough
CT: control target
= control target key end

     0   :  { %v43_v10 = vlaneseq  ;;  %v557_v47 = vmov 0   ;;  %s721_s0 = inlined_call_operand.vmem [shape: bf16[32,128], index: 0, kind: input, shape index: {}]   ;;  %s722_s3 = inlined_call_operand.vmem [shape: bf16[128,384], index: 3, kind: input, shape index: {}]   ;;  %s723_s1 = inlined_call_operand.vmem [shape: f32[1,128], index: 1, kind: input, shape index: {}]   ;;  %s724_s2 = inlined_call_operand.vmem [shape: f32[1,128], index: 2, kind: input, shape index: {}]   ;;  %s725_s4 = inlined_call_operand.vmem [shape: f32[1,384], index: 4, kind: input, shape index: {}]   ;;  %s726_s5 = inlined_call_operand.vmem [shape: bf16[32,384], index: 5, kind: output, shape index: {}]  }
   0x1   :  { %v478_v0 = vld [vmem:[%s721_s0] sm:$0xff]   ;;  %v485_v1 = vld [vmem:[%s721_s0 + $0x8] sm:$0xff]   ;;  %v527_v35 = vld [vmem:[%s722_s3 + $0x30] ss:$12 sps:$4 sm:$0xff]   ;;  %313 = vmatprep.mubr.bf16.mxu0 %v557_v47 }
   0x2   :  { %v479_v2 = vunpack.c.l.bf16 %v478_v0  ;;  %v483_v3 = vunpack.c.l.bf16 %v485_v1  ;;  %v480_v4 = vunpack.c.h.bf16 %v478_v0  ;;  %v484_v5 = vunpack.c.h.bf16 %v485_v1  ;;  %v517_v6 = vld [vmem:[%s722_s3 + $0x4] ss:$12 sps:$4 sm:$0xff]   ;;  %v519_v7 = vld [vmem:[%s722_s3] ss:$12 sps:$4 sm:$0xff]   ;;  %v520_v8 = vld [vmem:[%s722_s3 + $0x1c] ss:$12 sps:$4 sm:$0xff]  }
   0x3   :  { %281 = vmatprep.subr.bf16.mxu0 %v517_v6  ;;  %v522_v9 = vld [vmem:[%s722_s3 + $0x8] ss:$12 sps:$4 sm:$0xff]   ;;  %v44_v11 = vand.u32 127, %v43_v10  ;;  %v523_v32 = vld [vmem:[%s722_s3 + $0x18] ss:$12 sps:$4 sm:$0xff]  }
   0x4   :  { %31 = vadd.xlane.f32.xlu0 %v479_v2  ;;  %35 = vadd.xlane.f32.xlu1 %v483_v3  ;;  %v524_v33 = vld [vmem:[%s722_s3 + $0x34] ss:$12 sps:$4 sm:$0xff]   ;;  %v528_v36 = vld [vmem:[%s722_s3 + $0x4c] ss:$12 sps:$4 sm:$0xff]   ;;  %v532_v39 = vld [vmem:[%s722_s3 + $0x64] ss:$12 sps:$4 sm:$0xff]  }
   0x5   :  { %282 = vmatpush1.bf16.msra.mxu0 %v519_v7  ;;  %496 = vmatprep.subr.bf16.mxu1 %v522_v9  ;;  %vm45_vm0 = vcmp.lt.s32.totalorder %v44_v11, 32  ;;  %v526_v34 = vld [vmem:[%s722_s3 + $0x20] ss:$12 sps:$4 sm:$0xff]   ;;  %v530_v37 = vld [vmem:[%s722_s3 + $0x38] ss:$12 sps:$4 sm:$0xff]  }
   0x6   :  { %283 = vmatprep.subr.bf16.mxu0 %v520_v8  ;;  %497 = vmatpush3.bf16.msra.mxu1 %v522_v9  ;;  %v531_v38 = vld [vmem:[%s722_s3 + $0x48] ss:$12 sps:$4 sm:$0xff]   ;;  %v534_v40 = vld [vmem:[%s722_s3 + $0x50] ss:$12 sps:$4 sm:$0xff]   ;;  %v535_v41 = vld [vmem:[%s722_s3 + $0x60] ss:$12 sps:$4 sm:$0xff]  }
   0x7   :  { %498 = vmatprep.subr.bf16.mxu1 %v526_v34  ;;  %v536_v42 = vld [vmem:[%s722_s3 + $0x7c] ss:$12 sps:$4 sm:$0xff]   ;;  %v539_v44 = vld [vmem:[%s722_s3 + $0x78] ss:$12 sps:$4 sm:$0xff]   ;;  %v540_v45 = vld [vmem:[%s722_s3 + $0x94] ss:$12 sps:$4 sm:$0xff]  }
   0x8   :  { %33 = vadd.xlane.f32.xlu0 %v480_v4  ;;  %37 = vadd.xlane.f32.xlu1 %v484_v5  ;;  %v538_v43 = vld [vmem:[%s722_s3 + $0x68] ss:$12 sps:$4 sm:$0xff]   ;;  %v542_v46 = vld [vmem:[%s722_s3 + $0x80] ss:$12 sps:$4 sm:$0xff]   ;;  %v543_v48 = vld [vmem:[%s722_s3 + $0x90] ss:$12 sps:$4 sm:$0xff]  }
   0x9   :  { %284 = vmatpush1.bf16.msra.mxu0 %v523_v32  ;;  %v544_v49 = vld [vmem:[%s722_s3 + $0xac] ss:$12 sps:$4 sm:$0xff]   ;;  %v547_v51 = vld [vmem:[%s722_s3 + $0xa8] ss:$12 sps:$4 sm:$0xff]   ;;  %v548_v52 = vld [vmem:[%s722_s3 + $0xb0] ss:$12 sps:$4 sm:$0xff]  }
   0xa   :  { %285 = vmatprep.subr.bf16.mxu0 %v524_v33  ;;  %499 = vmatpush3.bf16.msra.mxu1 %v526_v34  ;;  %v546_v50 = vld [vmem:[%s722_s3 + $0x98] ss:$12 sps:$4 sm:$0xff]   ;;  %v436_v8 = vld [vmem:[%s724_s2] ss:$0 sm:$0xff] }
   0xb   :  { %500 = vmatprep.subr.bf16.mxu1 %v530_v37 }
   0xd   :  { %286 = vmatpush1.bf16.msra.mxu0 %v527_v35 }
   0xe   :  { %287 = vmatprep.subr.bf16.mxu0 %v528_v36  ;;  %501 = vmatpush3.bf16.msra.mxu1 %v530_v37 }
   0xf   :  { %502 = vmatprep.subr.bf16.mxu1 %v534_v40 }
  0x11   :  { %288 = vmatpush1.bf16.msra.mxu0 %v531_v38 }
  0x12   :  { %289 = vmatprep.subr.bf16.mxu0 %v532_v39  ;;  %503 = vmatpush3.bf16.msra.mxu1 %v534_v40 }
  0x13   :  { %504 = vmatprep.subr.bf16.mxu1 %v538_v43 }
  0x15   :  { %290 = vmatpush1.bf16.msra.mxu0 %v535_v41 }
  0x16   :  { %291 = vmatprep.subr.bf16.mxu0 %v536_v42  ;;  %505 = vmatpush3.bf16.msra.mxu1 %v538_v43 }
  0x17   :  { %506 = vmatprep.subr.bf16.mxu1 %v542_v46 }
  0x19   :  { %292 = vmatpush1.bf16.msra.mxu0 %v539_v44 }
  0x1a   :  { %293 = vmatprep.subr.bf16.mxu0 %v540_v45  ;;  %507 = vmatpush3.bf16.msra.mxu1 %v542_v46 }
  0x1b   :  { %508 = vmatprep.subr.bf16.mxu1 %v546_v50 }
  0x1d   :  { %294 = vmatpush1.bf16.msra.mxu0 %v543_v48 }
  0x1e   :  { %295 = vmatprep.subr.bf16.mxu0 %v544_v49  ;;  %509 = vmatpush3.bf16.msra.mxu1 %v546_v50 }
  0x1f   :  { %510 = vmatprep.subr.bf16.mxu1 %v548_v52 }
  0x21   :  { %296 = vmatpush1.bf16.msra.mxu0 %v547_v51 }
  0x22   :  { %511 = vmatpush3.bf16.msra.mxu1 %v548_v52 }
  0x91   :  { %v32_v12 = vpop.xlane.xlu0 %31  ;;  %v36_v13 = vpop.xlane.xlu1 %35 }
  0x92   :  { %v39_v14 = vmul.f32 0.03125, %v32_v12  ;;  %v41_v15 = vmul.f32 0.03125, %v36_v13 }
  0x94   :  { %v46_v16 = vsub.f32 %v479_v2, %v39_v14  ;;  %v48_v17 = vsub.f32 %v483_v3, %v41_v15  ;;  %v435_v3 = vld [vmem:[%s723_s1] ss:$0 sm:$0xff] }
  0x95   :  { %v34_v18 = vpop.xlane.xlu0 %33  ;;  %v38_v19 = vpop.xlane.xlu1 %37 }
  0x96   :  { %v40_v20 = vmul.f32 0.03125, %v34_v18  ;;  %v42_v21 = vmul.f32 0.03125, %v38_v19  ;;  %v607_v22 = vsel %vm45_vm0, %v46_v16, 0.0  ;;  %v609_v23 = vsel %vm45_vm0, %v48_v17, 0.0 }
  0x97   :  { %v54_v24 = vmul.f32 %v607_v22, %v607_v22  ;;  %v56_v27 = vmul.f32 %v609_v23, %v609_v23 }
  0x98   :  { %v47_v25 = vsub.f32 %v480_v4, %v40_v20  ;;  %v49_v26 = vsub.f32 %v484_v5, %v42_v21 }
  0x99   :  { %58 = vadd.xlane.f32.xlu0 %v54_v24  ;;  %v136_v24 = vld [vmem:[%s725_s4] sm:$0x7] }
  0x9a   :  { %v615_v28 = vsel %vm45_vm0, %v47_v25, 0.0  ;;  %v617_v29 = vsel %vm45_vm0, %v49_v26, 0.0 }
  0x9b   :  { %v55_v30 = vmul.f32 %v615_v28, %v615_v28  ;;  %v57_v31 = vmul.f32 %v617_v29, %v617_v29 }
  0x9d   :  { %62 = vadd.xlane.f32.xlu0 %v56_v27  ;;  %60 = vadd.xlane.f32.xlu1 %v55_v30 }
  0xa1   :  { %64 = vadd.xlane.f32.xlu1 %v57_v31 }
 0x126   :  { %v59_v53 = vpop.xlane.xlu0 %58 }
 0x127   :  { %v66_v54 = vmul.f32 0.03125, %v59_v53 }
 0x129   :  { %v70_v55 = vadd.f32 1e-05, %v66_v54 }
 0x12a   :  { %v61_v56 = vpop.xlane.xlu1 %60  ;;  %v63_v57 = vpop.xlane.xlu0 %62 }
 0x12b   :  { %549 = vrsqrt.f32 %v70_v55  ;;  %v67_v58 = vmul.f32 0.03125, %v61_v56  ;;  %v68_v59 = vmul.f32 0.03125, %v63_v57 }
 0x12d   :  { %v71_v60 = vadd.f32 1e-05, %v67_v58  ;;  %v72_v61 = vadd.f32 1e-05, %v68_v59 }
 0x12e   :  { %v65_v62 = vpop.xlane.xlu1 %64 }
 0x12f   :  { %551 = vrsqrt.f32 %v71_v60  ;;  %v69_v63 = vmul.f32 0.03125, %v65_v62 }
 0x130   :  { %553 = vrsqrt.f32 %v72_v61 }
 0x131   :  { %v73_v0 = vadd.f32 1e-05, %v69_v63 }
 0x133   :  { %555 = vrsqrt.f32 %v73_v0 }
 0x135   :  { %v550_v1 = vpop.eup %549 }
 0x136   :  { %v78_v2 = vmul.f32 %v550_v1, %v607_v22  ;;  %v139_v22 = vshrl.u32 %v43_v10, 7 }
 0x138   :  { %v88_v7 = vmul.f32 %v435_v3, %v78_v2  ;;  %v144_v25 = vsub.s32 1, %v139_v22  ;;  %v148_v27 = vsub.s32 2, %v139_v22 }
 0x139   :  { %v552_v4 = vpop.eup %551 }
 0x13a   :  { %v554_v5 = vpop.eup %553  ;;  %v79_v6 = vmul.f32 %v552_v4, %v615_v28  ;;  %v98_v13 = vadd.f32 %v436_v8, %v88_v7  ;;  %v145_v28 = vrot.slane %v136_v24, %v144_v25  ;;  %v149_v32 = vrot.slane %v136_v24, %v148_v27 }
 0x13b   :  { %v80_v9 = vmul.f32 %v554_v5, %v609_v23  ;;  %v140_v23 = vsub.s32 0, %v139_v22 }
 0x13c   :  { %v89_v11 = vmul.f32 %v435_v3, %v79_v6 }
 0x13d   :  { %v556_v12 = vpop.eup %555  ;;  %v90_v16 = vmul.f32 %v435_v3, %v80_v9  ;;  %v141_v26 = vrot.slane %v136_v24, %v140_v23 }
 0x13e   :  { %v99_v14 = vadd.f32 %v436_v8, %v89_v11  ;;  %v81_v15 = vmul.f32 %v556_v12, %v617_v29 }
 0x13f   :  { %v100_v19 = vadd.f32 %v436_v8, %v90_v16 }
 0x140   :  { %v102_v17 = vpack.c.bf16 %v99_v14, %v98_v13  ;;  %v91_v18 = vmul.f32 %v435_v3, %v81_v15 }
 0x142   :  { %314 = vmatmul.mubr.bf16.vlgmr.msra.gmra.mrb[0].mxu0 %v102_v17  ;;  %512 = vmatprep.mubr.bf16.mxu1 %v102_v17  ;;  %v101_v20 = vadd.f32 %v436_v8, %v91_v18 }
 0x143   :  { %323 = vmatprep.mubr.bf16.mxu0 %v557_v47 }
 0x144   :  { %v103_v21 = vpack.c.bf16 %v101_v20, %v100_v19 }
 0x146   :  { %513 = vmatmul.mubr.bf16.vlgmr.msra.gmra.mrb[0].mxu1 %v103_v21 }
 0x14a   :  { %324 = vmatmul.mubr.bf16.gmra.mrb[4].mxu0 %v103_v21 }
 0x215   :  { %v315_v29 = vpop.f32.mrb[0].mxu0 }
 0x216   :  { %v316_v30 = vadd.f32 %v315_v29, %v141_v26  ;;  %v317_v31 = vpop.f32.mrb[1].mxu0 }
 0x217   :  { %v318_v33 = vadd.f32 %v317_v31, %v145_v28  ;;  %v319_v34 = vpop.f32.mrb[2].mxu0 }
 0x218   :  { %v320_v35 = vadd.f32 %v319_v34, %v141_v26  ;;  %v321_v36 = vpop.f32.mrb[3].mxu0 }
 0x219   :  { %v469_v37 = vpack.c.bf16 %v318_v33, %v316_v30  ;;  %v322_v38 = vadd.f32 %v321_v36, %v145_v28  ;;  %v514_v10 = vpop.f32.mrb[0].mxu1 }
 0x21a   :  { %v377_v39 = vadd.f32 %v514_v10, %v149_v32  ;;  %v368_v40 = vpop.f32.mrb[1].mxu1 }
 0x21b   :  { %423 = vst [vmem:[%s726_s5] sm:$0xff] %v469_v37  ;;  %v471_v41 = vpack.c.bf16 %v322_v38, %v320_v35  ;;  %v369_v42 = vadd.f32 %v368_v40, %v149_v32  ;;  %v515_v43 = vpop.f32.mrb[2].mxu1 }
 0x21c   :  { %v474_v44 = vpack.c.bf16 %v377_v39, %v377_v39  ;;  %v380_v45 = vadd.f32 %v515_v43, %v149_v32  ;;  %v371_v46 = vpop.f32.mrb[3].mxu1 }
 0x21d   :  { %425 = vst [vmem:[%s726_s5 + $0xc] sm:$0xff] %v471_v41  ;;  %v470_v47 = vpack.c.bf16 %v369_v42, %v369_v42  ;;  %v372_v48 = vadd.f32 %v371_v46, %v149_v32  ;;  %v325_v49 = vpop.f32.mrb[4].mxu0 }
 0x21e   :  { %428 = vst [vmem:[%s726_s5 + $0x20] sm:$0xf] %v474_v44  ;;  %v476_v50 = vpack.c.bf16 %v380_v45, %v380_v45  ;;  %v326_v51 = vadd.f32 %v325_v49, %v141_v26  ;;  %v327_v52 = vpop.f32.mrb[5].mxu0 }
 0x21f   :  { %424 = vst [vmem:[%s726_s5 + $0x8] sm:$0xf] %v470_v47  ;;  %v472_v53 = vpack.c.bf16 %v372_v48, %v372_v48  ;;  %v328_v54 = vadd.f32 %v327_v52, %v145_v28  ;;  %v329_v55 = vpop.f32.mrb[6].mxu0 }
 0x220   :  { %430 = vst [vmem:[%s726_s5 + $0x2c] sm:$0xf] %v476_v50  ;;  %v330_v56 = vadd.f32 %v329_v55, %v141_v26  ;;  %v331_v57 = vpop.f32.mrb[7].mxu0 }
 0x221   :  { %426 = vst [vmem:[%s726_s5 + $0x14] sm:$0xf] %v472_v53  ;;  %v473_v58 = vpack.c.bf16 %v328_v54, %v326_v51  ;;  %v332_v59 = vadd.f32 %v331_v57, %v145_v28 }
 0x223   :  { %427 = vst [vmem:[%s726_s5 + $0x18] sm:$0xff] %v473_v58  ;;  %v475_v60 = vpack.c.bf16 %v332_v59, %v330_v56 }
 0x225   :  { %429 = vst [vmem:[%s726_s5 + $0x24] sm:$0xff] %v475_v60 }

// kernel: _lambda_.39
= control target key start
LH: loop header
LB: loop body
LE: loop exit
PB: predicated region body
PF: predicated region fallthrough
CT: control target
= control target key end

     0   :  { %v293_v1 = vmov 0   ;;  %v37_v19 = vlaneseq  ;;  %s383_s1 = inlined_call_operand.vmem [shape: bf16[128,256], index: 1, kind: input, shape index: {}]   ;;  %s384_s0 = inlined_call_operand.vmem [shape: bf16[32,128], index: 0, kind: input, shape index: {}]   ;;  %s385_s2 = inlined_call_operand.vmem [shape: f32[1,256], index: 2, kind: input, shape index: {}]   ;;  %s386_s3 = inlined_call_operand.vmem [shape: bf16[32,256], index: 3, kind: output, shape index: {}]  }
   0x1   :  { %v267_v0 = vld [vmem:[%s383_s1 + $0x4] ss:$8 sps:$4 sm:$0xff]   ;;  %171 = vmatprep.mubr.bf16.mxu0 %v293_v1  ;;  %181 = vmatprep.mubr.bf16.mxu1 %v293_v1  ;;  %v269_v2 = vld [vmem:[%s383_s1] ss:$8 sps:$4 sm:$0xff]   ;;  %v270_v3 = vld [vmem:[%s383_s1 + $0x14] ss:$8 sps:$4 sm:$0xff]  }
   0x2   :  { %139 = vmatprep.subr.bf16.mxu0 %v267_v0  ;;  %250 = vmatprep.subr.bf16.mxu1 %v267_v0  ;;  %v272_v4 = vld [vmem:[%s383_s1 + $0x10] ss:$8 sps:$4 sm:$0xff]   ;;  %v273_v5 = vld [vmem:[%s383_s1 + $0x24] ss:$8 sps:$4 sm:$0xff]   ;;  %v275_v6 = vld [vmem:[%s383_s1 + $0x20] ss:$8 sps:$4 sm:$0xff]  }
   0x3   :  { %140 = vmatpush1.bf16.msra.mxu0 %v269_v2  ;;  %258 = vmatpush1.bf16.msra.mxu1 %v269_v2  ;;  %v276_v7 = vld [vmem:[%s383_s1 + $0x34] ss:$8 sps:$4 sm:$0xff]   ;;  %v278_v8 = vld [vmem:[%s383_s1 + $0x30] ss:$8 sps:$4 sm:$0xff]   ;;  %v279_v9 = vld [vmem:[%s383_s1 + $0x44] ss:$8 sps:$4 sm:$0xff]  }
   0x4   :  { %141 = vmatprep.subr.bf16.mxu0 %v270_v3  ;;  %251 = vmatprep.subr.bf16.mxu1 %v270_v3  ;;  %v281_v10 = vld [vmem:[%s383_s1 + $0x40] ss:$8 sps:$4 sm:$0xff]   ;;  %v282_v11 = vld [vmem:[%s383_s1 + $0x54] ss:$8 sps:$4 sm:$0xff]   ;;  %v284_v12 = vld [vmem:[%s383_s1 + $0x50] ss:$8 sps:$4 sm:$0xff]  }
   0x5   :  { %v285_v13 = vld [vmem:[%s383_s1 + $0x64] ss:$8 sps:$4 sm:$0xff]   ;;  %v287_v14 = vld [vmem:[%s383_s1 + $0x60] ss:$8 sps:$4 sm:$0xff]   ;;  %v288_v15 = vld [vmem:[%s383_s1 + $0x74] ss:$8 sps:$4 sm:$0xff]  }
   0x6   :  { %v290_v16 = vld [vmem:[%s383_s1 + $0x70] ss:$8 sps:$4 sm:$0xff]   ;;  %v291_v17 = vld [vmem:[%s384_s0] sm:$0xff]   ;;  %v292_v18 = vld [vmem:[%s384_s0 + $0x8] sm:$0xff]   ;;  %v38_v20 = vshrl.u32 %v37_v19, 7 }
   0x7   :  { %142 = vmatpush1.bf16.msra.mxu0 %v272_v4  ;;  %259 = vmatpush1.bf16.msra.mxu1 %v272_v4  ;;  %v35_v22 = vld [vmem:[%s385_s2] sm:$0x3] }
   0x8   :  { %143 = vmatprep.subr.bf16.mxu0 %v273_v5  ;;  %252 = vmatprep.subr.bf16.mxu1 %v273_v5  ;;  %v39_v21 = vsub.s32 0, %v38_v20  ;;  %v43_v23 = vsub.s32 1, %v38_v20 }
   0xa   :  { %v40_v24 = vrot.slane %v35_v22, %v39_v21  ;;  %v44_v25 = vrot.slane %v35_v22, %v43_v23 }
   0xb   :  { %144 = vmatpush1.bf16.msra.mxu0 %v275_v6  ;;  %260 = vmatpush1.bf16.msra.mxu1 %v275_v6 }
   0xc   :  { %145 = vmatprep.subr.bf16.mxu0 %v276_v7  ;;  %253 = vmatprep.subr.bf16.mxu1 %v276_v7 }
   0xf   :  { %146 = vmatpush1.bf16.msra.mxu0 %v278_v8  ;;  %261 = vmatpush1.bf16.msra.mxu1 %v278_v8 }
  0x10   :  { %147 = vmatprep.subr.bf16.mxu0 %v279_v9  ;;  %254 = vmatprep.subr.bf16.mxu1 %v279_v9 }
  0x13   :  { %148 = vmatpush1.bf16.msra.mxu0 %v281_v10  ;;  %262 = vmatpush1.bf16.msra.mxu1 %v281_v10 }
  0x14   :  { %149 = vmatprep.subr.bf16.mxu0 %v282_v11  ;;  %255 = vmatprep.subr.bf16.mxu1 %v282_v11 }
  0x17   :  { %150 = vmatpush1.bf16.msra.mxu0 %v284_v12  ;;  %263 = vmatpush1.bf16.msra.mxu1 %v284_v12 }
  0x18   :  { %151 = vmatprep.subr.bf16.mxu0 %v285_v13  ;;  %256 = vmatprep.subr.bf16.mxu1 %v285_v13 }
  0x1b   :  { %152 = vmatpush1.bf16.msra.mxu0 %v287_v14  ;;  %264 = vmatpush1.bf16.msra.mxu1 %v287_v14 }
  0x1c   :  { %153 = vmatprep.subr.bf16.mxu0 %v288_v15  ;;  %257 = vmatprep.subr.bf16.mxu1 %v288_v15 }
  0x1f   :  { %154 = vmatpush1.bf16.msra.mxu0 %v290_v16  ;;  %265 = vmatpush1.bf16.msra.mxu1 %v290_v16 }
  0x22   :  { %172 = vmatmul.mubr.bf16.vlgmr.msra.gmra.mrb[0].mxu0 %v291_v17  ;;  %182 = vmatmul.mubr.bf16.vlgmr.msra.gmra.mrb[0].mxu1 %v292_v18 }
  0xf5   :  { %v173_v26 = vpop.f32.mrb[0].mxu0  ;;  %v183_v27 = vpop.f32.mrb[0].mxu1 }
  0xf6   :  { %v174_v28 = vadd.f32 %v173_v26, %v40_v24  ;;  %v184_v29 = vadd.f32 %v183_v27, %v40_v24  ;;  %v175_v30 = vpop.f32.mrb[1].mxu0  ;;  %v185_v31 = vpop.f32.mrb[1].mxu1 }
  0xf7   :  { %v176_v32 = vadd.f32 %v175_v30, %v44_v25  ;;  %v186_v33 = vadd.f32 %v185_v31, %v44_v25  ;;  %v177_v34 = vpop.f32.mrb[2].mxu0  ;;  %v187_v35 = vpop.f32.mrb[2].mxu1 }
  0xf8   :  { %v178_v36 = vadd.f32 %v177_v34, %v40_v24  ;;  %v188_v37 = vadd.f32 %v187_v35, %v40_v24  ;;  %v179_v38 = vpop.f32.mrb[3].mxu0  ;;  %v189_v39 = vpop.f32.mrb[3].mxu1 }
  0xf9   :  { %v246_v40 = vpack.c.bf16 %v176_v32, %v174_v28  ;;  %v248_v41 = vpack.c.bf16 %v186_v33, %v184_v29  ;;  %v180_v42 = vadd.f32 %v179_v38, %v44_v25  ;;  %v190_v43 = vadd.f32 %v189_v39, %v44_v25 }
  0xfb   :  { %216 = vst [vmem:[%s386_s3] sm:$0xff] %v246_v40  ;;  %218 = vst [vmem:[%s386_s3 + $0x10] sm:$0xff] %v248_v41  ;;  %v247_v44 = vpack.c.bf16 %v180_v42, %v178_v36  ;;  %v249_v45 = vpack.c.bf16 %v190_v43, %v188_v37 }
  0xfd   :  { %217 = vst [vmem:[%s386_s3 + $0x8] sm:$0xff] %v247_v44  ;;  %219 = vst [vmem:[%s386_s3 + $0x18] sm:$0xff] %v249_v45 }

// kernel: _lambda_.37
= control target key start
LH: loop header
LB: loop body
LE: loop exit
PB: predicated region body
PF: predicated region fallthrough
CT: control target
= control target key end

     0   :  { %v49_v7 = vlaneseq  ;;  %s644_s0 = inlined_call_operand.vmem [shape: bf16[32,128], index: 0, kind: input, shape index: {}]   ;;  %s645_s3 = inlined_call_operand.vmem [shape: bf16[128,128], index: 3, kind: input, shape index: {}]   ;;  %s646_s5 = inlined_call_operand.vmem [shape: bf16[128,128], index: 5, kind: input, shape index: {}]   ;;  %s647_s1 = inlined_call_operand.vmem [shape: f32[1,128], index: 1, kind: input, shape index: {}]   ;;  %s648_s2 = inlined_call_operand.vmem [shape: f32[1,128], index: 2, kind: input, shape index: {}, may-alias: {2,4,6}]   ;;  %s649_s4 = inlined_call_operand.vmem [shape: f32[1,128], index: 4, kind: input, shape index: {}, may-alias: {2,4,6}]   ;;  %s650_s6 = inlined_call_operand.vmem [shape: f32[1,128], index: 6, kind: input, shape index: {}, may-alias: {2,4,6}]   ;;  %s651_s7 = inlined_call_operand.vmem [shape: bf16[32,128], index: 7, kind: output, shape index: {}]  }
   0x1   :  { %v409_v0 = vld [vmem:[%s644_s0] sm:$0xff]   ;;  %v426_v1 = vld [vmem:[%s644_s0 + $0x8] sm:$0xff]   ;;  %v490_v30 = vld [vmem:[%s645_s3 + $0x10] sm:$0xff]  }
   0x2   :  { %v410_v2 = vunpack.c.l.bf16 %v409_v0  ;;  %v414_v3 = vunpack.c.l.bf16 %v426_v1  ;;  %v411_v4 = vunpack.c.h.bf16 %v409_v0  ;;  %v415_v5 = vunpack.c.h.bf16 %v426_v1  ;;  %v488_v6 = vld [vmem:[%s645_s3] sm:$0xff]   ;;  %v489_v29 = vld [vmem:[%s645_s3 + $0x8] sm:$0xff]   ;;  %v491_v31 = vld [vmem:[%s645_s3 + $0x18] sm:$0xff]  }
   0x3   :  { %448 = vmatprep.subr.bf16.mxu0 %v488_v6  ;;  %v50_v8 = vand.u32 127, %v49_v7  ;;  %v492_v32 = vld [vmem:[%s645_s3 + $0x20] sm:$0xff]   ;;  %v493_v33 = vld [vmem:[%s645_s3 + $0x28] sm:$0xff]   ;;  %v494_v34 = vld [vmem:[%s645_s3 + $0x30] sm:$0xff]  }
   0x4   :  { %37 = vadd.xlane.f32.xlu0 %v410_v2  ;;  %41 = vadd.xlane.f32.xlu1 %v414_v3  ;;  %v495_v35 = vld [vmem:[%s645_s3 + $0x38] sm:$0xff]   ;;  %v496_v36 = vld [vmem:[%s646_s5] sm:$0xff]   ;;  %v497_v37 = vld [vmem:[%s646_s5 + $0x8] sm:$0xff]  }
   0x5   :  { %449 = vmatpush3.bf16.msra.mxu0 %v488_v6  ;;  %vm51_vm0 = vcmp.lt.s32.totalorder %v50_v8, 32  ;;  %468 = vmatprep.subr.bf16.mxu1 %v496_v36  ;;  %v498_v38 = vld [vmem:[%s646_s5 + $0x10] sm:$0xff]   ;;  %v499_v39 = vld [vmem:[%s646_s5 + $0x18] sm:$0xff]   ;;  %v500_v40 = vld [vmem:[%s646_s5 + $0x20] sm:$0xff]  }
   0x6   :  { %450 = vmatprep.subr.bf16.mxu0 %v489_v29  ;;  %469 = vmatpush3.bf16.msra.mxu1 %v496_v36  ;;  %v501_v41 = vld [vmem:[%s646_s5 + $0x28] sm:$0xff]   ;;  %v380_v56 = vld [vmem:[%s647_s1] ss:$0 sm:$0xff] }
   0x7   :  { %470 = vmatprep.subr.bf16.mxu1 %v497_v37  ;;  %v381_v61 = vld [vmem:[%s648_s2] ss:$0 sm:$0xff] }
   0x8   :  { %39 = vadd.xlane.f32.xlu0 %v411_v4  ;;  %43 = vadd.xlane.f32.xlu1 %v415_v5 }
   0x9   :  { %451 = vmatpush3.bf16.msra.mxu0 %v489_v29 }
   0xa   :  { %452 = vmatprep.subr.bf16.mxu0 %v490_v30  ;;  %471 = vmatpush3.bf16.msra.mxu1 %v497_v37 }
   0xb   :  { %472 = vmatprep.subr.bf16.mxu1 %v498_v38 }
   0xd   :  { %453 = vmatpush3.bf16.msra.mxu0 %v490_v30 }
   0xe   :  { %454 = vmatprep.subr.bf16.mxu0 %v491_v31  ;;  %473 = vmatpush3.bf16.msra.mxu1 %v498_v38 }
   0xf   :  { %474 = vmatprep.subr.bf16.mxu1 %v499_v39 }
  0x11   :  { %455 = vmatpush3.bf16.msra.mxu0 %v491_v31 }
  0x12   :  { %456 = vmatprep.subr.bf16.mxu0 %v492_v32  ;;  %475 = vmatpush3.bf16.msra.mxu1 %v499_v39 }
  0x13   :  { %476 = vmatprep.subr.bf16.mxu1 %v500_v40 }
  0x15   :  { %457 = vmatpush3.bf16.msra.mxu0 %v492_v32 }
  0x16   :  { %458 = vmatprep.subr.bf16.mxu0 %v493_v33  ;;  %477 = vmatpush3.bf16.msra.mxu1 %v500_v40 }
  0x17   :  { %478 = vmatprep.subr.bf16.mxu1 %v501_v41 }
  0x19   :  { %459 = vmatpush3.bf16.msra.mxu0 %v493_v33 }
  0x1a   :  { %460 = vmatprep.subr.bf16.mxu0 %v494_v34  ;;  %479 = vmatpush3.bf16.msra.mxu1 %v501_v41 }
  0x1d   :  { %461 = vmatpush3.bf16.msra.mxu0 %v494_v34 }
  0x1e   :  { %462 = vmatprep.subr.bf16.mxu0 %v495_v35 }
  0x21   :  { %463 = vmatpush3.bf16.msra.mxu0 %v495_v35 }
  0x91   :  { %v38_v9 = vpop.xlane.xlu0 %37  ;;  %v42_v10 = vpop.xlane.xlu1 %41 }
  0x92   :  { %v45_v11 = vmul.f32 0.03125, %v38_v9  ;;  %v47_v12 = vmul.f32 0.03125, %v42_v10  ;;  %v502_v10 = vld [vmem:[%s646_s5 + $0x30] sm:$0xff]  }
  0x93   :  { %480 = vmatprep.subr.bf16.mxu1 %v502_v10 }
  0x94   :  { %v52_v13 = vsub.f32 %v410_v2, %v45_v11  ;;  %v54_v14 = vsub.f32 %v414_v3, %v47_v12  ;;  %481 = vmatpush3.bf16.msra.mxu1 %v502_v10  ;;  %v503_v11 = vld [vmem:[%s646_s5 + $0x38] sm:$0xff]   ;;  %v382_v12 = vld [vmem:[%s649_s4] ss:$0 sm:$0xff] }
  0x95   :  { %v40_v15 = vpop.xlane.xlu0 %39  ;;  %v44_v16 = vpop.xlane.xlu1 %43  ;;  %482 = vmatprep.subr.bf16.mxu1 %v503_v11 }
  0x96   :  { %v46_v17 = vmul.f32 0.03125, %v40_v15  ;;  %v48_v18 = vmul.f32 0.03125, %v44_v16  ;;  %v561_v19 = vsel %vm51_vm0, %v52_v13, 0.0  ;;  %v563_v20 = vsel %vm51_vm0, %v54_v14, 0.0 }
  0x97   :  { %v60_v21 = vmul.f32 %v561_v19, %v561_v19  ;;  %v62_v24 = vmul.f32 %v563_v20, %v563_v20 }
  0x98   :  { %v53_v22 = vsub.f32 %v411_v4, %v46_v17  ;;  %v55_v23 = vsub.f32 %v415_v5, %v48_v18  ;;  %483 = vmatpush3.bf16.msra.mxu1 %v503_v11 }
  0x99   :  { %64 = vadd.xlane.f32.xlu0 %v60_v21 }
  0x9a   :  { %v569_v25 = vsel %vm51_vm0, %v53_v22, 0.0  ;;  %v571_v26 = vsel %vm51_vm0, %v55_v23, 0.0 }
  0x9b   :  { %v61_v27 = vmul.f32 %v569_v25, %v569_v25  ;;  %v63_v28 = vmul.f32 %v571_v26, %v571_v26 }
  0x9d   :  { %68 = vadd.xlane.f32.xlu0 %v62_v24  ;;  %66 = vadd.xlane.f32.xlu1 %v61_v27 }
  0xa1   :  { %70 = vadd.xlane.f32.xlu1 %v63_v28  ;;  %v391_v28 = vld [vmem:[%s650_s6] ss:$0 sm:$0xff] }
 0x126   :  { %v65_v42 = vpop.xlane.xlu0 %64 }
 0x127   :  { %v72_v43 = vmul.f32 0.03125, %v65_v42 }
 0x129   :  { %v76_v44 = vadd.f32 1e-05, %v72_v43 }
 0x12a   :  { %v67_v45 = vpop.xlane.xlu1 %66  ;;  %v69_v46 = vpop.xlane.xlu0 %68 }
 0x12b   :  { %504 = vrsqrt.f32 %v76_v44  ;;  %v73_v47 = vmul.f32 0.03125, %v67_v45  ;;  %v74_v48 = vmul.f32 0.03125, %v69_v46 }
 0x12d   :  { %v77_v49 = vadd.f32 1e-05, %v73_v47  ;;  %v78_v50 = vadd.f32 1e-05, %v74_v48 }
 0x12e   :  { %v71_v51 = vpop.xlane.xlu1 %70 }
 0x12f   :  { %506 = vrsqrt.f32 %v77_v49  ;;  %v75_v52 = vmul.f32 0.03125, %v71_v51 }
 0x130   :  { %508 = vrsqrt.f32 %v78_v50 }
 0x131   :  { %v79_v53 = vadd.f32 1e-05, %v75_v52 }
 0x133   :  { %510 = vrsqrt.f32 %v79_v53 }
 0x135   :  { %v505_v54 = vpop.eup %504 }
 0x136   :  { %v84_v55 = vmul.f32 %v505_v54, %v561_v19 }
 0x138   :  { %v94_v60 = vmul.f32 %v380_v56, %v84_v55 }
 0x139   :  { %v507_v57 = vpop.eup %506 }
 0x13a   :  { %v509_v58 = vpop.eup %508  ;;  %v85_v59 = vmul.f32 %v507_v57, %v569_v25  ;;  %v104_v1 = vadd.f32 %v381_v61, %v94_v60 }
 0x13b   :  { %v86_v62 = vmul.f32 %v509_v58, %v563_v20 }
 0x13c   :  { %v95_v63 = vmul.f32 %v380_v56, %v85_v59 }
 0x13d   :  { %v511_v0 = vpop.eup %510  ;;  %v96_v4 = vmul.f32 %v380_v56, %v86_v62 }
 0x13e   :  { %v105_v2 = vadd.f32 %v381_v61, %v95_v63  ;;  %v87_v3 = vmul.f32 %v511_v0, %v571_v26 }
 0x13f   :  { %v106_v7 = vadd.f32 %v381_v61, %v96_v4 }
 0x140   :  { %v108_v5 = vpack.c.bf16 %v105_v2, %v104_v1  ;;  %v97_v6 = vmul.f32 %v380_v56, %v87_v3 }
 0x142   :  { %464 = vmatprep.mubr.bf16.mxu0 %v108_v5  ;;  %v107_v8 = vadd.f32 %v381_v61, %v97_v6 }
 0x144   :  { %v109_v9 = vpack.c.bf16 %v107_v8, %v106_v7 }
 0x146   :  { %465 = vmatmul.mubr.bf16.vlgmr.msra.gmra.mrb[0].mxu0 %v109_v9 }
 0x219   :  { %v466_v13 = vpop.f32.mrb[0].mxu0 }
 0x21a   :  { %v224_v14 = vadd.f32 %v466_v13, %v382_v12  ;;  %v215_v15 = vpop.f32.mrb[1].mxu0 }
 0x21b   :  { %v216_v16 = vadd.f32 %v382_v12, %v215_v15  ;;  %v467_v17 = vpop.f32.mrb[2].mxu0 }
 0x21c   :  { %v227_v18 = vadd.f32 %v467_v17, %v382_v12  ;;  %v218_v19 = vpop.f32.mrb[3].mxu0  ;;  %v232_v21 = vmax.f32 %v224_v14, 0.0 }
 0x21d   :  { %v219_v20 = vadd.f32 %v382_v12, %v218_v19  ;;  %v230_v23 = vmax.f32 %v216_v16, 0.0 }
 0x21e   :  { %v233_v22 = vmax.f32 %v227_v18, 0.0 }
 0x21f   :  { %v231_v24 = vmax.f32 %v219_v20, 0.0 }
 0x220   :  { %v235_v25 = vpack.c.bf16 %v233_v22, %v232_v21 }
 0x221   :  { %v234_v26 = vpack.c.bf16 %v231_v24, %v230_v23 }
 0x223   :  { %484 = vmatprep.mubr.bf16.mxu1 %v234_v26 }
 0x224   :  { %485 = vmatmul.mubr.bf16.vlgmr.msra.gmra.mrb[0].mxu1 %v235_v25 }
 0x2f7   :  { %v486_v27 = vpop.f32.mrb[0].mxu1 }
 0x2f8   :  { %v341_v29 = vpop.f32.mrb[1].mxu1  ;;  %v350_v31 = vadd.f32 %v486_v27, %v391_v28 }
 0x2f9   :  { %v487_v30 = vpop.f32.mrb[2].mxu1  ;;  %v342_v34 = vadd.f32 %v391_v28, %v341_v29 }
 0x2fa   :  { %v353_v32 = vadd.f32 %v487_v30, %v391_v28  ;;  %v344_v33 = vpop.f32.mrb[3].mxu1 }
 0x2fb   :  { %v345_v35 = vadd.f32 %v391_v28, %v344_v33 }
 0x2fc   :  { %v424_v36 = vpack.c.bf16 %v353_v32, %v350_v31 }
 0x2fd   :  { %v419_v37 = vpack.c.bf16 %v345_v35, %v342_v34 }
 0x2fe   :  { %427 = vst [vmem:[%s651_s7 + $0x8] sm:$0xff] %v424_v36  }
 0x2ff   :  { %420 = vst [vmem:[%s651_s7] sm:$0xff] %v419_v37  }

// kernel: _lambda_.41
= control target key start
LH: loop header
LB: loop body
LE: loop exit
PB: predicated region body
PF: predicated region fallthrough
CT: control target
= control target key end

     0   :  { %s491_s1 = inlined_call_operand.vmem [shape: bf16[128,128], index: 1, kind: input, shape index: {}]   ;;  %s492_s0 = inlined_call_operand.vmem [shape: bf16[32,128], index: 0, kind: input, shape index: {}]   ;;  %s493_s3 = inlined_call_operand.vmem [shape: bf16[128,128], index: 3, kind: input, shape index: {}]   ;;  %s494_s2 = inlined_call_operand.vmem [shape: f32[1,128], index: 2, kind: input, shape index: {}, may-alias: {2,4}]   ;;  %s495_s4 = inlined_call_operand.vmem [shape: f32[1,128], index: 4, kind: input, shape index: {}, may-alias: {2,4}]   ;;  %s496_s5 = inlined_call_operand.vmem [shape: f32[32,128], index: 5, kind: output, shape index: {}]  }
   0x1   :  { %v371_v0 = vld [vmem:[%s491_s1] sm:$0xff]   ;;  %v372_v1 = vld [vmem:[%s491_s1 + $0x8] sm:$0xff]   ;;  %v373_v2 = vld [vmem:[%s491_s1 + $0x10] sm:$0xff]  }
   0x2   :  { %331 = vmatprep.subr.bf16.mxu0 %v371_v0  ;;  %v374_v3 = vld [vmem:[%s491_s1 + $0x18] sm:$0xff]   ;;  %v379_v4 = vld [vmem:[%s492_s0] sm:$0xff]   ;;  %v382_v6 = vld [vmem:[%s493_s3 + $0x8] sm:$0xff]  }
   0x3   :  { %332 = vmatpush3.bf16.msra.mxu0 %v371_v0  ;;  %347 = vmatprep.mubr.bf16.mxu0 %v379_v4  ;;  %v381_v5 = vld [vmem:[%s493_s3] sm:$0xff]   ;;  %v383_v8 = vld [vmem:[%s493_s3 + $0x10] sm:$0xff]   ;;  %v376_v9 = vld [vmem:[%s491_s1 + $0x28] sm:$0xff]  }
   0x4   :  { %333 = vmatprep.subr.bf16.mxu0 %v372_v1  ;;  %v375_v7 = vld [vmem:[%s491_s1 + $0x20] sm:$0xff]   ;;  %351 = vmatprep.subr.bf16.mxu1 %v381_v5  ;;  %v384_v10 = vld [vmem:[%s493_s3 + $0x18] sm:$0xff]   ;;  %v377_v11 = vld [vmem:[%s491_s1 + $0x30] sm:$0xff]  }
   0x5   :  { %352 = vmatpush3.bf16.msra.mxu1 %v381_v5  ;;  %v385_v12 = vld [vmem:[%s493_s3 + $0x20] sm:$0xff]   ;;  %v378_v13 = vld [vmem:[%s491_s1 + $0x38] sm:$0xff]   ;;  %v386_v14 = vld [vmem:[%s493_s3 + $0x28] sm:$0xff]  }
   0x6   :  { %353 = vmatprep.subr.bf16.mxu1 %v382_v6  ;;  %v380_v15 = vld [vmem:[%s492_s0 + $0x8] sm:$0xff]   ;;  %v387_v16 = vld [vmem:[%s493_s3 + $0x30] sm:$0xff]   ;;  %v388_v17 = vld [vmem:[%s493_s3 + $0x38] sm:$0xff]  }
   0x7   :  { %334 = vmatpush3.bf16.msra.mxu0 %v372_v1  ;;  %v291_v18 = vld [vmem:[%s494_s2] ss:$0 sm:$0xff] }
   0x8   :  { %335 = vmatprep.subr.bf16.mxu0 %v373_v2  ;;  %v302_v33 = vld [vmem:[%s495_s4] ss:$0 sm:$0xff] }
   0x9   :  { %354 = vmatpush3.bf16.msra.mxu1 %v382_v6 }
   0xa   :  { %355 = vmatprep.subr.bf16.mxu1 %v383_v8 }
   0xb   :  { %336 = vmatpush3.bf16.msra.mxu0 %v373_v2 }
   0xc   :  { %337 = vmatprep.subr.bf16.mxu0 %v374_v3 }
   0xd   :  { %356 = vmatpush3.bf16.msra.mxu1 %v383_v8 }
   0xe   :  { %357 = vmatprep.subr.bf16.mxu1 %v384_v10 }
   0xf   :  { %338 = vmatpush3.bf16.msra.mxu0 %v374_v3 }
  0x10   :  { %339 = vmatprep.subr.bf16.mxu0 %v375_v7 }
  0x11   :  { %358 = vmatpush3.bf16.msra.mxu1 %v384_v10 }
  0x12   :  { %359 = vmatprep.subr.bf16.mxu1 %v385_v12 }
  0x13   :  { %340 = vmatpush3.bf16.msra.mxu0 %v375_v7 }
  0x14   :  { %341 = vmatprep.subr.bf16.mxu0 %v376_v9 }
  0x15   :  { %360 = vmatpush3.bf16.msra.mxu1 %v385_v12 }
  0x16   :  { %361 = vmatprep.subr.bf16.mxu1 %v386_v14 }
  0x17   :  { %342 = vmatpush3.bf16.msra.mxu0 %v376_v9 }
  0x18   :  { %343 = vmatprep.subr.bf16.mxu0 %v377_v11 }
  0x19   :  { %362 = vmatpush3.bf16.msra.mxu1 %v386_v14 }
  0x1a   :  { %363 = vmatprep.subr.bf16.mxu1 %v387_v16 }
  0x1b   :  { %344 = vmatpush3.bf16.msra.mxu0 %v377_v11 }
  0x1c   :  { %345 = vmatprep.subr.bf16.mxu0 %v378_v13 }
  0x1d   :  { %364 = vmatpush3.bf16.msra.mxu1 %v387_v16 }
  0x1e   :  { %365 = vmatprep.subr.bf16.mxu1 %v388_v17 }
  0x1f   :  { %346 = vmatpush3.bf16.msra.mxu0 %v378_v13 }
  0x21   :  { %366 = vmatpush3.bf16.msra.mxu1 %v388_v17 }
  0x22   :  { %348 = vmatmul.mubr.bf16.vlgmr.msra.gmra.mrb[0].mxu0 %v380_v15 }
  0xf5   :  { %v349_v19 = vpop.f32.mrb[0].mxu0 }
  0xf6   :  { %v151_v20 = vadd.f32 %v349_v19, %v291_v18  ;;  %v142_v21 = vpop.f32.mrb[1].mxu0 }
  0xf7   :  { %v143_v22 = vadd.f32 %v291_v18, %v142_v21  ;;  %v350_v23 = vpop.f32.mrb[2].mxu0 }
  0xf8   :  { %v154_v24 = vadd.f32 %v350_v23, %v291_v18  ;;  %v145_v25 = vpop.f32.mrb[3].mxu0  ;;  %v159_v27 = vmax.f32 %v151_v20, 0.0 }
  0xf9   :  { %v146_v26 = vadd.f32 %v291_v18, %v145_v25  ;;  %v157_v29 = vmax.f32 %v143_v22, 0.0 }
  0xfa   :  { %v160_v28 = vmax.f32 %v154_v24, 0.0 }
  0xfb   :  { %v158_v30 = vmax.f32 %v146_v26, 0.0 }
  0xfc   :  { %v162_v31 = vpack.c.bf16 %v160_v28, %v159_v27 }
  0xfd   :  { %v161_v32 = vpack.c.bf16 %v158_v30, %v157_v29 }
  0xff   :  { %367 = vmatprep.mubr.bf16.mxu1 %v161_v32 }
 0x100   :  { %368 = vmatmul.mubr.bf16.vlgmr.msra.gmra.mrb[0].mxu1 %v162_v31 }
 0x1d3   :  { %v369_v34 = vpop.f32.mrb[0].mxu1 }
 0x1d4   :  { %v277_v35 = vadd.f32 %v369_v34, %v302_v33  ;;  %v268_v36 = vpop.f32.mrb[1].mxu1 }
 0x1d5   :  { %v269_v37 = vadd.f32 %v302_v33, %v268_v36  ;;  %v370_v38 = vpop.f32.mrb[2].mxu1 }
 0x1d6   :  { %285 = vst [vmem:[%s496_s5 + $0x10] sm:$0xff] %v277_v35  ;;  %v280_v39 = vadd.f32 %v370_v38, %v302_v33  ;;  %v271_v40 = vpop.f32.mrb[3].mxu1 }
 0x1d7   :  { %283 = vst [vmem:[%s496_s5] sm:$0xff] %v269_v37  ;;  %v272_v41 = vadd.f32 %v302_v33, %v271_v40 }
 0x1d8   :  { %286 = vst [vmem:[%s496_s5 + $0x18] sm:$0xff] %v280_v39 }
 0x1d9   :  { %284 = vst [vmem:[%s496_s5 + $0x8] sm:$0xff] %v272_v41 }

</bundles_post_ra>
